<compile_context>
chip_gen: v7x
topology: tpu7x:2x2x1
jax: 0.10.0
libtpu: 0.0.40
codegen_flags: <defaults>
</compile_context>

<pallas_src>
import functools

import jax
import jax.numpy as jnp
import numpy as np
from jax.experimental import pallas as pl
from jax.experimental.pallas import tpu as pltpu

BN_EPS = 1e-5
H1, H2 = 400, 300            # module hidden sizes
H1_PAD, H2_PAD = 512, 384    # lane-multiple padded sizes


def _round_up(x, m):
    return (x + m - 1) // m * m


def actor_kernel(x_ref, w1_ref, b1_ref, gamma_ref, beta_ref,
                 w2_ref, b2_ref, w3_ref, b3_ref, out_ref,
                 *, n_valid, apply_mask):
    # ---- fc1 (MXU: bf16 x bf16 -> f32 accumulate) ----
    h1 = jnp.dot(x_ref[...].astype(jnp.bfloat16), w1_ref[...],
                 preferred_element_type=jnp.float32) + b1_ref[...]

    # ---- BatchNorm1d, training mode: biased batch stats over the n_valid real
    #      rows (zero-padded batch rows are masked out of the statistics) ----
    inv_n = 1.0 / n_valid
    if apply_mask:
        row = jax.lax.broadcasted_iota(jnp.int32, h1.shape, 0)
        mask = (row < n_valid).astype(jnp.float32)
        mean = jnp.sum(h1 * mask, axis=0, keepdims=True) * inv_n
        d = (h1 - mean) * mask
        var = jnp.sum(d * d, axis=0, keepdims=True) * inv_n
    else:
        mean = jnp.sum(h1, axis=0, keepdims=True) * inv_n
        d = h1 - mean
        var = jnp.sum(d * d, axis=0, keepdims=True) * inv_n
    inv_std = jax.lax.rsqrt(var + BN_EPS)
    # Folded affine: one mul + one add per element instead of sub/mul/mul/add.
    scale = gamma_ref[...] * inv_std
    shift = beta_ref[...] - mean * scale
    h1 = jnp.maximum(h1 * scale + shift, 0.0)

    # ---- fc2 + ReLU ----
    h2 = jnp.dot(h1.astype(jnp.bfloat16), w2_ref[...],
                 preferred_element_type=jnp.float32) + b2_ref[...]
    h2 = jnp.maximum(h2, 0.0)

    # ---- fc3 (NoisyLinear, effective weights folded in glue) + tanh ----
    h3 = jnp.dot(h2.astype(jnp.bfloat16), w3_ref[...],
                 preferred_element_type=jnp.float32) + b3_ref[...]
    out_ref[...] = jnp.tanh(h3)


def actor_forward(states, kp, action_length):
    """states: (B, state_length) f32; kp: padded/bf16 kernel params."""
    B, _ = states.shape
    B_pad = _round_up(max(B, 8), 8)
    if B_pad != B:
        states = jnp.pad(states, ((0, B_pad - B), (0, 0)))
    a_pad = kp["w3"].shape[1]

    vmem = pl.BlockSpec(memory_space=pltpu.MemorySpace.VMEM)
    args = (states, kp["w1"], kp["b1"], kp["gamma"], kp["beta"],
            kp["w2"], kp["b2"], kp["w3"], kp["b3"])
    kernel = functools.partial(actor_kernel, n_valid=B,
                               apply_mask=(B_pad != B))
    out = pl.pallas_call(
        kernel,
        out_shape=jax.ShapeDtypeStruct((B_pad, a_pad), jnp.float32),
        in_specs=[vmem] * len(args),
        out_specs=vmem,
    )(*args)
    return out[:B, :action_length]


def init_params(key, state_length, action_length):
    """Canonical f32 params mirroring the PyTorch module's init.

    fc1/fc2 weights: uniform(+-1/sqrt(out_features))  (weight_range uses size()[0]).
    Biases: PyTorch default uniform(+-1/sqrt(in_features)).
    fc3 (NoisyLinear): effective weight = mu + sigma * eps (factorized noise),
    folded here in glue (sample_epsilon has no in-kernel equivalent).
    Weights are stored (in_features, out_features) so the kernel computes x @ W + b.
    """
    ks = jax.random.split(key, 8)

    r1 = 1.0 / np.sqrt(H1)
    w1 = jax.random.uniform(ks[0], (state_length, H1), jnp.float32, -r1, r1)
    b1 = jax.random.uniform(ks[1], (1, H1), jnp.float32,
                            -1.0 / np.sqrt(state_length), 1.0 / np.sqrt(state_length))
    gamma = jnp.ones((1, H1), jnp.float32)   # BatchNorm1d default affine init
    beta = jnp.zeros((1, H1), jnp.float32)

    r2 = 1.0 / np.sqrt(H2)
    w2 = jax.random.uniform(ks[2], (H1, H2), jnp.float32, -r2, r2)
    b2 = jax.random.uniform(ks[3], (1, H2), jnp.float32,
                            -1.0 / np.sqrt(H1), 1.0 / np.sqrt(H1))

    mu_range = 1.0 / np.sqrt(H2)
    w3_mu = jax.random.uniform(ks[4], (H2, action_length), jnp.float32,
                               -mu_range, mu_range)
    b3_mu = jax.random.uniform(ks[5], (1, action_length), jnp.float32,
                               -mu_range, mu_range)
    sigma0 = 0.5 / np.sqrt(H2)
    f = lambda x: jnp.sign(x) * jnp.sqrt(jnp.abs(x))
    eps_in = f(jax.random.normal(ks[6], (H2, 1), jnp.float32))
    eps_out = f(jax.random.normal(ks[7], (1, action_length), jnp.float32))
    w3 = w3_mu + sigma0 * (eps_in * eps_out)
    b3 = b3_mu + sigma0 * eps_out

    return dict(w1=w1, b1=b1, gamma=gamma, beta=beta,
                w2=w2, b2=b2, w3=w3, b3=b3)


def prepare_kernel_params(p, action_length):
    """Zero-pad feature dims to lane multiples and cast matmul weights to bf16.

    Padded gamma/beta columns are 0, so padded BN features come out exactly 0;
    padded weight rows/cols are 0, so the padded lanes never affect real outputs.
    """
    a_pad = _round_up(action_length, 128)
    padc = lambda a, cols: jnp.pad(a, ((0, 0), (0, cols - a.shape[1])))

    return dict(
        w1=padc(p["w1"], H1_PAD).astype(jnp.bfloat16),
        b1=padc(p["b1"], H1_PAD),
        gamma=padc(p["gamma"], H1_PAD),
        beta=padc(p["beta"], H1_PAD),
        w2=jnp.pad(p["w2"], ((0, H1_PAD - H1), (0, H2_PAD - H2))).astype(jnp.bfloat16),
        b2=padc(p["b2"], H2_PAD),
        w3=jnp.pad(p["w3"], ((0, H2_PAD - H2), (0, a_pad - action_length))).astype(jnp.bfloat16),
        b3=padc(p["b3"], a_pad),
    )


def actor_ref_f32(states, p):
    """Pure f32 reference (exact module semantics)."""
    h1 = states @ p["w1"] + p["b1"]
    mean = jnp.mean(h1, axis=0, keepdims=True)
    var = jnp.mean((h1 - mean) ** 2, axis=0, keepdims=True)
    h1 = jnp.maximum((h1 - mean) * jax.lax.rsqrt(var + BN_EPS) * p["gamma"] + p["beta"], 0.0)
    h2 = jnp.maximum(h1 @ p["w2"] + p["b2"], 0.0)
    return jnp.tanh(h2 @ p["w3"] + p["b3"])


def actor_ref_bf16(states, p):
    """Reference matching the kernel's bf16-operand / f32-accumulate matmuls."""
    bf = lambda a: a.astype(jnp.bfloat16)
    dot = lambda a, b: jnp.dot(bf(a), bf(b), preferred_element_type=jnp.float32)
    h1 = dot(states, p["w1"]) + p["b1"]
    mean = jnp.mean(h1, axis=0, keepdims=True)
    var = jnp.mean((h1 - mean) ** 2, axis=0, keepdims=True)
    h1 = jnp.maximum((h1 - mean) * jax.lax.rsqrt(var + BN_EPS) * p["gamma"] + p["beta"], 0.0)
    h2 = jnp.maximum(dot(h1, p["w2"]) + p["b2"], 0.0)
    return jnp.tanh(dot(h2, p["w3"]) + p["b3"])


if __name__ == "__main__":
    key = jax.random.PRNGKey(0)
    k_param, k_state1, k_state2 = jax.random.split(key, 3)

    state_length, action_length = 16, 4
    params = init_params(k_param, state_length, action_length)
    kparams = prepare_kernel_params(params, action_length)

    # Primary run: batch=256 rows — fills the MXU and amortizes launch overhead.
    states = jax.random.normal(k_state1, (256, state_length), jnp.float32)
    out = jax.block_until_ready(actor_forward(states, kparams, action_length))
    np.testing.assert_allclose(np.asarray(out),
                               np.asarray(actor_ref_bf16(states, params)),
                               rtol=2e-3, atol=2e-3)
    np.testing.assert_allclose(np.asarray(out),
                               np.asarray(actor_ref_f32(states, params)),
                               rtol=5e-2, atol=5e-2)

    # Secondary run: ragged batch (exercises batch padding + masked-BN stats).
    states_s = jax.random.normal(k_state2, (10, state_length), jnp.float32)
    out_s = jax.block_until_ready(actor_forward(states_s, kparams, action_length))
    np.testing.assert_allclose(np.asarray(out_s),
                               np.asarray(actor_ref_bf16(states_s, params)),
                               rtol=2e-3, atol=2e-3)

    print("KERNEL_OK")
</pallas_src>

<mosaic_0001>
module attributes {stable_mosaic.version = 11 : i64} {
  func.func @actor_kernel(%arg0: memref<256x16xf32, #tpu.memory_space<vmem>>, %arg1: memref<16x512xbf16, #tpu.memory_space<vmem>>, %arg2: memref<1x512xf32, #tpu.memory_space<vmem>>, %arg3: memref<1x512xf32, #tpu.memory_space<vmem>>, %arg4: memref<1x512xf32, #tpu.memory_space<vmem>>, %arg5: memref<512x384xbf16, #tpu.memory_space<vmem>>, %arg6: memref<1x384xf32, #tpu.memory_space<vmem>>, %arg7: memref<384x128xbf16, #tpu.memory_space<vmem>>, %arg8: memref<1x128xf32, #tpu.memory_space<vmem>>, %arg9: memref<256x128xf32, #tpu.memory_space<vmem>>) attributes {dimension_semantics = [], scalar_prefetch = 0 : i64, scratch_operands = 0 : i64, tpu.core_type = #tpu.core_type<tc>} {
    %c0 = arith.constant 0 : index
    %c0_0 = arith.constant 0 : index
    %0 = vector.load %arg0[%c0, %c0_0] : memref<256x16xf32, #tpu.memory_space<vmem>>, vector<256x16xf32>
    %1 = arith.truncf %0 : vector<256x16xf32> to vector<256x16xbf16>
    %c0_1 = arith.constant 0 : index
    %c0_2 = arith.constant 0 : index
    %2 = vector.load %arg1[%c0_1, %c0_2] : memref<16x512xbf16, #tpu.memory_space<vmem>>, vector<16x512xbf16>
    %cst = arith.constant dense<0.000000e+00> : vector<256x512xf32>
    %3 = tpu.matmul %1, %2, %cst {dimension_numbers = #tpu.dot_dimension_numbers<[1], [0], [0], [1], [0, 0, 1, 1], [], []>} : vector<256x16xbf16>, vector<16x512xbf16>, vector<256x512xf32> -> vector<256x512xf32>
    %c0_3 = arith.constant 0 : index
    %c0_4 = arith.constant 0 : index
    %4 = vector.load %arg2[%c0_3, %c0_4] : memref<1x512xf32, #tpu.memory_space<vmem>>, vector<1x512xf32>
    %5 = vector.broadcast %4 : vector<1x512xf32> to vector<256x512xf32>
    %6 = arith.addf %3, %5 : vector<256x512xf32>
    %cst_5 = arith.constant dense<0.000000e+00> : vector<512xf32>
    %7 = vector.multi_reduction <add>, %6, %cst_5 [0] : vector<256x512xf32> to vector<512xf32>
    %8 = vector.shape_cast %7 : vector<512xf32> to vector<1x512xf32>
    %cst_6 = arith.constant 3.906250e-03 : f32
    %9 = vector.broadcast %cst_6 : f32 to vector<1x512xf32>
    %10 = arith.mulf %8, %9 : vector<1x512xf32>
    %11 = vector.broadcast %10 : vector<1x512xf32> to vector<256x512xf32>
    %12 = arith.subf %6, %11 : vector<256x512xf32>
    %13 = arith.mulf %12, %12 : vector<256x512xf32>
    %cst_7 = arith.constant dense<0.000000e+00> : vector<512xf32>
    %14 = vector.multi_reduction <add>, %13, %cst_7 [0] : vector<256x512xf32> to vector<512xf32>
    %15 = vector.shape_cast %14 : vector<512xf32> to vector<1x512xf32>
    %cst_8 = arith.constant 3.906250e-03 : f32
    %16 = vector.broadcast %cst_8 : f32 to vector<1x512xf32>
    %17 = arith.mulf %15, %16 : vector<1x512xf32>
    %cst_9 = arith.constant 9.99999974E-6 : f32
    %18 = vector.broadcast %cst_9 : f32 to vector<1x512xf32>
    %19 = arith.addf %17, %18 : vector<1x512xf32>
    %20 = math.rsqrt %19 : vector<1x512xf32>
    %c0_10 = arith.constant 0 : index
    %c0_11 = arith.constant 0 : index
    %21 = vector.load %arg3[%c0_10, %c0_11] : memref<1x512xf32, #tpu.memory_space<vmem>>, vector<1x512xf32>
    %22 = arith.mulf %21, %20 : vector<1x512xf32>
    %c0_12 = arith.constant 0 : index
    %c0_13 = arith.constant 0 : index
    %23 = vector.load %arg4[%c0_12, %c0_13] : memref<1x512xf32, #tpu.memory_space<vmem>>, vector<1x512xf32>
    %24 = arith.mulf %10, %22 : vector<1x512xf32>
    %25 = arith.subf %23, %24 : vector<1x512xf32>
    %26 = vector.broadcast %22 : vector<1x512xf32> to vector<256x512xf32>
    %27 = arith.mulf %6, %26 : vector<256x512xf32>
    %28 = vector.broadcast %25 : vector<1x512xf32> to vector<256x512xf32>
    %29 = arith.addf %27, %28 : vector<256x512xf32>
    %cst_14 = arith.constant 0.000000e+00 : f32
    %30 = vector.broadcast %cst_14 : f32 to vector<256x512xf32>
    %31 = arith.maximumf %29, %30 : vector<256x512xf32>
    %32 = arith.truncf %31 : vector<256x512xf32> to vector<256x512xbf16>
    %c0_15 = arith.constant 0 : index
    %c0_16 = arith.constant 0 : index
    %33 = vector.load %arg5[%c0_15, %c0_16] : memref<512x384xbf16, #tpu.memory_space<vmem>>, vector<512x384xbf16>
    %cst_17 = arith.constant dense<0.000000e+00> : vector<256x384xf32>
    %34 = tpu.matmul %32, %33, %cst_17 {dimension_numbers = #tpu.dot_dimension_numbers<[1], [0], [0], [1], [0, 0, 1, 1], [], []>} : vector<256x512xbf16>, vector<512x384xbf16>, vector<256x384xf32> -> vector<256x384xf32>
    %c0_18 = arith.constant 0 : index
    %c0_19 = arith.constant 0 : index
    %35 = vector.load %arg6[%c0_18, %c0_19] : memref<1x384xf32, #tpu.memory_space<vmem>>, vector<1x384xf32>
    %36 = vector.broadcast %35 : vector<1x384xf32> to vector<256x384xf32>
    %37 = arith.addf %34, %36 : vector<256x384xf32>
    %cst_20 = arith.constant 0.000000e+00 : f32
    %38 = vector.broadcast %cst_20 : f32 to vector<256x384xf32>
    %39 = arith.maximumf %37, %38 : vector<256x384xf32>
    %40 = arith.truncf %39 : vector<256x384xf32> to vector<256x384xbf16>
    %c0_21 = arith.constant 0 : index
    %c0_22 = arith.constant 0 : index
    %41 = vector.load %arg7[%c0_21, %c0_22] : memref<384x128xbf16, #tpu.memory_space<vmem>>, vector<384x128xbf16>
    %cst_23 = arith.constant dense<0.000000e+00> : vector<256x128xf32>
    %42 = tpu.matmul %40, %41, %cst_23 {dimension_numbers = #tpu.dot_dimension_numbers<[1], [0], [0], [1], [0, 0, 1, 1], [], []>} : vector<256x384xbf16>, vector<384x128xbf16>, vector<256x128xf32> -> vector<256x128xf32>
    %c0_24 = arith.constant 0 : index
    %c0_25 = arith.constant 0 : index
    %43 = vector.load %arg8[%c0_24, %c0_25] : memref<1x128xf32, #tpu.memory_space<vmem>>, vector<1x128xf32>
    %44 = vector.broadcast %43 : vector<1x128xf32> to vector<256x128xf32>
    %45 = arith.addf %42, %44 : vector<256x128xf32>
    %46 = math.tanh %45 : vector<256x128xf32>
    %c0_26 = arith.constant 0 : index
    %c0_27 = arith.constant 0 : index
    %47 = vector.load %arg9[%c0_26, %c0_27] : memref<256x128xf32, #tpu.memory_space<vmem>>, vector<256x128xf32>
    tpu.vector_store %arg9[%c0_26, %c0_27], %46 {strides = array<i32>} : memref<256x128xf32, #tpu.memory_space<vmem>>, vector<256x128xf32>,
    return
  }
}

</mosaic_0001>

<bundles_post_ra>
// kernel: tpu_custom_call.1
= control target key start
LH: loop header
LB: loop body
LE: loop exit
PB: predicated region body
PF: predicated region fallthrough
CT: control target
= control target key end

     0   :  { %14 = vsyncpa [#allocation3], 0  ;;  %s7274_s0 = inlined_call_operand.vmem [shape: f32[256,16], index: 0, kind: input, shape index: {}]   ;;  %s7275_s1 = inlined_call_operand.vmem [shape: bf16[16,512], index: 1, kind: input, shape index: {}]   ;;  %s7276_s2 = inlined_call_operand.vmem [shape: f32[1,512], index: 2, kind: input, shape index: {}]   ;;  %s7277_s3 = inlined_call_operand.vmem [shape: f32[1,512], index: 3, kind: input, shape index: {}]   ;;  %s7278_s4 = inlined_call_operand.vmem [shape: f32[1,512], index: 4, kind: input, shape index: {}]   ;;  %s7279_s5 = inlined_call_operand.hbm [shape: bf16[512,384], index: 5, kind: input, shape index: {}]   ;;  %s7280_s6 = inlined_call_operand.vmem [shape: f32[1,384], index: 6, kind: input, shape index: {}]   ;;  %s7281_s7 = inlined_call_operand.vmem [shape: bf16[384,128], index: 7, kind: input, shape index: {}]   ;;  %s7282_s8 = inlined_call_operand.vmem [shape: f32[1,128], index: 8, kind: input, shape index: {}]   ;;  %s7283_s9 = inlined_call_operand.hbm [shape: f32[256,128], index: 9, kind: output, shape index: {}]  }
   0x1   :  { %15 = vsyncpa [#allocation4], 0  ;;  %s4793_s30 = smov [#allocation2]   ;;  %s4745_s13 = scalar_lea.hbm %s7279_s5, 12288 }
   0x2   :  { %s31_s10 = sshll.u32 %s4793_s30, 4  ;;  %p4746_p0 = scmp.ne.s32.totalorder %s7279_s5, %s4745_s13  ;;  %s32_s10 = int_to_ptr.vmem [resolvable:$true] %s31_s10 }
   0x3   :  { %p4749_p1 = scmp.lt.u32.totalorder %s4745_s13, %s7279_s5 }
   0x5   :  { %p4751_p2 = pnand %p4749_p1, %p4746_p0 }
   0x7   :  { %4754 = shalt.err (!%p4751_p2)
}
   0x8   :  { %s4755_s18 = scalar_lea.vmem %s32_s10, 12288  ;;  %p4760_p4 = scmp.lt.s32.totalorder %s32_s10, %s32_s10 }
   0x9   :  { %p4756_p3 = scmp.ne.s32.totalorder %s32_s10, %s4755_s18  ;;  %p4761_p5 = scmp.lt.s32.totalorder %s4755_s18, %s4755_s18 }
   0xb   :  { %p4762_p6 = por %p4761_p5, %p4760_p4 }
   0xd   :  { %p4763_p7 = pnand %p4762_p6, %p4756_p3 }
   0xf   :  { %4766 = shalt.err (!%p4763_p7)
}
  0x10   :  { %s4794_s19 = smov 192   ;;  %s4795_s20 = smov 12  }
  0x11   :  { %37 = dma.hbm_to_vmem [thread:$0]  %s7279_s5, 12288, %s32_s10, [#allocation3], %s4794_s19, %s4794_s19, %s4795_s20  }
  0x12   :  { %4789 = dma.done.wait [#allocation3], 12288  }
  0x13   :  { %4790 = vsyncadd [#allocation3], 4294955008  ;;  %v4796_v0 = vmov 0   ;;  %v4515_v1 = vld [vmem:[%s7275_s1 + $0x4] ss:$16 sps:$4 sm:$0xff]   ;;  %v49_v4 = vld [vmem:[%s7274_s0 + $0x8] sm:$0xff]  ;;  %v102_v53 = vlaneseq }
  0x14   :  { %223 = vmatprep.mubr.bf16.mxu0 %v4796_v0  ;;  %343 = vmatprep.mubr.bf16.mxu1 %v4796_v0  ;;  %v4517_v2 = vld [vmem:[%s7275_s1] ss:$16 sps:$4 sm:$0xff]   ;;  %v73_v7 = vld [vmem:[%s7274_s0 + $0xc8] sm:$0xff]  ;;  %vm142_vm0 = vcmask 130048   ;;  %v51_v12 = vld [vmem:[%s7274_s0 + $0x18] sm:$0xff] }
  0x15   :  { %v48_v3 = vld [vmem:[%s7274_s0] sm:$0xff]  ;;  %191 = vmatprep.subr.bf16.mxu0 %v4515_v1  ;;  %4377 = vmatprep.subr.bf16.mxu1 %v4515_v1  ;;  %v4518_v9 = vld [vmem:[%s7275_s1 + $0x8] ss:$16 sps:$4 sm:$0xff]   ;;  %v4520_v10 = vld [vmem:[%s7275_s1 + $0xc] ss:$16 sps:$4 sm:$0xff]   ;;  %v5051_v54 = vshrl.u32 %v102_v53, 7 }
  0x16   :  { %v80_v5 = vpack.c.bf16 %v49_v4, %v48_v3  ;;  %v72_v6 = vld [vmem:[%s7274_s0 + $0xc0] sm:$0xff]  ;;  %192 = vmatpush1.bf16.msra.mxu0 %v4517_v2  ;;  %4378 = vmatpush1.bf16.msra.mxu1 %v4517_v2  ;;  %v50_v11 = vld [vmem:[%s7274_s0 + $0x10] sm:$0xff]  ;;  %v75_v14 = vld [vmem:[%s7274_s0 + $0xd8] sm:$0xff] }
  0x17   :  { %v4883_v8 = vpack.c.bf16 %v73_v7, %v72_v6  ;;  %384 = vmatprep.subr.bf16.mxu1 %v4520_v10  ;;  %v74_v13 = vld [vmem:[%s7274_s0 + $0xd0] sm:$0xff]  ;;  %v81_v15 = vpack.c.bf16 %v51_v12, %v50_v11  ;;  %v52_v17 = vld [vmem:[%s7274_s0 + $0x20] sm:$0xff]  ;;  %v53_v18 = vld [vmem:[%s7274_s0 + $0x28] sm:$0xff]  ;;  %7526 = vst [vmem:[#allocation8_spill] sm:$0xff] %v5051_v54  ;;  %v5054_v55 = vsub.s32 0, %v5051_v54  ;;  %v5062_v57 = vsub.s32 1, %v5051_v54 }
  0x18   :  { %v4908_v16 = vpack.c.bf16 %v75_v14, %v74_v13  ;;  %v76_v19 = vld [vmem:[%s7274_s0 + $0xe0] sm:$0xff]  ;;  %v77_v20 = vld [vmem:[%s7274_s0 + $0xe8] sm:$0xff]  ;;  %v82_v21 = vpack.c.bf16 %v53_v18, %v52_v17  ;;  %v54_v23 = vld [vmem:[%s7274_s0 + $0x30] sm:$0xff] }
  0x19   :  { %3816 = vmatmul.mubr.msk.bf16.vlgmr.msra.gmra.mrb[0].mxu0 %vm142_vm0, %v80_v5  ;;  %3828 = vmatmul.mubr.msk.bf16.vlgmr.msra.gmra.mrb[0].mxu1 %vm142_vm0, %v4883_v8  ;;  %v4927_v22 = vpack.c.bf16 %v77_v20, %v76_v19  ;;  %v55_v24 = vld [vmem:[%s7274_s0 + $0x38] sm:$0xff]  ;;  %v78_v25 = vld [vmem:[%s7274_s0 + $0xf0] sm:$0xff]  ;;  %v56_v29 = vld [vmem:[%s7274_s0 + $0x40] sm:$0xff]  ;;  %7527 = vst [vmem:[#allocation9_spill] sm:$0xff] %v5054_v55 }
  0x1a   :  { %385 = vmatpush1.bf16.msra.mxu1 %v4518_v9  ;;  %233 = vmatprep.mubr.bf16.mxu0 %v4796_v0  ;;  %v79_v26 = vld [vmem:[%s7274_s0 + $0xf8] sm:$0xff]  ;;  %v83_v27 = vpack.c.bf16 %v55_v24, %v54_v23  ;;  %v57_v30 = vld [vmem:[%s7274_s0 + $0x48] sm:$0xff]  ;;  %v58_v32 = vld [vmem:[%s7274_s0 + $0x50] sm:$0xff]  ;;  %7528 = vst [vmem:[#allocation10_spill] sm:$0xff] %v5062_v57 }
  0x1b   :  { %353 = vmatprep.mubr.bf16.mxu1 %v4796_v0  ;;  %v4946_v28 = vpack.c.bf16 %v79_v26, %v78_v25  ;;  %v84_v31 = vpack.c.bf16 %v57_v30, %v56_v29  ;;  %v59_v33 = vld [vmem:[%s7274_s0 + $0x58] sm:$0xff]  ;;  %v60_v35 = vld [vmem:[%s7274_s0 + $0x60] sm:$0xff]  ;;  %v61_v36 = vld [vmem:[%s7274_s0 + $0x68] sm:$0xff] }
  0x1c   :  { %v85_v34 = vpack.c.bf16 %v59_v33, %v58_v32  ;;  %v86_v37 = vpack.c.bf16 %v61_v36, %v60_v35  ;;  %v62_v38 = vld [vmem:[%s7274_s0 + $0x70] sm:$0xff]  ;;  %v63_v39 = vld [vmem:[%s7274_s0 + $0x78] sm:$0xff]  ;;  %v64_v41 = vld [vmem:[%s7274_s0 + $0x80] sm:$0xff] }
  0x1d   :  { %v87_v40 = vpack.c.bf16 %v63_v39, %v62_v38  ;;  %v65_v42 = vld [vmem:[%s7274_s0 + $0x88] sm:$0xff]  ;;  %v66_v44 = vld [vmem:[%s7274_s0 + $0x90] sm:$0xff]  ;;  %v67_v45 = vld [vmem:[%s7274_s0 + $0x98] sm:$0xff] }
  0x1e   :  { %v88_v43 = vpack.c.bf16 %v65_v42, %v64_v41  ;;  %v89_v46 = vpack.c.bf16 %v67_v45, %v66_v44  ;;  %v68_v47 = vld [vmem:[%s7274_s0 + $0xa0] sm:$0xff]  ;;  %v69_v48 = vld [vmem:[%s7274_s0 + $0xa8] sm:$0xff]  ;;  %v70_v50 = vld [vmem:[%s7274_s0 + $0xb0] sm:$0xff] }
  0x1f   :  { %v90_v49 = vpack.c.bf16 %v69_v48, %v68_v47  ;;  %v71_v51 = vld [vmem:[%s7274_s0 + $0xb8] sm:$0xff]  ;;  %v5059_v56 = vld [vmem:[%s7276_s2] sm:$0xf] }
  0x20   :  { %v91_v52 = vpack.c.bf16 %v71_v51, %v70_v50  ;;  %v5068_v60 = vrot.slane %v5059_v56, %v5054_v55  ;;  %v5074_v63 = vrot.slane %v5059_v56, %v5062_v57 }
  0x21   :  { %3817 = vmatmul.mubr.msk.bf16.gmra.mrb[4].mxu0 %vm142_vm0, %v81_v15  ;;  %3829 = vmatmul.mubr.msk.bf16.gmra.mrb[4].mxu1 %vm142_vm0, %v4908_v16 }
  0x22   :  { %243 = vmatprep.mubr.bf16.mxu0 %v4796_v0  ;;  %363 = vmatprep.mubr.bf16.mxu1 %v4796_v0 }
  0x29   :  { %3818 = vmatmul.mubr.msk.bf16.gmra.mrb[8].mxu0 %vm142_vm0, %v82_v21  ;;  %3830 = vmatmul.mubr.msk.bf16.gmra.mrb[8].mxu1 %vm142_vm0, %v4927_v22 }
  0x2a   :  { %253 = vmatprep.mubr.bf16.mxu0 %v4796_v0  ;;  %373 = vmatprep.mubr.bf16.mxu1 %v4796_v0 }
  0x31   :  { %3819 = vmatmul.mubr.msk.bf16.gmra.mrb[12].mxu0 %vm142_vm0, %v83_v27  ;;  %3831 = vmatmul.mubr.msk.bf16.gmra.mrb[12].mxu1 %vm142_vm0, %v4946_v28 }
  0x32   :  { %263 = vmatprep.mubr.bf16.mxu0 %v4796_v0  ;;  %416 = vmatprep.mubr.bf16.mxu1 %v4796_v0 }
  0x39   :  { %3820 = vmatmul.mubr.msk.bf16.gmra.mrb[16].mxu0 %vm142_vm0, %v84_v31  ;;  %3832 = vmatmul.mubr.msk.bf16.vlgmr.msra.gmra.mrb[16].mxu1 %vm142_vm0, %v80_v5 }
  0x3a   :  { %273 = vmatprep.mubr.bf16.mxu0 %v4796_v0  ;;  %426 = vmatprep.mubr.bf16.mxu1 %v4796_v0 }
  0x41   :  { %3821 = vmatmul.mubr.msk.bf16.gmra.mrb[20].mxu0 %vm142_vm0, %v85_v34  ;;  %3833 = vmatmul.mubr.msk.bf16.gmra.mrb[20].mxu1 %vm142_vm0, %v81_v15 }
  0x42   :  { %283 = vmatprep.mubr.bf16.mxu0 %v4796_v0  ;;  %436 = vmatprep.mubr.bf16.mxu1 %v4796_v0 }
  0x49   :  { %3822 = vmatmul.mubr.msk.bf16.gmra.mrb[24].mxu0 %vm142_vm0, %v86_v37  ;;  %3834 = vmatmul.mubr.msk.bf16.gmra.mrb[24].mxu1 %vm142_vm0, %v82_v21 }
  0x4a   :  { %293 = vmatprep.mubr.bf16.mxu0 %v4796_v0  ;;  %446 = vmatprep.mubr.bf16.mxu1 %v4796_v0 }
  0x51   :  { %3823 = vmatmul.mubr.msk.bf16.gmra.mrb[28].mxu0 %vm142_vm0, %v87_v40  ;;  %3835 = vmatmul.mubr.msk.bf16.gmra.mrb[28].mxu1 %vm142_vm0, %v83_v27 }
  0x52   :  { %303 = vmatprep.mubr.bf16.mxu0 %v4796_v0  ;;  %456 = vmatprep.mubr.bf16.mxu1 %v4796_v0 }
  0x59   :  { %3824 = vmatmul.mubr.msk.bf16.gmra.mrb[32].mxu0 %vm142_vm0, %v88_v43  ;;  %3836 = vmatmul.mubr.msk.bf16.gmra.mrb[32].mxu1 %vm142_vm0, %v84_v31 }
  0x5a   :  { %313 = vmatprep.mubr.bf16.mxu0 %v4796_v0  ;;  %466 = vmatprep.mubr.bf16.mxu1 %v4796_v0 }
  0x61   :  { %3825 = vmatmul.mubr.msk.bf16.gmra.mrb[36].mxu0 %vm142_vm0, %v89_v46  ;;  %3837 = vmatmul.mubr.msk.bf16.gmra.mrb[36].mxu1 %vm142_vm0, %v85_v34 }
  0x62   :  { %323 = vmatprep.mubr.bf16.mxu0 %v4796_v0  ;;  %476 = vmatprep.mubr.bf16.mxu1 %v4796_v0 }
  0x69   :  { %3826 = vmatmul.mubr.msk.bf16.gmra.mrb[40].mxu0 %vm142_vm0, %v90_v49  ;;  %3838 = vmatmul.mubr.msk.bf16.gmra.mrb[40].mxu1 %vm142_vm0, %v86_v37 }
  0x6a   :  { %333 = vmatprep.mubr.bf16.mxu0 %v4796_v0  ;;  %486 = vmatprep.mubr.bf16.mxu1 %v4796_v0 }
  0x71   :  { %3827 = vmatmul.mubr.msk.bf16.gmra.mrb[44].mxu0 %vm142_vm0, %v91_v52  ;;  %3839 = vmatmul.mubr.msk.bf16.gmra.mrb[44].mxu1 %vm142_vm0, %v87_v40 }
  0x72   :  { %496 = vmatprep.mubr.bf16.mxu1 %v4796_v0 }
  0x79   :  { %3840 = vmatmul.mubr.msk.bf16.gmra.mrb[48].mxu1 %vm142_vm0, %v88_v43 }
  0x7a   :  { %506 = vmatprep.mubr.bf16.mxu1 %v4796_v0 }
  0x81   :  { %3841 = vmatmul.mubr.msk.bf16.gmra.mrb[52].mxu1 %vm142_vm0, %v89_v46 }
  0x82   :  { %516 = vmatprep.mubr.bf16.mxu1 %v4796_v0 }
  0x89   :  { %3842 = vmatmul.mubr.msk.bf16.gmra.mrb[56].mxu1 %vm142_vm0, %v90_v49 }
  0x8a   :  { %526 = vmatprep.mubr.bf16.mxu1 %v4796_v0 }
  0x91   :  { %3843 = vmatmul.mubr.msk.bf16.gmra.mrb[60].mxu1 %vm142_vm0, %v91_v52 }
  0x92   :  { %536 = vmatprep.mubr.bf16.mxu1 %v4796_v0 }
  0x99   :  { %3844 = vmatmul.mubr.msk.bf16.gmra.mrb[64].mxu1 %vm142_vm0, %v4883_v8 }
  0x9a   :  { %546 = vmatprep.mubr.bf16.mxu1 %v4796_v0 }
  0xa1   :  { %3845 = vmatmul.mubr.msk.bf16.gmra.mrb[68].mxu1 %vm142_vm0, %v4908_v16 }
  0xa2   :  { %556 = vmatprep.mubr.bf16.mxu1 %v4796_v0 }
  0xa9   :  { %3846 = vmatmul.mubr.msk.bf16.gmra.mrb[72].mxu1 %vm142_vm0, %v4927_v22 }
  0xaa   :  { %566 = vmatprep.mubr.bf16.mxu1 %v4796_v0 }
  0xb1   :  { %3847 = vmatmul.mubr.msk.bf16.gmra.mrb[76].mxu1 %vm142_vm0, %v4946_v28 }
  0xec   :  { %v5064_v58 = vpop.f32.mrb[0].mxu1  ;;  %v225_v59 = vpop.f32.mrb[0].mxu0 }
  0xed   :  { %v5070_v61 = vpop.f32.mrb[1].mxu1  ;;  %v227_v62 = vpop.f32.mrb[1].mxu0  ;;  %v5081_v3 = vadd.f32 %v225_v59, %v5068_v60 }
  0xee   :  { %v5076_v0 = vpop.f32.mrb[2].mxu1  ;;  %v229_v1 = vpop.f32.mrb[2].mxu0  ;;  %v5087_v6 = vadd.f32 %v227_v62, %v5074_v63 }
  0xef   :  { %v5078_v2 = vpop.f32.mrb[3].mxu1  ;;  %7529 = vst [vmem:[#allocation11_spill] sm:$0xff] %v5081_v3  ;;  %v5084_v4 = vadd.f32 %v229_v1, %v5068_v60  ;;  %v231_v5 = vpop.f32.mrb[3].mxu0 }
  0xf0   :  { %7531 = vst [vmem:[#allocation13_spill] sm:$0xff] %v5087_v6  ;;  %v5090_v7 = vadd.f32 %v231_v5, %v5074_v63 }
  0xf1   :  { %7530 = vst [vmem:[#allocation12_spill] sm:$0xff] %v5084_v4  ;;  %v577_v8 = vadd.f32 %v5084_v4, %v5081_v3 }
  0xf2   :  { %7532 = vst [vmem:[#allocation14_spill] sm:$0xff] %v5090_v7  ;;  %v614_v10 = vadd.f32 %v5090_v7, %v5087_v6 }
  0xf4   :  { %v5094_v9 = vpop.f32.mrb[4].mxu1  ;;  %v235_v11 = vpop.f32.mrb[4].mxu0 }
  0xf5   :  { %v5098_v12 = vpop.f32.mrb[5].mxu1  ;;  %v5101_v13 = vadd.f32 %v235_v11, %v5068_v60  ;;  %v237_v14 = vpop.f32.mrb[5].mxu0 }
  0xf6   :  { %v5103_v15 = vpop.f32.mrb[6].mxu1  ;;  %v5106_v16 = vadd.f32 %v237_v14, %v5074_v63  ;;  %v239_v17 = vpop.f32.mrb[6].mxu0 }
  0xf7   :  { %7533 = vst [vmem:[#allocation15_spill] sm:$0xff] %v5101_v13  ;;  %v5108_v18 = vpop.f32.mrb[7].mxu1  ;;  %v578_v19 = vadd.f32 %v577_v8, %v5101_v13  ;;  %v5112_v20 = vadd.f32 %v239_v17, %v5068_v60  ;;  %v241_v21 = vpop.f32.mrb[7].mxu0 }
  0xf8   :  { %7534 = vst [vmem:[#allocation16_spill] sm:$0xff] %v5106_v16  ;;  %v615_v22 = vadd.f32 %v614_v10, %v5106_v16  ;;  %v5116_v23 = vadd.f32 %v241_v21, %v5074_v63 }
  0xf9   :  { %7535 = vst [vmem:[#allocation17_spill] sm:$0xff] %v5112_v20  ;;  %v579_v24 = vadd.f32 %v578_v19, %v5112_v20 }
  0xfa   :  { %7536 = vst [vmem:[#allocation18_spill] sm:$0xff] %v5116_v23  ;;  %v616_v26 = vadd.f32 %v615_v22, %v5116_v23 }
  0xfc   :  { %v5119_v25 = vpop.f32.mrb[8].mxu1  ;;  %v245_v27 = vpop.f32.mrb[8].mxu0 }
  0xfd   :  { %v5122_v28 = vpop.f32.mrb[9].mxu1  ;;  %v5125_v29 = vadd.f32 %v245_v27, %v5068_v60  ;;  %v247_v30 = vpop.f32.mrb[9].mxu0 }
  0xfe   :  { %v5127_v31 = vpop.f32.mrb[10].mxu1  ;;  %v5130_v32 = vadd.f32 %v247_v30, %v5074_v63  ;;  %v249_v33 = vpop.f32.mrb[10].mxu0 }
  0xff   :  { %7537 = vst [vmem:[#allocation19_spill] sm:$0xff] %v5125_v29  ;;  %v5132_v34 = vpop.f32.mrb[11].mxu1  ;;  %v580_v35 = vadd.f32 %v579_v24, %v5125_v29  ;;  %v5136_v36 = vadd.f32 %v249_v33, %v5068_v60  ;;  %v251_v37 = vpop.f32.mrb[11].mxu0 }
 0x100   :  { %7538 = vst [vmem:[#allocation20_spill] sm:$0xff] %v5130_v32  ;;  %v617_v38 = vadd.f32 %v616_v26, %v5130_v32  ;;  %v5140_v39 = vadd.f32 %v251_v37, %v5074_v63 }
 0x101   :  { %7539 = vst [vmem:[#allocation21_spill] sm:$0xff] %v5136_v36  ;;  %v581_v40 = vadd.f32 %v580_v35, %v5136_v36 }
 0x102   :  { %7540 = vst [vmem:[#allocation22_spill] sm:$0xff] %v5140_v39  ;;  %v618_v42 = vadd.f32 %v617_v38, %v5140_v39 }
 0x104   :  { %v5143_v41 = vpop.f32.mrb[12].mxu1  ;;  %v255_v43 = vpop.f32.mrb[12].mxu0 }
 0x105   :  { %v5146_v44 = vpop.f32.mrb[13].mxu1  ;;  %v5149_v45 = vadd.f32 %v255_v43, %v5068_v60  ;;  %v257_v46 = vpop.f32.mrb[13].mxu0 }
 0x106   :  { %v5151_v47 = vpop.f32.mrb[14].mxu1  ;;  %v5154_v48 = vadd.f32 %v257_v46, %v5074_v63  ;;  %v259_v49 = vpop.f32.mrb[14].mxu0 }
 0x107   :  { %7541 = vst [vmem:[#allocation23_spill] sm:$0xff] %v5149_v45  ;;  %v5156_v50 = vpop.f32.mrb[15].mxu1  ;;  %v582_v51 = vadd.f32 %v581_v40, %v5149_v45  ;;  %v5160_v52 = vadd.f32 %v259_v49, %v5068_v60  ;;  %v261_v53 = vpop.f32.mrb[15].mxu0 }
 0x108   :  { %7542 = vst [vmem:[#allocation24_spill] sm:$0xff] %v5154_v48  ;;  %v619_v59 = vadd.f32 %v618_v42, %v5154_v48  ;;  %v5164_v62 = vadd.f32 %v261_v53, %v5074_v63 }
 0x109   :  { %7543 = vst [vmem:[#allocation25_spill] sm:$0xff] %v5160_v52  ;;  %v583_v1 = vadd.f32 %v582_v51, %v5160_v52 }
 0x10a   :  { %7544 = vst [vmem:[#allocation26_spill] sm:$0xff] %v5164_v62  ;;  %v620_v8 = vadd.f32 %v619_v59, %v5164_v62 }
 0x10c   :  { %v5167_v5 = vpop.f32.mrb[16].mxu1  ;;  %v265_v10 = vpop.f32.mrb[16].mxu0 }
 0x10d   :  { %v5170_v11 = vpop.f32.mrb[17].mxu1  ;;  %v5173_v14 = vadd.f32 %v265_v10, %v5068_v60  ;;  %v267_v17 = vpop.f32.mrb[17].mxu0 }
 0x10e   :  { %v5175_v19 = vpop.f32.mrb[18].mxu1  ;;  %v5178_v21 = vadd.f32 %v267_v17, %v5074_v63  ;;  %v269_v22 = vpop.f32.mrb[18].mxu0 }
 0x10f   :  { %7545 = vst [vmem:[#allocation27_spill] sm:$0xff] %v5173_v14  ;;  %v5180_v24 = vpop.f32.mrb[19].mxu1  ;;  %v584_v26 = vadd.f32 %v583_v1, %v5173_v14  ;;  %v5184_v27 = vadd.f32 %v269_v22, %v5068_v60  ;;  %v271_v30 = vpop.f32.mrb[19].mxu0 }
 0x110   :  { %7546 = vst [vmem:[#allocation28_spill] sm:$0xff] %v5178_v21  ;;  %v621_v33 = vadd.f32 %v620_v8, %v5178_v21  ;;  %v5188_v35 = vadd.f32 %v271_v30, %v5074_v63 }
 0x111   :  { %7547 = vst [vmem:[#allocation29_spill] sm:$0xff] %v5184_v27  ;;  %v585_v37 = vadd.f32 %v584_v26, %v5184_v27 }
 0x112   :  { %7548 = vst [vmem:[#allocation30_spill] sm:$0xff] %v5188_v35  ;;  %v622_v40 = vadd.f32 %v621_v33, %v5188_v35 }
 0x114   :  { %v5191_v38 = vpop.f32.mrb[20].mxu1  ;;  %v275_v42 = vpop.f32.mrb[20].mxu0 }
 0x115   :  { %v5194_v43 = vpop.f32.mrb[21].mxu1  ;;  %v5197_v46 = vadd.f32 %v275_v42, %v5068_v60  ;;  %v277_v49 = vpop.f32.mrb[21].mxu0 }
 0x116   :  { %v5199_v51 = vpop.f32.mrb[22].mxu1  ;;  %v5202_v53 = vadd.f32 %v277_v49, %v5074_v63  ;;  %v279_v59 = vpop.f32.mrb[22].mxu0 }
 0x117   :  { %7549 = vst [vmem:[#allocation31_spill] sm:$0xff] %v5197_v46  ;;  %v5204_v1 = vpop.f32.mrb[23].mxu1  ;;  %v586_v8 = vadd.f32 %v585_v37, %v5197_v46  ;;  %v5208_v10 = vadd.f32 %v279_v59, %v5068_v60  ;;  %v281_v17 = vpop.f32.mrb[23].mxu0 }
 0x118   :  { %7550 = vst [vmem:[#allocation32_spill] sm:$0xff] %v5202_v53  ;;  %v623_v22 = vadd.f32 %v622_v40, %v5202_v53  ;;  %v5212_v26 = vadd.f32 %v281_v17, %v5074_v63 }
 0x119   :  { %7551 = vst [vmem:[#allocation33_spill] sm:$0xff] %v5208_v10  ;;  %v587_v30 = vadd.f32 %v586_v8, %v5208_v10 }
 0x11a   :  { %7552 = vst [vmem:[#allocation34_spill] sm:$0xff] %v5212_v26  ;;  %v624_v42 = vadd.f32 %v623_v22, %v5212_v26 }
 0x11c   :  { %v5215_v33 = vpop.f32.mrb[24].mxu1  ;;  %v285_v49 = vpop.f32.mrb[24].mxu0 }
 0x11d   :  { %v5218_v57 = vpop.f32.mrb[25].mxu1  ;;  %v5221_v37 = vadd.f32 %v285_v49, %v5068_v60  ;;  %v287_v59 = vpop.f32.mrb[25].mxu0 }
 0x11e   :  { %v5223_v55 = vpop.f32.mrb[26].mxu1  ;;  %v5226_v40 = vadd.f32 %v287_v59, %v5074_v63  ;;  %v289_v17 = vpop.f32.mrb[26].mxu0 }
 0x11f   :  { %7553 = vst [vmem:[#allocation35_spill] sm:$0xff] %v5221_v37  ;;  %v5228_v53 = vpop.f32.mrb[27].mxu1  ;;  %v588_v8 = vadd.f32 %v587_v30, %v5221_v37  ;;  %v5232_v10 = vadd.f32 %v289_v17, %v5068_v60  ;;  %v291_v22 = vpop.f32.mrb[27].mxu0 }
 0x120   :  { %7554 = vst [vmem:[#allocation36_spill] sm:$0xff] %v5226_v40  ;;  %v625_v26 = vadd.f32 %v624_v42, %v5226_v40  ;;  %v5236_v49 = vadd.f32 %v291_v22, %v5074_v63 }
 0x121   :  { %7555 = vst [vmem:[#allocation37_spill] sm:$0xff] %v5232_v10  ;;  %v589_v46 = vadd.f32 %v588_v8, %v5232_v10 }
 0x122   :  { %7556 = vst [vmem:[#allocation38_spill] sm:$0xff] %v5236_v49  ;;  %v626_v59 = vadd.f32 %v625_v26, %v5236_v49 }
 0x124   :  { %v5239_v35 = vpop.f32.mrb[28].mxu1  ;;  %v295_v27 = vpop.f32.mrb[28].mxu0 }
 0x125   :  { %v5242_v21 = vpop.f32.mrb[29].mxu1  ;;  %v5245_v30 = vadd.f32 %v295_v27, %v5068_v60  ;;  %v297_v17 = vpop.f32.mrb[29].mxu0 }
 0x126   :  { %v5247_v37 = vpop.f32.mrb[30].mxu1  ;;  %v5250_v42 = vadd.f32 %v297_v17, %v5074_v63  ;;  %v299_v22 = vpop.f32.mrb[30].mxu0 }
 0x127   :  { %7557 = vst [vmem:[#allocation39_spill] sm:$0xff] %v5245_v30  ;;  %v5252_v40 = vpop.f32.mrb[31].mxu1  ;;  %v590_v8 = vadd.f32 %v589_v46, %v5245_v30  ;;  %v5256_v10 = vadd.f32 %v299_v22, %v5068_v60  ;;  %v301_v26 = vpop.f32.mrb[31].mxu0 }
 0x128   :  { %7558 = vst [vmem:[#allocation40_spill] sm:$0xff] %v5250_v42  ;;  %v627_v49 = vadd.f32 %v626_v59, %v5250_v42  ;;  %v5260_v27 = vadd.f32 %v301_v26, %v5074_v63 }
 0x129   :  { %7559 = vst [vmem:[#allocation41_spill] sm:$0xff] %v5256_v10  ;;  %v591_v14 = vadd.f32 %v590_v8, %v5256_v10 }
 0x12a   :  { %7560 = vst [vmem:[#allocation42_spill] sm:$0xff] %v5260_v27  ;;  %v628_v17 = vadd.f32 %v627_v49, %v5260_v27 }
 0x12c   :  { %v5263_v62 = vpop.f32.mrb[32].mxu1  ;;  %v305_v52 = vpop.f32.mrb[32].mxu0 }
 0x12d   :  { %v5266_v48 = vpop.f32.mrb[33].mxu1  ;;  %v5269_v46 = vadd.f32 %v305_v52, %v5068_v60  ;;  %v307_v22 = vpop.f32.mrb[33].mxu0 }
 0x12e   :  { %v5271_v30 = vpop.f32.mrb[34].mxu1  ;;  %v5274_v59 = vadd.f32 %v307_v22, %v5074_v63  ;;  %v309_v26 = vpop.f32.mrb[34].mxu0 }
 0x12f   :  { %7561 = vst [vmem:[#allocation43_spill] sm:$0xff] %v5269_v46  ;;  %v5276_v42 = vpop.f32.mrb[35].mxu1  ;;  %v592_v8 = vadd.f32 %v591_v14, %v5269_v46  ;;  %v5280_v10 = vadd.f32 %v309_v26, %v5068_v60  ;;  %v311_v49 = vpop.f32.mrb[35].mxu0 }
 0x130   :  { %7562 = vst [vmem:[#allocation44_spill] sm:$0xff] %v5274_v59  ;;  %v629_v27 = vadd.f32 %v628_v17, %v5274_v59  ;;  %v5284_v52 = vadd.f32 %v311_v49, %v5074_v63 }
 0x131   :  { %7563 = vst [vmem:[#allocation45_spill] sm:$0xff] %v5280_v10  ;;  %v593_v45 = vadd.f32 %v592_v8, %v5280_v10 }
 0x132   :  { %7564 = vst [vmem:[#allocation46_spill] sm:$0xff] %v5284_v52  ;;  %v630_v22 = vadd.f32 %v629_v27, %v5284_v52 }
 0x134   :  { %v5287_v39 = vpop.f32.mrb[36].mxu1  ;;  %v315_v36 = vpop.f32.mrb[36].mxu0 }
 0x135   :  { %v5290_v32 = vpop.f32.mrb[37].mxu1  ;;  %v5293_v14 = vadd.f32 %v315_v36, %v5068_v60  ;;  %v317_v26 = vpop.f32.mrb[37].mxu0 }
 0x136   :  { %v5295_v46 = vpop.f32.mrb[38].mxu1  ;;  %v5298_v17 = vadd.f32 %v317_v26, %v5074_v63  ;;  %v319_v49 = vpop.f32.mrb[38].mxu0 }
 0x137   :  { %7565 = vst [vmem:[#allocation47_spill] sm:$0xff] %v5293_v14  ;;  %v5300_v59 = vpop.f32.mrb[39].mxu1  ;;  %v594_v8 = vadd.f32 %v593_v45, %v5293_v14  ;;  %v5304_v10 = vadd.f32 %v319_v49, %v5068_v60  ;;  %v321_v27 = vpop.f32.mrb[39].mxu0 }
 0x138   :  { %7566 = vst [vmem:[#allocation48_spill] sm:$0xff] %v5298_v17  ;;  %v631_v52 = vadd.f32 %v630_v22, %v5298_v17  ;;  %v5308_v36 = vadd.f32 %v321_v27, %v5074_v63 }
 0x139   :  { %7567 = vst [vmem:[#allocation49_spill] sm:$0xff] %v5304_v10  ;;  %v595_v23 = vadd.f32 %v594_v8, %v5304_v10 }
 0x13a   :  { %7568 = vst [vmem:[#allocation50_spill] sm:$0xff] %v5308_v36  ;;  %v632_v26 = vadd.f32 %v631_v52, %v5308_v36  ;;  %v5331_v36 = vsub.s32 2, %v5051_v54 }
 0x13c   :  { %v5311_v29 = vpop.f32.mrb[40].mxu1  ;;  %v325_v16 = vpop.f32.mrb[40].mxu0  ;;  %7572 = vst [vmem:[#allocation54_spill] sm:$0xff] %v5331_v36  ;;  %v5340_v6 = vrot.slane %v5059_v56, %v5331_v36 }
 0x13d   :  { %v5314_v20 = vpop.f32.mrb[41].mxu1  ;;  %v5317_v45 = vadd.f32 %v325_v16, %v5068_v60  ;;  %v327_v49 = vpop.f32.mrb[41].mxu0 }
 0x13e   :  { %v5319_v14 = vpop.f32.mrb[42].mxu1  ;;  %v5322_v22 = vadd.f32 %v327_v49, %v5074_v63  ;;  %v329_v27 = vpop.f32.mrb[42].mxu0 }
 0x13f   :  { %7569 = vst [vmem:[#allocation51_spill] sm:$0xff] %v5317_v45  ;;  %v5324_v17 = vpop.f32.mrb[43].mxu1  ;;  %v596_v8 = vadd.f32 %v595_v23, %v5317_v45  ;;  %v5328_v10 = vadd.f32 %v329_v27, %v5068_v60  ;;  %v331_v52 = vpop.f32.mrb[43].mxu0 }
 0x140   :  { %7570 = vst [vmem:[#allocation52_spill] sm:$0xff] %v5322_v22  ;;  %v633_v16 = vadd.f32 %v632_v26, %v5322_v22  ;;  %v5335_v7 = vadd.f32 %v331_v52, %v5074_v63  ;;  %v5352_v26 = vadd.f32 %v5175_v19, %v5340_v6  ;;  %v5370_v19 = vadd.f32 %v5167_v5, %v5340_v6 }
 0x141   :  { %7571 = vst [vmem:[#allocation53_spill] sm:$0xff] %v5328_v10  ;;  %v597_v49 = vadd.f32 %v596_v8, %v5328_v10 }
 0x142   :  { %7573 = vst [vmem:[#allocation55_spill] sm:$0xff] %v5335_v7  ;;  %v634_v23 = vadd.f32 %v633_v16, %v5335_v7  ;;  %7576 = vst [vmem:[#allocation58_spill] sm:$0xff] %v5352_v26  ;;  %v5360_v16 = vsub.s32 3, %v5051_v54  ;;  %v651_v5 = vadd.f32 %v5352_v26, %v5370_v19 }
 0x143   :  { %7580 = vst [vmem:[#allocation62_spill] sm:$0xff] %v5370_v19 }
 0x144   :  { %v335_v45 = vpop.f32.mrb[44].mxu0  ;;  %v5343_v27 = vpop.f32.mrb[44].mxu1  ;;  %7578 = vst [vmem:[#allocation60_spill] sm:$0xff] %v5360_v16 }
 0x145   :  { %v5346_v13 = vadd.f32 %v335_v45, %v5068_v60  ;;  %v337_v4 = vpop.f32.mrb[45].mxu0  ;;  %v5348_v3 = vpop.f32.mrb[45].mxu1 }
 0x146   :  { %7575 = vst [vmem:[#allocation57_spill] sm:$0xff] %v5348_v3  ;;  %v5355_v8 = vadd.f32 %v337_v4, %v5074_v63  ;;  %v339_v52 = vpop.f32.mrb[46].mxu0  ;;  %v5357_v36 = vpop.f32.mrb[46].mxu1  ;;  %v5374_v4 = vadd.f32 %v5191_v38, %v5340_v6 }
 0x147   :  { %7574 = vst [vmem:[#allocation56_spill] sm:$0xff] %v5346_v13  ;;  %v598_v7 = vadd.f32 %v597_v49, %v5346_v13  ;;  %v5364_v45 = vadd.f32 %v339_v52, %v5068_v60  ;;  %v341_v22 = vpop.f32.mrb[47].mxu0  ;;  %v5366_v10 = vpop.f32.mrb[47].mxu1  ;;  %v5382_v49 = vadd.f32 %v5064_v58, %v5068_v60  ;;  %v5387_v13 = vadd.f32 %v5070_v61, %v5074_v63 }
 0x148   :  { %7577 = vst [vmem:[#allocation59_spill] sm:$0xff] %v5355_v8  ;;  %7581 = vst [vmem:[#allocation63_spill] sm:$0xff] %v5374_v4  ;;  %v635_v3 = vadd.f32 %v634_v23, %v5355_v8  ;;  %v5378_v54 = vadd.f32 %v341_v22, %v5074_v63  ;;  %v5394_v23 = vadd.f32 %v5076_v0, %v5068_v60 }
 0x149   :  { %7579 = vst [vmem:[#allocation61_spill] sm:$0xff] %v5364_v45  ;;  %7583 = vst [vmem:[#allocation65_spill] sm:$0xff] %v5382_v49  ;;  %v599_v52 = vadd.f32 %v598_v7, %v5364_v45  ;;  %v5398_v22 = vrot.slane %v5059_v56, %v5360_v16  ;;  %v5403_v7 = vadd.f32 %v5078_v2, %v5074_v63 }
 0x14a   :  { %7582 = vst [vmem:[#allocation64_spill] sm:$0xff] %v5378_v54  ;;  %7584 = vst [vmem:[#allocation66_spill] sm:$0xff] %v5387_v13  ;;  %v636_v38 = vadd.f32 %v635_v3, %v5378_v54  ;;  %v652_v61 = vadd.f32 %v651_v5, %v5374_v4  ;;  %v5408_v8 = vadd.f32 %v5199_v51, %v5340_v6 }
 0x14b   :  { %7585 = vst [vmem:[#allocation67_spill] sm:$0xff] %v5394_v23  ;;  %v600_v58 = vadd.f32 %v599_v52, %v5382_v49  ;;  %7586 = vst [vmem:[#allocation68_spill] sm:$0xff] %v5403_v7  ;;  %v5415_v56 = vadd.f32 %v5094_v9, %v5068_v60  ;;  %v5422_v2 = vadd.f32 %v5098_v12, %v5074_v63 }
 0x14c   :  { %7587 = vst [vmem:[#allocation69_spill] sm:$0xff] %v5408_v8  ;;  %v637_v3 = vadd.f32 %v636_v38, %v5387_v13  ;;  %v5411_v0 = vpop.f32.mrb[48].mxu1  ;;  %v5426_v51 = vadd.f32 %v5180_v24, %v5398_v22  ;;  %v5430_v5 = vadd.f32 %v5215_v33, %v5340_v6  ;;  %v5444_v24 = vadd.f32 %v5170_v11, %v5398_v22 }
 0x14d   :  { %7588 = vst [vmem:[#allocation70_spill] sm:$0xff] %v5415_v56  ;;  %v601_v52 = vadd.f32 %v600_v58, %v5394_v23  ;;  %v5418_v16 = vpop.f32.mrb[49].mxu1  ;;  %7589 = vst [vmem:[#allocation71_spill] sm:$0xff] %v5422_v2  ;;  %v5437_v58 = vadd.f32 %v5103_v15, %v5068_v60  ;;  %v5448_v33 = vadd.f32 %v5194_v43, %v5398_v22 }
 0x14e   :  { %7590 = vst [vmem:[#allocation72_spill] sm:$0xff] %v5426_v51  ;;  %7591 = vst [vmem:[#allocation73_spill] sm:$0xff] %v5430_v5  ;;  %v638_v38 = vadd.f32 %v637_v3, %v5403_v7  ;;  %v5433_v9 = vpop.f32.mrb[50].mxu1  ;;  %v653_v3 = vadd.f32 %v652_v61, %v5408_v8  ;;  %v5454_v15 = vadd.f32 %v5108_v18, %v5074_v63 }
 0x14f   :  { %7592 = vst [vmem:[#allocation74_spill] sm:$0xff] %v5437_v58  ;;  %v602_v13 = vadd.f32 %v601_v52, %v5415_v56  ;;  %v5440_v12 = vpop.f32.mrb[51].mxu1  ;;  %7593 = vst [vmem:[#allocation75_spill] sm:$0xff] %v5444_v24  ;;  %v5458_v52 = vadd.f32 %v5119_v25, %v5068_v60  ;;  %v688_v11 = vadd.f32 %v5426_v51, %v5444_v24 }
 0x150   :  { %7594 = vst [vmem:[#allocation76_spill] sm:$0xff] %v5448_v33  ;;  %v639_v7 = vadd.f32 %v638_v38, %v5422_v2  ;;  %7595 = vst [vmem:[#allocation77_spill] sm:$0xff] %v5454_v15  ;;  %v654_v43 = vadd.f32 %v653_v3, %v5430_v5  ;;  %v5466_v61 = vadd.f32 %v5223_v55, %v5340_v6 }
 0x151   :  { %7596 = vst [vmem:[#allocation78_spill] sm:$0xff] %v5458_v52  ;;  %v603_v54 = vadd.f32 %v602_v13, %v5437_v58  ;;  %v5470_v38 = vadd.f32 %v5127_v31, %v5068_v60  ;;  %v689_v2 = vadd.f32 %v688_v11, %v5448_v33  ;;  %v5477_v13 = vadd.f32 %v5204_v1, %v5398_v22 }
 0x152   :  { %7597 = vst [vmem:[#allocation79_spill] sm:$0xff] %v5466_v61  ;;  %v640_v25 = vadd.f32 %v639_v7, %v5454_v15  ;;  %v5481_v3 = vadd.f32 %v5239_v35, %v5340_v6  ;;  %v5487_v31 = vadd.f32 %v5122_v28, %v5074_v63  ;;  %v5498_v1 = vadd.f32 %v5218_v57, %v5398_v22 }
 0x153   :  { %7598 = vst [vmem:[#allocation80_spill] sm:$0xff] %v5470_v38  ;;  %v604_v18 = vadd.f32 %v603_v54, %v5458_v52  ;;  %7599 = vst [vmem:[#allocation81_spill] sm:$0xff] %v5477_v13  ;;  %v5491_v54 = vadd.f32 %v5143_v41, %v5068_v60  ;;  %v655_v35 = vadd.f32 %v654_v43, %v5466_v61 }
 0x154   :  { %7600 = vst [vmem:[#allocation82_spill] sm:$0xff] %v5481_v3  ;;  %v5483_v55 = vpop.f32.mrb[52].mxu1  ;;  %7601 = vst [vmem:[#allocation83_spill] sm:$0xff] %v5487_v31  ;;  %v641_v28 = vadd.f32 %v640_v25, %v5487_v31  ;;  %v690_v41 = vadd.f32 %v689_v2, %v5477_v13  ;;  %v5511_v24 = vadd.f32 %v5247_v37, %v5340_v6 }
 0x155   :  { %7602 = vst [vmem:[#allocation84_spill] sm:$0xff] %v5491_v54  ;;  %v605_v7 = vadd.f32 %v604_v18, %v5470_v38  ;;  %v5494_v11 = vpop.f32.mrb[53].mxu1  ;;  %7603 = vst [vmem:[#allocation85_spill] sm:$0xff] %v5498_v1  ;;  %v656_v18 = vadd.f32 %v655_v35, %v5481_v3  ;;  %v5515_v57 = vadd.f32 %v5132_v34, %v5074_v63 }
 0x156   :  { %v5501_v33 = vpop.f32.mrb[54].mxu1  ;;  %7604 = vst [vmem:[#allocation86_spill] sm:$0xff] %v5511_v24  ;;  %v5519_v43 = vadd.f32 %v5151_v47, %v5068_v60  ;;  %v691_v25 = vadd.f32 %v690_v41, %v5498_v1  ;;  %v5528_v2 = vadd.f32 %v5263_v62, %v5340_v6  ;;  %v5534_v34 = vadd.f32 %v5242_v21, %v5398_v22 }
 0x157   :  { %v606_v15 = vadd.f32 %v605_v7, %v5491_v54  ;;  %v5505_v51 = vpop.f32.mrb[55].mxu1  ;;  %7605 = vst [vmem:[#allocation87_spill] sm:$0xff] %v5515_v57  ;;  %v5524_v7 = vadd.f32 %v5228_v53, %v5398_v22  ;;  %v642_v35 = vadd.f32 %v641_v28, %v5515_v57  ;;  %v657_v60 = vadd.f32 %v656_v18, %v5511_v24 }
 0x158   :  { %7606 = vst [vmem:[#allocation88_spill] sm:$0xff] %v5519_v43  ;;  %7608 = vst [vmem:[#allocation90_spill] sm:$0xff] %v5528_v2  ;;  %v5541_v53 = vadd.f32 %v5146_v44, %v5074_v63  ;;  %v5549_v28 = vadd.f32 %v5271_v30, %v5340_v6  ;;  %v5559_v57 = vadd.f32 %v5252_v40, %v5398_v22 }
 0x159   :  { %7607 = vst [vmem:[#allocation89_spill] sm:$0xff] %v5524_v7  ;;  %v607_v37 = vadd.f32 %v606_v15, %v5519_v43  ;;  %7609 = vst [vmem:[#allocation91_spill] sm:$0xff] %v5534_v34  ;;  %v692_v62 = vadd.f32 %v691_v25, %v5524_v7  ;;  %v658_v15 = vadd.f32 %v657_v60, %v5528_v2 }
 0x15a   :  { %7610 = vst [vmem:[#allocation92_spill] sm:$0xff] %v5541_v53  ;;  %7611 = vst [vmem:[#allocation93_spill] sm:$0xff] %v5549_v28  ;;  %v643_v18 = vadd.f32 %v642_v35, %v5541_v53  ;;  %v5563_v25 = vadd.f32 %v5287_v39, %v5340_v6  ;;  %v5567_v30 = vadd.f32 %v5156_v50, %v5074_v63 }
 0x15b   :  { %v608_v1 = vrot.slane %v607_v37, 4  ;;  %v693_v44 = vadd.f32 %v692_v62, %v5534_v34  ;;  %7612 = vst [vmem:[#allocation94_spill] sm:$0xff] %v5559_v57  ;;  %v5571_v60 = vadd.f32 %v5266_v48, %v5398_v22  ;;  %v659_v35 = vadd.f32 %v658_v15, %v5549_v28 }
 0x15c   :  { %v5537_v47 = vpop.f32.mrb[56].mxu1  ;;  %7613 = vst [vmem:[#allocation95_spill] sm:$0xff] %v5563_v25  ;;  %7614 = vst [vmem:[#allocation96_spill] sm:$0xff] %v5567_v30  ;;  %v644_v62 = vadd.f32 %v643_v18, %v5567_v30  ;;  %v5579_v39 = vadd.f32 %v5295_v46, %v5340_v6  ;;  %v5588_v50 = vadd.f32 %v5276_v42, %v5398_v22 }
 0x15d   :  { %v5543_v41 = vpop.f32.mrb[57].mxu1  ;;  %7615 = vst [vmem:[#allocation97_spill] sm:$0xff] %v5571_v60  ;;  %v609_v7 = vadd.f32 %v608_v1, %v607_v37  ;;  %v694_v40 = vadd.f32 %v693_v44, %v5559_v57  ;;  %v660_v34 = vadd.f32 %v659_v35, %v5563_v25  ;;  %v5592_v1 = vadd.f32 %v5311_v29, %v5340_v6 }
 0x15e   :  { %v5551_v21 = vpop.f32.mrb[58].mxu1  ;;  %7616 = vst [vmem:[#allocation98_spill] sm:$0xff] %v5579_v39  ;;  %7617 = vst [vmem:[#allocation99_spill] sm:$0xff] %v5588_v50  ;;  %v645_v18 = vrot.slane %v644_v62, 4  ;;  %v5600_v44 = vadd.f32 %v5290_v32, %v5398_v22  ;;  %v5607_v29 = vadd.f32 %v5319_v14, %v5340_v6  ;;  %v5612_v31 = vadd.f32 %v5300_v59, %v5398_v22 }
 0x15f   :  { %v5554_v13 = vpop.f32.mrb[59].mxu1  ;;  %v695_v48 = vadd.f32 %v694_v40, %v5571_v60  ;;  %7618 = vst [vmem:[#allocation100_spill] sm:$0xff] %v5592_v1  ;;  %v610_v15 = vrot.slane %v609_v7, 2  ;;  %v661_v35 = vadd.f32 %v660_v34, %v5579_v39  ;;  %v5616_v32 = vadd.f32 %v5343_v27, %v5340_v6 }
 0x160   :  { %7619 = vst [vmem:[#allocation101_spill] sm:$0xff] %v5600_v44  ;;  %7620 = vst [vmem:[#allocation102_spill] sm:$0xff] %v5607_v29  ;;  %v646_v60 = vadd.f32 %v645_v18, %v644_v62  ;;  %v5624_v14 = vadd.f32 %v5314_v20, %v5398_v22  ;;  %v5640_v20 = vadd.f32 %v5324_v17, %v5398_v22 }
 0x161   :  { %v696_v40 = vadd.f32 %v695_v48, %v5588_v50  ;;  %v662_v42 = vadd.f32 %v661_v35, %v5592_v1  ;;  %v611_v30 = vadd.f32 %v610_v15, %v609_v7  ;;  %7621 = vst [vmem:[#allocation103_spill] sm:$0xff] %v5612_v31  ;;  %7622 = vst [vmem:[#allocation104_spill] sm:$0xff] %v5616_v32 }
 0x162   :  { %7623 = vst [vmem:[#allocation105_spill] sm:$0xff] %v5624_v14  ;;  %v647_v18 = vrot.slane %v646_v60, 2  ;;  %7625 = vst [vmem:[#allocation107_spill] sm:$0xff] %v5640_v20 }
 0x163   :  { %v697_v57 = vadd.f32 %v696_v40, %v5600_v44  ;;  %v663_v7 = vadd.f32 %v662_v42, %v5607_v29  ;;  %v612_v15 = vrot.slane %v611_v30, 1  ;;  %v5635_v40 = vadd.f32 %v5357_v36, %v5340_v6 }
 0x164   :  { %v5581_v53 = vpop.f32.mrb[60].mxu1  ;;  %v5644_v42 = vadd.f32 %v5411_v0, %v5340_v6  ;;  %v648_v29 = vadd.f32 %v647_v18, %v646_v60  ;;  %v5659_v0 = vadd.f32 %v5433_v9, %v5340_v6  ;;  %v5678_v9 = vadd.f32 %v5418_v16, %v5398_v22 }
 0x165   :  { %v5583_v63 = vpop.f32.mrb[61].mxu1  ;;  %v698_v35 = vadd.f32 %v697_v57, %v5612_v31  ;;  %v664_v27 = vadd.f32 %v663_v7, %v5616_v32  ;;  %7624 = vst [vmem:[#allocation106_spill] sm:$0xff] %v5635_v40  ;;  %v613_v50 = vadd.f32 %v612_v15, %v611_v30  ;;  %v7627_v57 = vld [vmem:[#allocation57_spill] sm:$0xff] }
 0x166   :  { %v5594_v37 = vpop.f32.mrb[62].mxu1  ;;  %7626 = vst [vmem:[#allocation108_spill] sm:$0xff] %v5644_v42  ;;  %v5648_v31 = vadd.f32 %v7627_v57, %v5398_v22  ;;  %7629 = vst [vmem:[#allocation109_spill] sm:$0xff] %v5659_v0  ;;  %v649_v15 = vrot.slane %v648_v29, 1  ;;  %v5670_v57 = vadd.f32 %v5366_v10, %v5398_v22 }
 0x167   :  { %v5596_v46 = vpop.f32.mrb[63].mxu1  ;;  %v699_v44 = vadd.f32 %v698_v35, %v5624_v14  ;;  %v665_v7 = vadd.f32 %v664_v27, %v5635_v40  ;;  %v5663_v60 = vmul.f32 0.00390625, %v613_v50  ;;  %7633 = vst [vmem:[#allocation113_spill] sm:$0xff] %v5678_v9  ;;  %v7635_v14 = vld [vmem:[#allocation12_spill] sm:$0xff]  ;;  %v5753_v25 = vadd.f32 %v5594_v37, %v5340_v6 }
 0x168   :  { %7628 = vst [vmem:[#allocation57_spill] sm:$0xff] %v5648_v31  ;;  %7631 = vst [vmem:[#allocation111_spill] sm:$0xff] %v5670_v57 }
 0x169   :  { %v700_v35 = vadd.f32 %v699_v44, %v5640_v20  ;;  %v666_v17 = vadd.f32 %v665_v7, %v5644_v42  ;;  %7630 = vst [vmem:[#allocation110_spill] sm:$0xff] %v5663_v60  ;;  %v5674_v44 = vadd.f32 %v5483_v55, %v5340_v6  ;;  %v7634_v7 = vld [vmem:[#allocation11_spill] sm:$0xff]  ;;  %v5689_v55 = vadd.f32 %v5501_v33, %v5340_v6 }
 0x16a   :  { %v729_v20 = vsub.f32 %v7634_v7, %v5663_v60  ;;  %v5698_v7 = vadd.f32 %v5440_v12, %v5398_v22  ;;  %v7640_v12 = vld [vmem:[#allocation15_spill] sm:$0xff]  ;;  %7649 = vst [vmem:[#allocation122_spill] sm:$0xff] %v5753_v25 }
 0x16b   :  { %v701_v27 = vadd.f32 %v700_v35, %v5648_v31  ;;  %7632 = vst [vmem:[#allocation112_spill] sm:$0xff] %v5674_v44  ;;  %v667_v50 = vadd.f32 %v666_v17, %v5659_v0  ;;  %v733_v35 = vsub.f32 %v7635_v14, %v5663_v60  ;;  %v650_v31 = vadd.f32 %v649_v15, %v648_v29 }
 0x16c   :  { %v5618_v34 = vpop.f32.mrb[64].mxu1  ;;  %7636 = vst [vmem:[#allocation114_spill] sm:$0xff] %v5689_v55  ;;  %7637 = vst [vmem:[#allocation115_spill] sm:$0xff] %v5698_v7  ;;  %v5702_v29 = vadd.f32 %v5537_v47, %v5340_v6 }
 0x16d   :  { %v5620_v48 = vpop.f32.mrb[65].mxu1  ;;  %v702_v10 = vadd.f32 %v701_v27, %v5670_v57  ;;  %v668_v42 = vadd.f32 %v667_v50, %v5674_v44  ;;  %v857_v27 = vmul.f32 %v729_v20, %v729_v20  ;;  %v861_v50 = vmul.f32 %v733_v35, %v733_v35  ;;  %v7642_v35 = vld [vmem:[#allocation13_spill] sm:$0xff] }
 0x16e   :  { %v5627_v62 = vpop.f32.mrb[66].mxu1  ;;  %7638 = vst [vmem:[#allocation116_spill] sm:$0xff] %v5702_v29  ;;  %v5706_v33 = vmul.f32 0.00390625, %v650_v31  ;;  %v5712_v57 = vadd.f32 %v5494_v11, %v5398_v22  ;;  %v5721_v20 = vadd.f32 %v5551_v21, %v5340_v6  ;;  %v7643_v11 = vld [vmem:[#allocation14_spill] sm:$0xff]  ;;  %v7646_v21 = vld [vmem:[#allocation17_spill] sm:$0xff] }
 0x16f   :  { %v5629_v59 = vpop.f32.mrb[67].mxu1  ;;  %v703_v17 = vadd.f32 %v702_v10, %v5678_v9  ;;  %v669_v10 = vadd.f32 %v668_v42, %v5689_v55  ;;  %v737_v9 = vsub.f32 %v7640_v12, %v5663_v60  ;;  %v985_v31 = vadd.f32 %v861_v50, %v857_v27 }
 0x170   :  { %7639 = vst [vmem:[#allocation117_spill] sm:$0xff] %v5712_v57  ;;  %7641 = vst [vmem:[#allocation118_spill] sm:$0xff] %v5721_v20  ;;  %v730_v0 = vsub.f32 %v7642_v35, %v5706_v33  ;;  %v734_v1 = vsub.f32 %v7643_v11, %v5706_v33  ;;  %v5730_v12 = vadd.f32 %v5505_v51, %v5398_v22 }
 0x171   :  { %v704_v47 = vadd.f32 %v703_v17, %v5698_v7  ;;  %v670_v44 = vadd.f32 %v669_v10, %v5702_v29  ;;  %v5734_v17 = vadd.f32 %v5581_v53, %v5340_v6  ;;  %v741_v27 = vsub.f32 %v7646_v21, %v5663_v60 }
 0x172   :  { %7644 = vst [vmem:[#allocation119_spill] sm:$0xff] %v5730_v12  ;;  %v865_v50 = vmul.f32 %v737_v9, %v737_v9  ;;  %v5742_v11 = vadd.f32 %v5543_v41, %v5398_v22  ;;  %v858_v53 = vmul.f32 %v730_v0, %v730_v0  ;;  %v862_v55 = vmul.f32 %v734_v1, %v734_v1  ;;  %v7650_v41 = vld [vmem:[#allocation19_spill] sm:$0xff] }
 0x173   :  { %v705_v42 = vadd.f32 %v704_v47, %v5712_v57  ;;  %7645 = vst [vmem:[#allocation120_spill] sm:$0xff] %v5734_v17  ;;  %v671_v47 = vadd.f32 %v670_v44, %v5721_v20  ;;  %v7648_v57 = vld [vmem:[#allocation16_spill] sm:$0xff]  ;;  %v745_v44 = vsub.f32 %v7650_v41, %v5663_v60  ;;  %v869_v20 = vmul.f32 %v741_v27, %v741_v27 }
 0x174   :  { %v5651_v36 = vpop.f32.mrb[68].mxu1  ;;  %7647 = vst [vmem:[#allocation121_spill] sm:$0xff] %v5742_v11  ;;  %v986_v51 = vadd.f32 %v985_v31, %v865_v50  ;;  %v738_v29 = vsub.f32 %v7648_v57, %v5706_v33  ;;  %v7651_v31 = vld [vmem:[#allocation18_spill] sm:$0xff]  ;;  %v1022_v28 = vadd.f32 %v862_v55, %v858_v53  ;;  %v5769_v27 = vadd.f32 %v5618_v34, %v5340_v6 }
 0x175   :  { %v5653_v32 = vpop.f32.mrb[69].mxu1  ;;  %v706_v21 = vadd.f32 %v705_v42, %v5730_v12  ;;  %v672_v9 = vadd.f32 %v671_v47, %v5734_v17  ;;  %v742_v50 = vsub.f32 %v7651_v31, %v5706_v33  ;;  %v5762_v42 = vadd.f32 %v5554_v13, %v5398_v22  ;;  %v7653_v47 = vld [vmem:[#allocation20_spill] sm:$0xff] }
 0x176   :  { %v5661_v30 = vpop.f32.mrb[70].mxu1  ;;  %v987_v1 = vadd.f32 %v986_v51, %v869_v20  ;;  %v866_v57 = vmul.f32 %v738_v29, %v738_v29  ;;  %v746_v37 = vsub.f32 %v7653_v47, %v5706_v33  ;;  %7654 = vst [vmem:[#allocation124_spill] sm:$0xff] %v5769_v27  ;;  %v5773_v41 = vadd.f32 %v5627_v62, %v5340_v6  ;;  %v7656_v29 = vld [vmem:[#allocation21_spill] sm:$0xff]  ;;  %v7659_v62 = vld [vmem:[#allocation22_spill] sm:$0xff] }
 0x177   :  { %v5665_v18 = vpop.f32.mrb[71].mxu1  ;;  %v707_v0 = vadd.f32 %v706_v21, %v5742_v11  ;;  %7652 = vst [vmem:[#allocation123_spill] sm:$0xff] %v5762_v42  ;;  %v673_v12 = vadd.f32 %v672_v9, %v5753_v25  ;;  %v749_v55 = vsub.f32 %v7656_v29, %v5663_v60  ;;  %v873_v20 = vmul.f32 %v745_v44, %v745_v44 }
 0x178   :  { %7655 = vst [vmem:[#allocation125_spill] sm:$0xff] %v5773_v41  ;;  %v870_v21 = vmul.f32 %v742_v50, %v742_v50  ;;  %v1023_v13 = vadd.f32 %v1022_v28, %v866_v57  ;;  %v5780_v53 = vadd.f32 %v5651_v36, %v5340_v6  ;;  %v5784_v34 = vadd.f32 %v5583_v63, %v5398_v22  ;;  %v7661_v57 = vld [vmem:[#allocation23_spill] sm:$0xff] }
 0x179   :  { %v674_v51 = vadd.f32 %v673_v12, %v5769_v27  ;;  %v988_v9 = vadd.f32 %v987_v1, %v873_v20  ;;  %v750_v31 = vsub.f32 %v7659_v62, %v5706_v33  ;;  %v874_v11 = vmul.f32 %v746_v37, %v746_v37 }
 0x17a   :  { %7657 = vst [vmem:[#allocation126_spill] sm:$0xff] %v5780_v53  ;;  %v1024_v47 = vadd.f32 %v1023_v13, %v870_v21  ;;  %7658 = vst [vmem:[#allocation127_spill] sm:$0xff] %v5784_v34  ;;  %v5791_v28 = vadd.f32 %v5661_v30, %v5340_v6  ;;  %v753_v36 = vsub.f32 %v7661_v57, %v5663_v60  ;;  %v7664_v13 = vld [vmem:[#allocation24_spill] sm:$0xff] }
 0x17b   :  { %v675_v44 = vadd.f32 %v674_v51, %v5773_v41  ;;  %v877_v12 = vmul.f32 %v749_v55, %v749_v55  ;;  %v708_v50 = vadd.f32 %v707_v0, %v5762_v42  ;;  %v5804_v30 = vadd.f32 %v5596_v46, %v5398_v22 }
 0x17c   :  { %v5691_v40 = vpop.f32.mrb[72].mxu1  ;;  %7660 = vst [vmem:[#allocation128_spill] sm:$0xff] %v5791_v28  ;;  %v1025_v1 = vadd.f32 %v1024_v47, %v874_v11  ;;  %v754_v51 = vsub.f32 %v7664_v13, %v5706_v33  ;;  %v878_v55 = vmul.f32 %v750_v31, %v750_v31 }
 0x17d   :  { %v5693_v16 = vpop.f32.mrb[73].mxu1  ;;  %v676_v63 = vadd.f32 %v675_v44, %v5780_v53  ;;  %v5799_v20 = vadd.f32 %v5691_v40, %v5340_v6  ;;  %v989_v37 = vadd.f32 %v988_v9, %v877_v12  ;;  %v709_v21 = vadd.f32 %v708_v50, %v5784_v34  ;;  %7663 = vst [vmem:[#allocation130_spill] sm:$0xff] %v5804_v30  ;;  %v7666_v40 = vld [vmem:[#allocation25_spill] sm:$0xff] }
 0x17e   :  { %v5704_v15 = vpop.f32.mrb[74].mxu1  ;;  %v757_v47 = vsub.f32 %v7666_v40, %v5663_v60  ;;  %v881_v9 = vmul.f32 %v753_v36, %v753_v36  ;;  %v1026_v44 = vadd.f32 %v1025_v1, %v878_v55  ;;  %v5817_v12 = vadd.f32 %v5620_v48, %v5398_v22  ;;  %v7671_v48 = vld [vmem:[#allocation27_spill] sm:$0xff] }
 0x17f   :  { %v5708_v14 = vpop.f32.mrb[75].mxu1  ;;  %7662 = vst [vmem:[#allocation129_spill] sm:$0xff] %v5799_v20  ;;  %v677_v0 = vadd.f32 %v676_v63, %v5791_v28  ;;  %v5811_v11 = vadd.f32 %v5704_v15, %v5340_v6  ;;  %v7669_v63 = vld [vmem:[#allocation26_spill] sm:$0xff]  ;;  %v882_v15 = vmul.f32 %v754_v51, %v754_v51  ;;  %v710_v57 = vadd.f32 %v709_v21, %v5804_v30  ;;  %v7673_v21 = vld [vmem:[#allocation28_spill] sm:$0xff] }
 0x180   :  { %7667 = vst [vmem:[#allocation132_spill] sm:$0xff] %v5817_v12  ;;  %v990_v31 = vadd.f32 %v989_v37, %v881_v9  ;;  %v758_v13 = vsub.f32 %v7669_v63, %v5706_v33  ;;  %v761_v1 = vsub.f32 %v7671_v48, %v5663_v60  ;;  %v885_v55 = vmul.f32 %v757_v47, %v757_v47  ;;  %v7675_v47 = vld [vmem:[#allocation29_spill] sm:$0xff] }
 0x181   :  { %7665 = vst [vmem:[#allocation131_spill] sm:$0xff] %v5811_v11  ;;  %v678_v46 = vadd.f32 %v677_v0, %v5799_v20  ;;  %v1027_v0 = vadd.f32 %v1026_v44, %v882_v15  ;;  %v5835_v37 = vadd.f32 %v5629_v59, %v5398_v22  ;;  %v762_v9 = vsub.f32 %v7673_v21, %v5706_v33 }
 0x182   :  { %v886_v63 = vmul.f32 %v758_v13, %v758_v13  ;;  %v889_v44 = vmul.f32 %v761_v1, %v761_v1 }
 0x183   :  { %v679_v40 = vadd.f32 %v678_v46, %v5811_v11  ;;  %7672 = vst [vmem:[#allocation135_spill] sm:$0xff] %v5835_v37  ;;  %v991_v46 = vadd.f32 %v990_v31, %v885_v55  ;;  %v890_v31 = vmul.f32 %v762_v9, %v762_v9 }
 0x184   :  { %v568_v10 = vpop.f32.mrb[76].mxu1  ;;  %v1028_v15 = vadd.f32 %v1027_v0, %v886_v63  ;;  %v5859_v0 = vadd.f32 %v5693_v16, %v5398_v22 }
 0x185   :  { %v5738_v7 = vpop.f32.mrb[77].mxu1  ;;  %v5821_v50 = vadd.f32 %v568_v10, %v5340_v6  ;;  %v711_v10 = vadd.f32 %v710_v57, %v5817_v12  ;;  %v765_v57 = vsub.f32 %v7675_v47, %v5663_v60  ;;  %v992_v21 = vadd.f32 %v991_v46, %v889_v44  ;;  %v7680_v46 = vld [vmem:[#allocation32_spill] sm:$0xff] }
 0x186   :  { %v572_v35 = vpop.f32.mrb[78].mxu1  ;;  %v1029_v63 = vadd.f32 %v1028_v15, %v890_v31  ;;  %7679 = vst [vmem:[#allocation138_spill] sm:$0xff] %v5859_v0  ;;  %v770_v9 = vsub.f32 %v7680_v46, %v5706_v33  ;;  %v5869_v15 = vadd.f32 %v5708_v14, %v5398_v22  ;;  %v7686_v14 = vld [vmem:[#allocation36_spill] sm:$0xff] }
 0x187   :  { %v5747_v39 = vpop.f32.mrb[79].mxu1  ;;  %7668 = vst [vmem:[#allocation133_spill] sm:$0xff] %v5821_v50  ;;  %v5828_v36 = vadd.f32 %v572_v35, %v5340_v6  ;;  %v680_v51 = vadd.f32 %v679_v40, %v5821_v50  ;;  %v5842_v6 = vadd.f32 %v5653_v32, %v5398_v22  ;;  %v712_v59 = vadd.f32 %v711_v10, %v5835_v37  ;;  %v7676_v40 = vld [vmem:[#allocation30_spill] sm:$0xff] }
 0x188   :  { %v766_v62 = vsub.f32 %v7676_v40, %v5706_v33  ;;  %v5853_v32 = vadd.f32 %v5665_v18, %v5398_v22  ;;  %v893_v1 = vmul.f32 %v765_v57, %v765_v57  ;;  %v7681_v18 = vld [vmem:[#allocation33_spill] sm:$0xff]  ;;  %7682 = vst [vmem:[#allocation139_spill] sm:$0xff] %v5869_v15  ;;  %v778_v46 = vsub.f32 %v7686_v14, %v5706_v33 }
 0x189   :  { %7670 = vst [vmem:[#allocation134_spill] sm:$0xff] %v5828_v36  ;;  %7674 = vst [vmem:[#allocation136_spill] sm:$0xff] %v5842_v6  ;;  %v681_v35 = vadd.f32 %v680_v51, %v5828_v36  ;;  %v713_v13 = vadd.f32 %v712_v59, %v5842_v6  ;;  %v7678_v51 = vld [vmem:[#allocation31_spill] sm:$0xff]  ;;  %v773_v40 = vsub.f32 %v7681_v18, %v5663_v60 }
 0x18a   :  { %7677 = vst [vmem:[#allocation137_spill] sm:$0xff] %v5853_v32  ;;  %v769_v47 = vsub.f32 %v7678_v51, %v5663_v60  ;;  %v993_v10 = vadd.f32 %v992_v21, %v893_v1  ;;  %v894_v44 = vmul.f32 %v766_v62, %v766_v62  ;;  %v7683_v21 = vld [vmem:[#allocation34_spill] sm:$0xff]  ;;  %v898_v1 = vmul.f32 %v770_v9, %v770_v9  ;;  %v7685_v18 = vld [vmem:[#allocation35_spill] sm:$0xff] }
 0x18b   :  { %v682_v48 = vrot.slane %v681_v35, 4  ;;  %v714_v59 = vadd.f32 %v713_v13, %v5853_v32  ;;  %v774_v31 = vsub.f32 %v7683_v21, %v5706_v33  ;;  %v5875_v62 = vadd.f32 %v5738_v7, %v5398_v22  ;;  %v4560_v6 = vld [vmem:[#allocation2 + $0xd8] ss:$12 sps:$4 sm:$0xff]  }
 0x18c   :  { %v1030_v29 = vadd.f32 %v1029_v63, %v894_v44  ;;  %v901_v63 = vmul.f32 %v773_v40, %v773_v40  ;;  %v5885_v9 = vadd.f32 %v5747_v39, %v5398_v22  ;;  %v906_v51 = vmul.f32 %v778_v46, %v778_v46  ;;  %v4527_v39 = vld [vmem:[#allocation2 + $0x4] ss:$12 sps:$4 sm:$0xff]   ;;  %v7692_v46 = vld [vmem:[#allocation41_spill] sm:$0xff] }
 0x18d   :  { %v683_v55 = vadd.f32 %v682_v48, %v681_v35  ;;  %v897_v35 = vmul.f32 %v769_v47, %v769_v47  ;;  %v715_v57 = vadd.f32 %v714_v59, %v5859_v0  ;;  %7684 = vst [vmem:[#allocation140_spill] sm:$0xff] %v5875_v62  ;;  %v777_v47 = vsub.f32 %v7685_v18, %v5663_v60 }
 0x18e   :  { %v1031_v44 = vadd.f32 %v1030_v29, %v898_v1  ;;  %7687 = vst [vmem:[#allocation141_spill] sm:$0xff] %v5885_v9  ;;  %2358 = vmatprep.subr.bf16.mxu0 %v4527_v39 }
 0x18f   :  { %v684_v48 = vrot.slane %v683_v55, 2  ;;  %v994_v16 = vadd.f32 %v993_v10, %v897_v35  ;;  %v716_v59 = vadd.f32 %v715_v57, %v5869_v15  ;;  %v902_v35 = vmul.f32 %v774_v31, %v774_v31  ;;  %v7689_v57 = vld [vmem:[#allocation38_spill] sm:$0xff]  ;;  %v7691_v15 = vld [vmem:[#allocation40_spill] sm:$0xff] }
 0x190   :  { %v905_v18 = vmul.f32 %v777_v47, %v777_v47  ;;  %v782_v1 = vsub.f32 %v7689_v57, %v5706_v33  ;;  %v7701_v57 = vld [vmem:[#allocation44_spill] sm:$0xff] }
 0x191   :  { %v685_v13 = vadd.f32 %v684_v48, %v683_v55  ;;  %v995_v10 = vadd.f32 %v994_v16, %v901_v63  ;;  %v717_v21 = vadd.f32 %v716_v59, %v5875_v62  ;;  %v7688_v55 = vld [vmem:[#allocation37_spill] sm:$0xff]  ;;  %v1032_v40 = vadd.f32 %v1031_v44, %v902_v35  ;;  %v7690_v63 = vld [vmem:[#allocation39_spill] sm:$0xff] }
 0x192   :  { %v781_v48 = vsub.f32 %v7688_v55, %v5663_v60  ;;  %v785_v59 = vsub.f32 %v7690_v63, %v5663_v60  ;;  %v786_v55 = vsub.f32 %v7691_v15, %v5706_v33  ;;  %v910_v47 = vmul.f32 %v782_v1, %v782_v1  ;;  %v4530_v63 = vld [vmem:[#allocation2 + $0x18] ss:$12 sps:$4 sm:$0xff]  }
 0x193   :  { %v686_v7 = vrot.slane %v685_v13, 1  ;;  %v996_v29 = vadd.f32 %v995_v10, %v905_v18  ;;  %v718_v16 = vadd.f32 %v717_v21, %v5885_v9  ;;  %v1033_v22 = vadd.f32 %v1032_v40, %v906_v51  ;;  %v4525_v18 = vld [vmem:[#allocation2] ss:$12 sps:$4 sm:$0xff]   ;;  %v7693_v51 = vld [vmem:[#allocation42_spill] sm:$0xff]  ;;  %v7694_v1 = vld [vmem:[#allocation43_spill] sm:$0xff] }
 0x194   :  { %v909_v14 = vmul.f32 %v781_v48, %v781_v48  ;;  %v789_v21 = vsub.f32 %v7692_v46, %v5663_v60  ;;  %2359 = vmatpush1.bf16.msra.mxu0 %v4525_v18  ;;  %v914_v40 = vmul.f32 %v786_v55, %v786_v55  ;;  %v793_v15 = vsub.f32 %v7694_v1, %v5663_v60  ;;  %v4535_v1 = vld [vmem:[#allocation2 + $0x34] ss:$12 sps:$4 sm:$0xff]  }
 0x195   :  { %v687_v31 = vadd.f32 %v686_v7, %v685_v13  ;;  %v719_v44 = vrot.slane %v718_v16, 4  ;;  %v913_v13 = vmul.f32 %v785_v59, %v785_v59  ;;  %v1034_v35 = vadd.f32 %v1033_v22, %v910_v47  ;;  %v4532_v7 = vld [vmem:[#allocation2 + $0x1c] ss:$12 sps:$4 sm:$0xff]  }
 0x196   :  { %v997_v62 = vadd.f32 %v996_v29, %v909_v14  ;;  %v790_v14 = vsub.f32 %v7693_v51, %v5706_v33  ;;  %2360 = vmatprep.subr.bf16.mxu0 %v4532_v7  ;;  %v7695_v59 = vld [vmem:[#allocation45_spill] sm:$0xff]  ;;  %v917_v18 = vmul.f32 %v789_v21, %v789_v21  ;;  %v7700_v7 = vld [vmem:[#allocation56_spill] sm:$0xff] }
 0x197   :  { %v5896_v10 = vmul.f32 0.00390625, %v687_v31  ;;  %v720_v29 = vadd.f32 %v719_v44, %v718_v16  ;;  %v797_v22 = vsub.f32 %v7695_v59, %v5663_v60  ;;  %v1035_v55 = vadd.f32 %v1034_v35, %v914_v40  ;;  %v7697_v16 = vld [vmem:[#allocation49_spill] sm:$0xff] }
 0x198   :  { %v998_v48 = vadd.f32 %v997_v62, %v913_v13  ;;  %v7696_v62 = vld [vmem:[#allocation47_spill] sm:$0xff]  ;;  %2361 = vmatpush1.bf16.msra.mxu0 %v4530_v63  ;;  %v805_v44 = vsub.f32 %v7697_v16, %v5663_v60  ;;  %v918_v21 = vmul.f32 %v790_v14, %v790_v14  ;;  %v821_v40 = vsub.f32 %v5364_v45, %v5663_v60 }
 0x199   :  { %v731_v31 = vsub.f32 %v5370_v19, %v5896_v10  ;;  %v735_v39 = vsub.f32 %v5352_v26, %v5896_v10  ;;  %v801_v47 = vsub.f32 %v7696_v62, %v5663_v60  ;;  %v7698_v13 = vld [vmem:[#allocation51_spill] sm:$0xff]  ;;  %v7699_v19 = vld [vmem:[#allocation53_spill] sm:$0xff]  ;;  %v817_v26 = vsub.f32 %v7700_v7, %v5663_v60  ;;  %2362 = vmatprep.subr.bf16.mxu0 %v4535_v1 }
 0x19a   :  { %v809_v46 = vsub.f32 %v7698_v13, %v5663_v60  ;;  %v813_v51 = vsub.f32 %v7699_v19, %v5663_v60  ;;  %v999_v59 = vadd.f32 %v998_v48, %v917_v18  ;;  %v794_v62 = vsub.f32 %v7701_v57, %v5706_v33  ;;  %v4533_v63 = vld [vmem:[#allocation2 + $0x30] ss:$12 sps:$4 sm:$0xff]  }
 0x19b   :  { %v721_v35 = vrot.slane %v720_v29, 2  ;;  %v739_v13 = vsub.f32 %v5374_v4, %v5896_v10  ;;  %v859_v16 = vmul.f32 %v731_v31, %v731_v31  ;;  %v863_v9 = vmul.f32 %v735_v39, %v735_v39  ;;  %v4538_v39 = vld [vmem:[#allocation2 + $0x4c] ss:$12 sps:$4 sm:$0xff]  }
 0x19c   :  { %v825_v7 = vsub.f32 %v5382_v49, %v5663_v60  ;;  %v829_v48 = vsub.f32 %v5394_v23, %v5663_v60  ;;  %v921_v18 = vmul.f32 %v793_v15, %v793_v15  ;;  %v1036_v57 = vadd.f32 %v1035_v55, %v918_v21  ;;  %2363 = vmatpush1.bf16.msra.mxu0 %v4533_v63  ;;  %v7702_v49 = vld [vmem:[#allocation46_spill] sm:$0xff] }
 0x19d   :  { %v833_v14 = vsub.f32 %v5415_v56, %v5663_v60  ;;  %v837_v45 = vsub.f32 %v5437_v58, %v5663_v60  ;;  %v841_v31 = vsub.f32 %v5458_v52, %v5663_v60  ;;  %v743_v1 = vsub.f32 %v5408_v8, %v5896_v10  ;;  %v4536_v21 = vld [vmem:[#allocation2 + $0x48] ss:$12 sps:$4 sm:$0xff]   ;;  %2364 = vmatprep.subr.bf16.mxu0 %v4538_v39  ;;  %v4541_v52 = vld [vmem:[#allocation2 + $0x60] ss:$12 sps:$4 sm:$0xff]  }
 0x19e   :  { %v1000_v4 = vadd.f32 %v999_v59, %v921_v18  ;;  %v798_v23 = vsub.f32 %v7702_v49, %v5706_v33  ;;  %v922_v15 = vmul.f32 %v794_v62, %v794_v62  ;;  %v722_v55 = vadd.f32 %v721_v35, %v720_v29 }
 0x19f   :  { %v845_v63 = vsub.f32 %v5470_v38, %v5663_v60  ;;  %v747_v58 = vsub.f32 %v5430_v5, %v5896_v10  ;;  %v867_v56 = vmul.f32 %v739_v13, %v739_v13  ;;  %v1059_v19 = vadd.f32 %v863_v9, %v859_v16  ;;  %v4543_v13 = vld [vmem:[#allocation2 + $0x64] ss:$12 sps:$4 sm:$0xff]  }
 0x1a0   :  { %v5946_v8 = vsub.f32 %v5491_v54, %v5663_v60  ;;  %v5950_v59 = vsub.f32 %v5519_v43, %v5663_v60  ;;  %v925_v62 = vmul.f32 %v797_v22, %v797_v22  ;;  %v1037_v29 = vadd.f32 %v1036_v57, %v922_v15  ;;  %2365 = vmatpush1.bf16.msra.mxu0 %v4536_v21  ;;  %v7703_v16 = vld [vmem:[#allocation48_spill] sm:$0xff]  ;;  %v4522_v60 = vld [vmem:[#allocation2 + $0x8] ss:$12 sps:$4 sm:$0xff]  }
 0x1a1   :  { %v929_v35 = vmul.f32 %v801_v47, %v801_v47  ;;  %v751_v18 = vsub.f32 %v5466_v61, %v5896_v10  ;;  %v871_v49 = vmul.f32 %v743_v1, %v743_v1  ;;  %v1060_v5 = vadd.f32 %v1059_v19, %v867_v56  ;;  %2366 = vmatprep.subr.bf16.mxu0 %v4543_v13  ;;  %v7714_v43 = vld [vmem:[#allocation72_spill] sm:$0xff] }
 0x1a2   :  { %v1001_v9 = vadd.f32 %v1000_v4, %v925_v62  ;;  %v802_v39 = vsub.f32 %v7703_v16, %v5706_v33  ;;  %v926_v54 = vmul.f32 %v798_v23, %v798_v23  ;;  %v723_v38 = vrot.slane %v722_v55, 1  ;;  %v4546_v62 = vld [vmem:[#allocation2 + $0x7c] ss:$12 sps:$4 sm:$0xff]   ;;  %v7721_v16 = vld [vmem:[#allocation76_spill] sm:$0xff] }
 0x1a3   :  { %v933_v0 = vmul.f32 %v805_v44, %v805_v44  ;;  %v755_v22 = vsub.f32 %v5481_v3, %v5896_v10  ;;  %v875_v57 = vmul.f32 %v747_v58, %v747_v58  ;;  %v1061_v15 = vadd.f32 %v1060_v5, %v871_v49  ;;  %v7704_v58 = vld [vmem:[#allocation50_spill] sm:$0xff] }
 0x1a4   :  { %v937_v47 = vmul.f32 %v809_v46, %v809_v46  ;;  %v5958_v21 = vmul.f32 %v813_v51, %v813_v51  ;;  %v5960_v1 = vmul.f32 %v817_v26, %v817_v26  ;;  %v1038_v19 = vadd.f32 %v1037_v29, %v926_v54  ;;  %2367 = vmatpush1.bf16.msra.mxu0 %v4541_v52  ;;  %v4544_v51 = vld [vmem:[#allocation2 + $0x78] ss:$12 sps:$4 sm:$0xff]  }
 0x1a5   :  { %v5962_v4 = vmul.f32 %v821_v40, %v821_v40  ;;  %v759_v23 = vsub.f32 %v5511_v24, %v5896_v10  ;;  %v879_v56 = vmul.f32 %v751_v18, %v751_v18  ;;  %v1062_v44 = vadd.f32 %v1061_v15, %v875_v57  ;;  %2368 = vmatprep.subr.bf16.mxu0 %v4546_v62  ;;  %v4550_v57 = vld [vmem:[#allocation2 + $0x94] ss:$12 sps:$4 sm:$0xff]   ;;  %v7713_v24 = vld [vmem:[#allocation75_spill] sm:$0xff] }
 0x1a6   :  { %v1002_v61 = vadd.f32 %v1001_v9, %v929_v35  ;;  %v806_v49 = vsub.f32 %v7704_v58, %v5706_v33  ;;  %v930_v5 = vmul.f32 %v802_v39, %v802_v39  ;;  %v724_v46 = vadd.f32 %v723_v38, %v722_v55  ;;  %v7705_v38 = vld [vmem:[#allocation93_spill] sm:$0xff]  ;;  %v4557_v58 = vld [vmem:[#allocation2 + $0xc4] ss:$12 sps:$4 sm:$0xff]  }
 0x1a7   :  { %v5968_v13 = vmul.f32 %v825_v7, %v825_v7  ;;  %v763_v26 = vsub.f32 %v5528_v2, %v5896_v10  ;;  %v883_v52 = vmul.f32 %v755_v22, %v755_v22  ;;  %v1063_v54 = vadd.f32 %v1062_v44, %v879_v56  ;;  %v7706_v22 = vld [vmem:[#allocation52_spill] sm:$0xff] }
 0x1a8   :  { %v5972_v40 = vmul.f32 %v829_v48, %v829_v48  ;;  %v5974_v29 = vmul.f32 %v833_v14, %v833_v14  ;;  %v5976_v18 = vmul.f32 %v837_v45, %v837_v45  ;;  %v1039_v35 = vadd.f32 %v1038_v19, %v930_v5  ;;  %2369 = vmatpush1.bf16.msra.mxu0 %v4544_v51  ;;  %v4548_v14 = vld [vmem:[#allocation2 + $0x90] ss:$12 sps:$4 sm:$0xff]  }
 0x1a9   :  { %v5978_v9 = vmul.f32 %v841_v31, %v841_v31  ;;  %v767_v7 = vsub.f32 %v7705_v38, %v5896_v10  ;;  %v887_v55 = vmul.f32 %v759_v23, %v759_v23  ;;  %v1064_v39 = vadd.f32 %v1063_v54, %v883_v52  ;;  %v7707_v19 = vld [vmem:[#allocation95_spill] sm:$0xff]  ;;  %2370 = vmatprep.subr.bf16.mxu0 %v4550_v57  ;;  %v7710_v52 = vld [vmem:[#allocation64_spill] sm:$0xff] }
 0x1aa   :  { %v1003_v15 = vadd.f32 %v1002_v61, %v933_v0  ;;  %v810_v56 = vsub.f32 %v7706_v22, %v5706_v33  ;;  %v934_v48 = vmul.f32 %v806_v49, %v806_v49  ;;  %v5984_v44 = vmul.f32 0.00390625, %v724_v46  ;;  %v7708_v23 = vld [vmem:[#allocation55_spill] sm:$0xff] }
 0x1ab   :  { %v5986_v45 = vmul.f32 %v845_v63, %v845_v63  ;;  %v771_v31 = vsub.f32 %v7707_v19, %v5896_v10  ;;  %v891_v62 = vmul.f32 %v763_v26, %v763_v26  ;;  %v1065_v5 = vadd.f32 %v1064_v39, %v887_v55  ;;  %v7709_v61 = vld [vmem:[#allocation59_spill] sm:$0xff]  ;;  %v7711_v63 = vld [vmem:[#allocation66_spill] sm:$0xff] }
 0x1ac   :  { %v814_v51 = vsub.f32 %v7708_v23, %v5706_v33  ;;  %v818_v0 = vsub.f32 %v7709_v61, %v5706_v33  ;;  %v5996_v49 = vsub.f32 %v7710_v52, %v5706_v33  ;;  %v1040_v46 = vadd.f32 %v1039_v35, %v934_v48  ;;  %2371 = vmatpush1.bf16.msra.mxu0 %v4548_v14  ;;  %v7712_v26 = vld [vmem:[#allocation98_spill] sm:$0xff]  ;;  %v4554_v19 = vld [vmem:[#allocation2 + $0xac] ss:$12 sps:$4 sm:$0xff]   ;;  %v7715_v48 = vld [vmem:[#allocation68_spill] sm:$0xff] }
 0x1ad   :  { %v6000_v54 = vsub.f32 %v7711_v63, %v5706_v33  ;;  %v775_v55 = vsub.f32 %v7712_v26, %v5896_v10  ;;  %v895_v39 = vmul.f32 %v767_v7, %v767_v7  ;;  %v1066_v57 = vadd.f32 %v1065_v5, %v891_v62  ;;  %v4552_v35 = vld [vmem:[#allocation2 + $0xa8] ss:$12 sps:$4 sm:$0xff]   ;;  %v7716_v63 = vld [vmem:[#allocation100_spill] sm:$0xff]  ;;  %2372 = vmatprep.subr.bf16.mxu0 %v4554_v19  ;;  %v7719_v5 = vld [vmem:[#allocation83_spill] sm:$0xff] }
 0x1ae   :  { %v1004_v38 = vadd.f32 %v1003_v15, %v937_v47  ;;  %v938_v2 = vmul.f32 %v810_v56, %v810_v56  ;;  %v732_v3 = vsub.f32 %v7713_v24, %v5984_v44  ;;  %v736_v52 = vsub.f32 %v7714_v43, %v5984_v44  ;;  %v7717_v47 = vld [vmem:[#allocation71_spill] sm:$0xff]  ;;  %v7718_v56 = vld [vmem:[#allocation77_spill] sm:$0xff] }
 0x1af   :  { %v6010_v14 = vsub.f32 %v7715_v48, %v5706_v33  ;;  %v779_v61 = vsub.f32 %v7716_v63, %v5896_v10  ;;  %v899_v26 = vmul.f32 %v771_v31, %v771_v31  ;;  %v1067_v7 = vadd.f32 %v1066_v57, %v895_v39  ;;  %v7720_v63 = vld [vmem:[#allocation102_spill] sm:$0xff] }
 0x1b0   :  { %v6016_v15 = vsub.f32 %v7717_v47, %v5706_v33  ;;  %v6020_v62 = vsub.f32 %v7718_v56, %v5706_v33  ;;  %v6024_v23 = vsub.f32 %v7719_v5, %v5706_v33  ;;  %v1041_v48 = vadd.f32 %v1040_v46, %v938_v2  ;;  %2373 = vmatpush1.bf16.msra.mxu0 %v4552_v35  ;;  %v4521_v57 = vld [vmem:[#allocation2 + $0xc8] ss:$12 sps:$4 sm:$0xff]   ;;  %v4555_v5 = vld [vmem:[#allocation2 + $0xc0] ss:$12 sps:$4 sm:$0xff]  }
 0x1b1   :  { %v942_v22 = vmul.f32 %v814_v51, %v814_v51  ;;  %v783_v31 = vsub.f32 %v7720_v63, %v5896_v10  ;;  %v903_v39 = vmul.f32 %v775_v55, %v775_v55  ;;  %v1068_v19 = vadd.f32 %v1067_v7, %v899_v26  ;;  %v7722_v2 = vld [vmem:[#allocation104_spill] sm:$0xff]  ;;  %3969 = vmatprep.subr.bf16.mxu1 %v4521_v57  ;;  %v7723_v26 = vld [vmem:[#allocation87_spill] sm:$0xff] }
 0x1b2   :  { %v1005_v47 = vadd.f32 %v1004_v38, %v5958_v21  ;;  %v740_v56 = vsub.f32 %v7721_v16, %v5984_v44  ;;  %v860_v43 = vmul.f32 %v732_v3, %v732_v3  ;;  %v864_v24 = vmul.f32 %v736_v52, %v736_v52  ;;  %2374 = vmatprep.subr.bf16.mxu0 %v4557_v58  ;;  %v7724_v21 = vld [vmem:[#allocation92_spill] sm:$0xff]  ;;  %v7725_v3 = vld [vmem:[#allocation81_spill] sm:$0xff] }
 0x1b3   :  { %v787_v46 = vsub.f32 %v7722_v2, %v5896_v10  ;;  %v907_v51 = vmul.f32 %v779_v61, %v779_v61  ;;  %v1069_v35 = vadd.f32 %v1068_v19, %v903_v39  ;;  %v6035_v55 = vsub.f32 %v7723_v26, %v5706_v33  ;;  %3970 = vmatpush3.bf16.msra.mxu1 %v4522_v60  ;;  %v7726_v2 = vld [vmem:[#allocation106_spill] sm:$0xff]  ;;  %v4523_v58 = vld [vmem:[#allocation2 + $0xe0] ss:$12 sps:$4 sm:$0xff]   ;;  %v4562_v57 = vld [vmem:[#allocation2 + $0xdc] ss:$12 sps:$4 sm:$0xff]  }
 0x1b4   :  { %v6039_v38 = vsub.f32 %v7724_v21, %v5706_v33  ;;  %v1042_v7 = vadd.f32 %v1041_v48, %v942_v22  ;;  %v744_v52 = vsub.f32 %v7725_v3, %v5984_v44  ;;  %v946_v63 = vmul.f32 %v818_v0, %v818_v0  ;;  %2375 = vmatpush1.bf16.msra.mxu0 %v4555_v5  ;;  %v7727_v16 = vld [vmem:[#allocation85_spill] sm:$0xff]  ;;  %v7728_v60 = vld [vmem:[#allocation108_spill] sm:$0xff] }
 0x1b5   :  { %v791_v61 = vsub.f32 %v7726_v2, %v5896_v10  ;;  %v911_v39 = vmul.f32 %v783_v31, %v783_v31  ;;  %v1070_v19 = vadd.f32 %v1069_v35, %v907_v51  ;;  %v1006_v26 = vadd.f32 %v1005_v47, %v5960_v1  ;;  %v4524_v48 = vld [vmem:[#allocation2 + $0x20] ss:$12 sps:$4 sm:$0xff]   ;;  %3971 = vmatprep.subr.bf16.mxu1 %v4523_v58  ;;  %v4563_v58 = vld [vmem:[#allocation2 + $0xf0] ss:$12 sps:$4 sm:$0xff]  }
 0x1b6   :  { %v748_v21 = vsub.f32 %v7727_v16, %v5984_v44  ;;  %v868_v32 = vmul.f32 %v740_v56, %v740_v56  ;;  %v1096_v22 = vadd.f32 %v864_v24, %v860_v43  ;;  %v795_v0 = vsub.f32 %v7728_v60, %v5896_v10  ;;  %2376 = vmatprep.subr.bf16.mxu0 %v4562_v57  ;;  %v7729_v5 = vld [vmem:[#allocation89_spill] sm:$0xff]  ;;  %v4528_v60 = vld [vmem:[#allocation2 + $0xf8] ss:$12 sps:$4 sm:$0xff]  }
 0x1b7   :  { %v915_v3 = vmul.f32 %v787_v46, %v787_v46  ;;  %v1071_v37 = vadd.f32 %v1070_v19, %v911_v39  ;;  %v1043_v31 = vadd.f32 %v1042_v7, %v946_v63  ;;  %v752_v51 = vsub.f32 %v7729_v5, %v5984_v44  ;;  %3972 = vmatpush3.bf16.msra.mxu1 %v4524_v48  ;;  %v7730_v24 = vld [vmem:[#allocation109_spill] sm:$0xff]  ;;  %v4565_v46 = vld [vmem:[#allocation2 + $0xf4] ss:$12 sps:$4 sm:$0xff]   ;;  %v7731_v63 = vld [vmem:[#allocation91_spill] sm:$0xff] }
 0x1b8   :  { %v872_v35 = vmul.f32 %v744_v52, %v744_v52  ;;  %v1097_v1 = vadd.f32 %v1096_v22, %v868_v32  ;;  %v950_v47 = vmul.f32 %v5996_v49, %v5996_v49  ;;  %v799_v43 = vsub.f32 %v7730_v24, %v5896_v10  ;;  %2377 = vmatpush1.bf16.msra.mxu0 %v4560_v6  ;;  %v4529_v32 = vld [vmem:[#allocation2 + $0x38] ss:$12 sps:$4 sm:$0xff]   ;;  %v7733_v6 = vld [vmem:[#allocation94_spill] sm:$0xff] }
 0x1b9   :  { %v919_v56 = vmul.f32 %v791_v61, %v791_v61  ;;  %v1072_v2 = vadd.f32 %v1071_v37, %v915_v3  ;;  %v1007_v39 = vadd.f32 %v1006_v26, %v5962_v4  ;;  %v756_v7 = vsub.f32 %v7731_v63, %v5984_v44  ;;  %v7732_v57 = vld [vmem:[#allocation112_spill] sm:$0xff]  ;;  %3973 = vmatprep.subr.bf16.mxu1 %v4528_v60 }
 0x1ba   :  { %v876_v19 = vmul.f32 %v748_v21, %v748_v21  ;;  %v1098_v52 = vadd.f32 %v1097_v1, %v872_v35  ;;  %v803_v49 = vsub.f32 %v7732_v57, %v5896_v10  ;;  %v923_v22 = vmul.f32 %v795_v0, %v795_v0  ;;  %2378 = vmatprep.subr.bf16.mxu0 %v4565_v46  ;;  %v7734_v21 = vld [vmem:[#allocation114_spill] sm:$0xff]  ;;  %v7735_v0 = vld [vmem:[#allocation97_spill] sm:$0xff] }
 0x1bb   :  { %v1073_v48 = vadd.f32 %v1072_v2, %v919_v56  ;;  %v1044_v37 = vadd.f32 %v1043_v31, %v950_v47  ;;  %v760_v3 = vsub.f32 %v7733_v6, %v5984_v44  ;;  %v880_v61 = vmul.f32 %v752_v51, %v752_v51  ;;  %3974 = vmatpush3.bf16.msra.mxu1 %v4529_v32  ;;  %v4539_v57 = vld [vmem:[#allocation2 + $0x110] ss:$12 sps:$4 sm:$0xff]   ;;  %v4568_v2 = vld [vmem:[#allocation2 + $0x10c] ss:$12 sps:$4 sm:$0xff]   ;;  %v4566_v46 = vld [vmem:[#allocation2 + $0x108] ss:$12 sps:$4 sm:$0xff]  }
 0x1bc   :  { %v1099_v4 = vadd.f32 %v1098_v52, %v876_v19  ;;  %v954_v26 = vmul.f32 %v6000_v54, %v6000_v54  ;;  %v807_v35 = vsub.f32 %v7734_v21, %v5896_v10  ;;  %v927_v1 = vmul.f32 %v799_v43, %v799_v43  ;;  %2379 = vmatpush1.bf16.msra.mxu0 %v4563_v58  ;;  %v4540_v56 = vld [vmem:[#allocation2 + $0x50] ss:$12 sps:$4 sm:$0xff]   ;;  %v7736_v19 = vld [vmem:[#allocation116_spill] sm:$0xff] }
 0x1bd   :  { %v1074_v24 = vadd.f32 %v1073_v48, %v923_v22  ;;  %v1008_v60 = vadd.f32 %v1007_v39, %v5968_v13  ;;  %v764_v31 = vsub.f32 %v7735_v0, %v5984_v44  ;;  %v884_v47 = vmul.f32 %v756_v7, %v756_v7  ;;  %3975 = vmatprep.subr.bf16.mxu1 %v4539_v57  ;;  %v7737_v58 = vld [vmem:[#allocation99_spill] sm:$0xff]  ;;  %v7738_v7 = vld [vmem:[#allocation118_spill] sm:$0xff] }
 0x1be   :  { %v1100_v51 = vadd.f32 %v1099_v4, %v880_v61  ;;  %v811_v54 = vsub.f32 %v7736_v19, %v5896_v10  ;;  %v931_v52 = vmul.f32 %v803_v49, %v803_v49  ;;  %2380 = vmatprep.subr.bf16.mxu0 %v4568_v2  ;;  %v1045_v43 = vadd.f32 %v1044_v37, %v954_v26  ;;  %v4547_v19 = vld [vmem:[#allocation2 + $0x128] ss:$12 sps:$4 sm:$0xff]   ;;  %v4571_v2 = vld [vmem:[#allocation2 + $0x120] ss:$12 sps:$4 sm:$0xff]  }
 0x1bf   :  { %v1075_v32 = vadd.f32 %v1074_v24, %v927_v1  ;;  %v768_v22 = vsub.f32 %v7737_v58, %v5984_v44  ;;  %v888_v48 = vmul.f32 %v760_v3, %v760_v3  ;;  %3976 = vmatpush3.bf16.msra.mxu1 %v4540_v56  ;;  %v958_v39 = vmul.f32 %v6010_v14, %v6010_v14  ;;  %v4573_v24 = vld [vmem:[#allocation2 + $0x124] ss:$12 sps:$4 sm:$0xff]   ;;  %v7739_v49 = vld [vmem:[#allocation101_spill] sm:$0xff] }
 0x1c0   :  { %v1101_v13 = vadd.f32 %v1100_v51, %v884_v47  ;;  %v815_v61 = vsub.f32 %v7738_v7, %v5896_v10  ;;  %v935_v4 = vmul.f32 %v807_v35, %v807_v35  ;;  %2381 = vmatpush1.bf16.msra.mxu0 %v4566_v46  ;;  %v1009_v57 = vadd.f32 %v1008_v60, %v5972_v40  ;;  %v4551_v1 = vld [vmem:[#allocation2 + $0x68] ss:$12 sps:$4 sm:$0xff]   ;;  %v4558_v35 = vld [vmem:[#allocation2 + $0x140] ss:$12 sps:$4 sm:$0xff]   ;;  %v7740_v46 = vld [vmem:[#allocation103_spill] sm:$0xff] }
 0x1c1   :  { %v1076_v21 = vadd.f32 %v1075_v32, %v931_v52  ;;  %v772_v37 = vsub.f32 %v7739_v49, %v5984_v44  ;;  %v892_v26 = vmul.f32 %v764_v31, %v764_v31  ;;  %v819_v14 = vsub.f32 %v5734_v17, %v5896_v10  ;;  %3977 = vmatprep.subr.bf16.mxu1 %v4547_v19  ;;  %v4559_v32 = vld [vmem:[#allocation2 + $0x80] ss:$12 sps:$4 sm:$0xff]   ;;  %v4576_v31 = vld [vmem:[#allocation2 + $0x13c] ss:$12 sps:$4 sm:$0xff]  }
 0x1c2   :  { %v1102_v3 = vadd.f32 %v1101_v13, %v888_v48  ;;  %v939_v47 = vmul.f32 %v811_v54, %v811_v54  ;;  %2382 = vmatprep.subr.bf16.mxu0 %v4573_v24  ;;  %v1046_v56 = vadd.f32 %v1045_v43, %v958_v39  ;;  %v776_v52 = vsub.f32 %v7740_v46, %v5984_v44  ;;  %v4569_v54 = vld [vmem:[#allocation2 + $0x158] ss:$12 sps:$4 sm:$0xff]   ;;  %v7741_v43 = vld [vmem:[#allocation105_spill] sm:$0xff]  ;;  %v4580_v24 = vld [vmem:[#allocation2 + $0x154] ss:$12 sps:$4 sm:$0xff]  }
 0x1c3   :  { %v1077_v51 = vadd.f32 %v1076_v21, %v935_v4  ;;  %v896_v40 = vmul.f32 %v768_v22, %v768_v22  ;;  %3978 = vmatpush3.bf16.msra.mxu1 %v4551_v1  ;;  %v823_v48 = vsub.f32 %v5753_v25, %v5896_v10  ;;  %v943_v13 = vmul.f32 %v815_v61, %v815_v61  ;;  %v4574_v21 = vld [vmem:[#allocation2 + $0x138] ss:$12 sps:$4 sm:$0xff]  }
 0x1c4   :  { %v1103_v60 = vadd.f32 %v1102_v3, %v892_v26  ;;  %3979 = vmatprep.subr.bf16.mxu1 %v4558_v35  ;;  %2383 = vmatpush1.bf16.msra.mxu0 %v4571_v2  ;;  %v962_v19 = vmul.f32 %v6016_v15, %v6016_v15  ;;  %v780_v39 = vsub.f32 %v7741_v43, %v5984_v44  ;;  %v7742_v2 = vld [vmem:[#allocation107_spill] sm:$0xff] }
 0x1c5   :  { %v1078_v7 = vadd.f32 %v1077_v51, %v939_v47  ;;  %v900_v22 = vmul.f32 %v772_v37, %v772_v37  ;;  %2384 = vmatprep.subr.bf16.mxu0 %v4576_v31  ;;  %v1010_v26 = vadd.f32 %v1009_v57, %v5974_v29  ;;  %v827_v61 = vsub.f32 %v5769_v27, %v5896_v10  ;;  %v4570_v25 = vld [vmem:[#allocation2 + $0x98] ss:$12 sps:$4 sm:$0xff]   ;;  %v4577_v29 = vld [vmem:[#allocation2 + $0x170] ss:$12 sps:$4 sm:$0xff]  }
 0x1c6   :  { %v1104_v4 = vadd.f32 %v1103_v60, %v896_v40  ;;  %v947_v3 = vmul.f32 %v819_v14, %v819_v14  ;;  %v1047_v47 = vadd.f32 %v1046_v56, %v962_v19  ;;  %v784_v51 = vsub.f32 %v7742_v2, %v5984_v44  ;;  %v4578_v57 = vld [vmem:[#allocation2 + $0x150] ss:$12 sps:$4 sm:$0xff]   ;;  %v7743_v14 = vld [vmem:[#allocation57_spill] sm:$0xff] }
 0x1c7   :  { %v1079_v1 = vadd.f32 %v1078_v7, %v943_v13  ;;  %v904_v35 = vmul.f32 %v776_v52, %v776_v52  ;;  %3980 = vmatpush3.bf16.msra.mxu1 %v4559_v32  ;;  %v831_v37 = vsub.f32 %v5773_v41, %v5896_v10  ;;  %v951_v40 = vmul.f32 %v823_v48, %v823_v48  ;;  %v4584_v32 = vld [vmem:[#allocation2 + $0x16c] ss:$12 sps:$4 sm:$0xff]   ;;  %v7793_v27 = vld [vmem:[#allocation26_spill] sm:$0xff] }
 0x1c8   :  { %v1105_v15 = vadd.f32 %v1104_v4, %v900_v22  ;;  %3981 = vmatprep.subr.bf16.mxu1 %v4569_v54  ;;  %2385 = vmatpush1.bf16.msra.mxu0 %v4574_v21  ;;  %v966_v7 = vmul.f32 %v6020_v62, %v6020_v62  ;;  %v788_v56 = vsub.f32 %v7743_v14, %v5984_v44  ;;  %v7744_v22 = vld [vmem:[#allocation111_spill] sm:$0xff]  ;;  %v7792_v41 = vld [vmem:[#allocation25_spill] sm:$0xff] }
 0x1c9   :  { %v1080_v60 = vadd.f32 %v1079_v1, %v947_v3  ;;  %v908_v31 = vmul.f32 %v780_v39, %v780_v39  ;;  %2386 = vmatprep.subr.bf16.mxu0 %v4580_v24  ;;  %v1011_v13 = vadd.f32 %v1010_v26, %v5976_v18  ;;  %v835_v48 = vsub.f32 %v5780_v53, %v5896_v10  ;;  %v4581_v1 = vld [vmem:[#allocation2 + $0xb0] ss:$12 sps:$4 sm:$0xff]   ;;  %v4582_v18 = vld [vmem:[#allocation2 + $0x168] ss:$12 sps:$4 sm:$0xff]  }
 0x1ca   :  { %v1106_v52 = vadd.f32 %v1105_v15, %v904_v35  ;;  %v955_v19 = vmul.f32 %v827_v61, %v827_v61  ;;  %v1048_v21 = vadd.f32 %v1047_v47, %v966_v7  ;;  %v792_v4 = vsub.f32 %v7744_v22, %v5984_v44  ;;  %v4588_v26 = vld [vmem:[#allocation2 + $0x248] ss:$12 sps:$4 sm:$0xff]   ;;  %v7795_v17 = vld [vmem:[#allocation27_spill] sm:$0xff] }
 0x1cb   :  { %v1081_v54 = vadd.f32 %v1080_v60, %v951_v40  ;;  %v912_v3 = vmul.f32 %v784_v51, %v784_v51  ;;  %3982 = vmatpush3.bf16.msra.mxu1 %v4570_v25  ;;  %v839_v39 = vsub.f32 %v5791_v28, %v5896_v10  ;;  %v959_v24 = vmul.f32 %v831_v37, %v831_v37  ;;  %v7745_v47 = vld [vmem:[#allocation113_spill] sm:$0xff]  ;;  %v4587_v25 = vld [vmem:[#allocation2 + $0x184] ss:$12 sps:$4 sm:$0xff]  }
 0x1cc   :  { %v1107_v62 = vadd.f32 %v1106_v52, %v908_v31  ;;  %3983 = vmatprep.subr.bf16.mxu1 %v4577_v29  ;;  %2387 = vmatpush1.bf16.msra.mxu0 %v4578_v57  ;;  %v970_v61 = vmul.f32 %v6024_v23, %v6024_v23  ;;  %v796_v15 = vsub.f32 %v7745_v47, %v5984_v44  ;;  %v7746_v31 = vld [vmem:[#allocation115_spill] sm:$0xff] }
 0x1cd   :  { %v1082_v35 = vadd.f32 %v1081_v54, %v955_v19  ;;  %v916_v40 = vmul.f32 %v788_v56, %v788_v56  ;;  %2388 = vmatprep.subr.bf16.mxu0 %v4584_v32  ;;  %v1012_v60 = vadd.f32 %v1011_v13, %v5978_v9  ;;  %v843_v37 = vsub.f32 %v5799_v20, %v5896_v10  ;;  %v7747_v13 = vld [vmem:[#allocation117_spill] sm:$0xff] }
 0x1ce   :  { %v1108_v51 = vadd.f32 %v1107_v62, %v912_v3  ;;  %v963_v7 = vmul.f32 %v835_v48, %v835_v48  ;;  %v1049_v57 = vadd.f32 %v1048_v21, %v970_v61  ;;  %v800_v52 = vsub.f32 %v7746_v31, %v5984_v44 }
 0x1cf   :  { %v1083_v29 = vadd.f32 %v1082_v35, %v959_v24  ;;  %v920_v19 = vmul.f32 %v792_v4, %v792_v4  ;;  %3984 = vmatpush3.bf16.msra.mxu1 %v4581_v1  ;;  %v847_v56 = vsub.f32 %v5811_v11, %v5896_v10  ;;  %v967_v54 = vmul.f32 %v839_v39, %v839_v39  ;;  %v7748_v35 = vld [vmem:[#allocation119_spill] sm:$0xff] }
 0x1d0   :  { %v1109_v23 = vadd.f32 %v1108_v51, %v916_v40  ;;  %2389 = vmatpush1.bf16.msra.mxu0 %v4582_v18  ;;  %4081 = vmatprep.subr.bf16.mxu1 %v4588_v26  ;;  %v974_v9 = vmul.f32 %v6035_v55, %v6035_v55  ;;  %v804_v48 = vsub.f32 %v7747_v13, %v5984_v44  ;;  %v7822_v13 = vld [vmem:[#allocation49_spill] sm:$0xff] }
 0x1d1   :  { %v1084_v32 = vadd.f32 %v1083_v29, %v963_v7  ;;  %v924_v21 = vmul.f32 %v796_v15, %v796_v15  ;;  %2551 = vmatprep.subr.bf16.mxu0 %v4587_v25  ;;  %v1013_v4 = vadd.f32 %v1012_v60, %v5986_v45  ;;  %v851_v62 = vsub.f32 %v5821_v50, %v5896_v10  ;;  %v7749_v15 = vld [vmem:[#allocation96_spill] sm:$0xff]  ;;  %v7750_v60 = vld [vmem:[#allocation121_spill] sm:$0xff] }
 0x1d2   :  { %v1110_v3 = vadd.f32 %v1109_v23, %v920_v19  ;;  %v971_v1 = vmul.f32 %v843_v37, %v843_v37  ;;  %v1050_v39 = vadd.f32 %v1049_v57, %v974_v9  ;;  %v808_v18 = vsub.f32 %v7748_v35, %v5984_v44  ;;  %v7821_v35 = vld [vmem:[#allocation48_spill] sm:$0xff] }
 0x1d3   :  { %v1085_v24 = vadd.f32 %v1084_v32, %v967_v54  ;;  %v928_v26 = vmul.f32 %v800_v52, %v800_v52  ;;  %v977_v55 = vmul.f32 %v5946_v8, %v5946_v8  ;;  %v854_v40 = vsub.f32 %v7749_v15, %v5706_v33 }
 0x1d4   :  { %v1111_v61 = vadd.f32 %v1110_v3, %v924_v21  ;;  %v975_v51 = vmul.f32 %v847_v56, %v847_v56  ;;  %v978_v45 = vmul.f32 %v6039_v38, %v6039_v38  ;;  %v812_v37 = vsub.f32 %v7750_v60, %v5984_v44  ;;  %v7820_v60 = vld [vmem:[#allocation47_spill] sm:$0xff] }
 0x1d5   :  { %v1086_v25 = vadd.f32 %v1085_v24, %v971_v1  ;;  %v932_v7 = vmul.f32 %v804_v48, %v804_v48  ;;  %v1014_v57 = vadd.f32 %v1013_v4, %v977_v55  ;;  %v855_v52 = vsub.f32 %v5828_v36, %v5896_v10 }
 0x1d6   :  { %v1112_v29 = vadd.f32 %v1111_v61, %v928_v26  ;;  %v979_v19 = vmul.f32 %v851_v62, %v851_v62  ;;  %v1051_v8 = vadd.f32 %v1050_v39, %v978_v45  ;;  %v816_v54 = vsub.f32 %v5762_v42, %v5984_v44  ;;  %v7751_v45 = vld [vmem:[#allocation135_spill] sm:$0xff]  ;;  %v7819_v42 = vld [vmem:[#allocation45_spill] sm:$0xff] }
 0x1d7   :  { %v1087_v23 = vadd.f32 %v1086_v25, %v975_v51  ;;  %v936_v56 = vmul.f32 %v808_v18, %v808_v18  ;;  %v981_v38 = vmul.f32 %v5950_v59, %v5950_v59  ;;  %v982_v9 = vmul.f32 %v854_v40, %v854_v40 }
 0x1d8   :  { %v1113_v32 = vadd.f32 %v1112_v29, %v932_v7  ;;  %v820_v48 = vsub.f32 %v5784_v34, %v5984_v44  ;;  %v940_v3 = vmul.f32 %v812_v37, %v812_v37  ;;  %v983_v24 = vmul.f32 %v855_v52, %v855_v52  ;;  %v7752_v52 = vld [vmem:[#allocation136_spill] sm:$0xff]  ;;  %v7818_v34 = vld [vmem:[#allocation43_spill] sm:$0xff] }
 0x1d9   :  { %v1088_v21 = vadd.f32 %v1087_v23, %v979_v19  ;;  %v1015_v1 = vadd.f32 %v1014_v57, %v981_v38  ;;  %v1052_v62 = vadd.f32 %v1051_v8, %v982_v9  ;;  %v824_v39 = vsub.f32 %v5804_v30, %v5984_v44  ;;  %v7816_v30 = vld [vmem:[#allocation40_spill] sm:$0xff] }
 0x1da   :  { %v1114_v4 = vadd.f32 %v1113_v32, %v936_v56  ;;  %v944_v26 = vmul.f32 %v816_v54, %v816_v54  ;;  %v828_v55 = vsub.f32 %v5817_v12, %v5984_v44  ;;  %v948_v59 = vmul.f32 %v820_v48, %v820_v48  ;;  %v7753_v32 = vld [vmem:[#allocation137_spill] sm:$0xff]  ;;  %v7814_v12 = vld [vmem:[#allocation38_spill] sm:$0xff] }
 0x1db   :  { %v1089_v18 = vadd.f32 %v1088_v21, %v983_v24  ;;  %v1016_v51 = vrot.slane %v1015_v1, 4  ;;  %v1053_v25 = vrot.slane %v1052_v62, 4  ;;  %v832_v37 = vsub.f32 %v7751_v45, %v5984_v44  ;;  %v7812_v45 = vld [vmem:[#allocation37_spill] sm:$0xff] }
 0x1dc   :  { %v1115_v61 = vadd.f32 %v1114_v4, %v940_v3  ;;  %v952_v7 = vmul.f32 %v824_v39, %v824_v39  ;;  %v836_v19 = vsub.f32 %v7752_v52, %v5984_v44  ;;  %v956_v23 = vmul.f32 %v828_v55, %v828_v55  ;;  %v7754_v3 = vld [vmem:[#allocation138_spill] sm:$0xff]  ;;  %v7810_v52 = vld [vmem:[#allocation36_spill] sm:$0xff] }
 0x1dd   :  { %v1090_v57 = vrot.slane %v1089_v18, 4  ;;  %v1017_v54 = vadd.f32 %v1016_v51, %v1015_v1  ;;  %v1054_v56 = vadd.f32 %v1053_v25, %v1052_v62  ;;  %v840_v38 = vsub.f32 %v7753_v32, %v5984_v44  ;;  %v7756_v62 = vld [vmem:[#allocation140_spill] sm:$0xff]  ;;  %v7808_v32 = vld [vmem:[#allocation35_spill] sm:$0xff] }
 0x1de   :  { %v1116_v40 = vadd.f32 %v1115_v61, %v944_v26  ;;  %v960_v9 = vmul.f32 %v832_v37, %v832_v37  ;;  %v844_v4 = vsub.f32 %v7754_v3, %v5984_v44  ;;  %v964_v24 = vmul.f32 %v836_v19, %v836_v19  ;;  %v7806_v3 = vld [vmem:[#allocation34_spill] sm:$0xff] }
 0x1df   :  { %v1091_v48 = vadd.f32 %v1090_v57, %v1089_v18  ;;  %v1018_v26 = vrot.slane %v1017_v54, 2  ;;  %v1055_v61 = vrot.slane %v1054_v56, 2  ;;  %v968_v55 = vmul.f32 %v840_v38, %v840_v38  ;;  %v7757_v57 = vld [vmem:[#allocation141_spill] sm:$0xff] }
 0x1e0   :  { %v1117_v29 = vadd.f32 %v1116_v40, %v948_v59  ;;  %v7755_v59 = vld [vmem:[#allocation139_spill] sm:$0xff]  ;;  %v852_v51 = vsub.f32 %v7756_v62, %v5984_v44  ;;  %v972_v25 = vmul.f32 %v844_v4, %v844_v4  ;;  %v7800_v62 = vld [vmem:[#allocation30_spill] sm:$0xff] }
 0x1e1   :  { %v848_v40 = vsub.f32 %v7755_v59, %v5984_v44  ;;  %v1092_v1 = vrot.slane %v1091_v48, 2  ;;  %v1056_v18 = vadd.f32 %v1055_v61, %v1054_v56  ;;  %v7803_v59 = vld [vmem:[#allocation32_spill] sm:$0xff] }
 0x1e2   :  { %v1118_v8 = vadd.f32 %v1117_v29, %v952_v7  ;;  %v1019_v29 = vadd.f32 %v1018_v26, %v1017_v54 }
 0x1e3   :  { %v976_v19 = vmul.f32 %v848_v40, %v848_v40  ;;  %v1057_v11 = vrot.slane %v1056_v18, 1 }
 0x1e4   :  { %v1119_v21 = vadd.f32 %v1118_v8, %v956_v23  ;;  %v856_v23 = vsub.f32 %v7757_v57, %v5984_v44  ;;  %v1020_v50 = vrot.slane %v1019_v29, 1  ;;  %v7802_v57 = vld [vmem:[#allocation31_spill] sm:$0xff] }
 0x1e5   :  { %v1058_v53 = vadd.f32 %v1057_v11, %v1056_v18  ;;  %v4797_v11 = vmov 1966171168  }
 0x1e6   :  { %v1120_v39 = vadd.f32 %v1119_v21, %v960_v9  ;;  %v1093_v9 = vadd.f32 %v1092_v1, %v1091_v48  ;;  %v980_v21 = vmul.f32 %v852_v51, %v852_v51  ;;  %v984_v38 = vmul.f32 %v856_v23, %v856_v23 }
 0x1e7   :  { %v1021_v28 = vadd.f32 %v1020_v50, %v1019_v29  ;;  %v1134_v26 = vmul.f32 0.00390625, %v1058_v53  ;;  %v1153_v50 = vunpack.c.l.s4 %v4797_v11 }
 0x1e8   :  { %v1121_v7 = vadd.f32 %v1120_v39, %v964_v24  ;;  %v1094_v39 = vrot.slane %v1093_v9, 1 }
 0x1e9   :  { %v1133_v56 = vmul.f32 0.00390625, %v1021_v28  ;;  %v1138_v48 = vadd.f32 1e-05, %v1134_v26 }
 0x1ea   :  { %v1122_v37 = vadd.f32 %v1121_v7, %v968_v55  ;;  %v1095_v55 = vadd.f32 %v1094_v39, %v1093_v9 }
 0x1ec   :  { %v1123_v8 = vadd.f32 %v1122_v37, %v972_v25  ;;  %v1135_v7 = vmul.f32 0.00390625, %v1095_v55  ;;  %v1137_v25 = vadd.f32 1e-05, %v1133_v56  ;;  %v7759_v56 = vld [vmem:[#allocation9_spill] sm:$0xff] }
 0x1ee   :  { %v1124_v36 = vadd.f32 %v1123_v8, %v976_v19  ;;  %v1139_v51 = vadd.f32 1e-05, %v1135_v7  ;;  %4673 = vrsqrt.f32 %v1137_v25  ;;  %v7758_v19 = vld [vmem:[#allocation8_spill] sm:$0xff] }
 0x1ef   :  { %4675 = vrsqrt.f32 %v1138_v48  ;;  %v7763_v48 = vld [vmem:[#allocation60_spill] sm:$0xff] }
 0x1f0   :  { %v1125_v24 = vadd.f32 %v1124_v36, %v980_v21  ;;  %4677 = vrsqrt.f32 %v1139_v51  ;;  %v7765_v51 = vld [vmem:[#allocation110_spill] sm:$0xff] }
 0x1f2   :  { %v1126_v20 = vadd.f32 %v1125_v24, %v984_v38 }
 0x1f4   :  { %v1127_v4 = vrot.slane %v1126_v20, 4 }
 0x1f6   :  { %v1128_v54 = vadd.f32 %v1127_v4, %v1126_v20  ;;  %v1154_v20 = vunpack.c.0.s8 %v1153_v50  ;;  %v1145_v4 = vld [vmem:[%s7277_s3] sm:$0xf] }
 0x1f8   :  { %v1129_v61 = vrot.slane %v1128_v54, 2  ;;  %v4674_v29 = vpop.eup %4673  ;;  %v1157_v8 = vsub.s32 %v1154_v20, %v7758_v19  ;;  %v1176_v19 = vld [vmem:[%s7278_s4] sm:$0xf] }
 0x1f9   :  { %v4676_v28 = vpop.eup %4675 }
 0x1fa   :  { %v1130_v40 = vadd.f32 %v1129_v61, %v1128_v54  ;;  %v4678_v53 = vpop.eup %4677  ;;  %v1150_v18 = vcombine.low %v4674_v29, %v4676_v28  ;;  %v7760_v61 = vld [vmem:[#allocation10_spill] sm:$0xff] }
 0x1fc   :  { %v1131_v1 = vrot.slane %v1130_v40, 1  ;;  %v1158_v38 = vrot.slane %v1150_v18, %v1157_v8 }
 0x1fe   :  { %v1132_v37 = vadd.f32 %v1131_v1, %v1130_v40  ;;  %v7761_v40 = vld [vmem:[#allocation54_spill] sm:$0xff] }
 0x200   :  { %v1136_v36 = vmul.f32 0.00390625, %v1132_v37 }
 0x202   :  { %v1140_v23 = vadd.f32 1e-05, %v1136_v36 }
 0x204   :  { %4679 = vrsqrt.f32 %v1140_v23 }
 0x20e   :  { %v4680_v9 = vpop.eup %4679 }
 0x20f   :  { %v1151_v21 = vcombine.low %v4678_v53, %v4680_v9  ;;  %v7766_v9 = vld [vmem:[#allocation11_spill] sm:$0xff] }
 0x211   :  { %v1165_v24 = vrot.slane %v1151_v21, %v1157_v8 }
 0x213   :  { %v1166_v39 = vcombine.low %v1158_v38, %v1165_v24 }
 0x215   :  { %v1173_v55 = vrot.slane %v1166_v39, %v1157_v8 }
 0x217   :  { %v1175_v54 = vmul.f32 %v1173_v55, %v1145_v4  ;;  %v7771_v4 = vld [vmem:[#allocation14_spill] sm:$0xff]  ;;  %v7772_v55 = vld [vmem:[#allocation72_spill] sm:$0xff] }
 0x219   :  { %v6168_v26 = vrot.slane %v1175_v54, %v7759_v56  ;;  %v6171_v7 = vrot.slane %v1175_v54, %v7760_v61  ;;  %v6174_v25 = vrot.slane %v1175_v54, %v7761_v40  ;;  %v6177_v1 = vrot.slane %v1175_v54, %v7763_v48  ;;  %v7799_v40 = vld [vmem:[#allocation29_spill] sm:$0xff] }
 0x21b   :  { %7762 = vst [vmem:[#allocation85_spill] sm:$0xff] %v6174_v25  ;;  %7764 = vst [vmem:[#allocation89_spill] sm:$0xff] %v6177_v1  ;;  %v1198_v37 = vmul.f32 %v6168_v26, %v7765_v51  ;;  %v1199_v36 = vmul.f32 %v6171_v7, %v5706_v33  ;;  %v1200_v23 = vmul.f32 %v6174_v25, %v5896_v10  ;;  %v7767_v33 = vld [vmem:[#allocation13_spill] sm:$0xff]  ;;  %v7768_v10 = vld [vmem:[#allocation75_spill] sm:$0xff] }
 0x21c   :  { %v1201_v11 = vmul.f32 %v6177_v1, %v5984_v44  ;;  %v1232_v21 = vmul.f32 %v6168_v26, %v7766_v9  ;;  %v1233_v38 = vmul.f32 %v6171_v7, %v7767_v33  ;;  %v6196_v24 = vmul.f32 %v6177_v1, %v7768_v10  ;;  %v7770_v44 = vld [vmem:[#allocation12_spill] sm:$0xff]  ;;  %v7774_v51 = vld [vmem:[#allocation15_spill] sm:$0xff]  ;;  %v7781_v33 = vld [vmem:[#allocation81_spill] sm:$0xff] }
 0x21d   :  { %v1206_v50 = vcombine.low %v1198_v37, %v1199_v36  ;;  %v1236_v39 = vmul.f32 %v6168_v26, %v7770_v44  ;;  %v6204_v54 = vmul.f32 %v6177_v1, %v7772_v55  ;;  %v6208_v37 = vmul.f32 %v6168_v26, %v7774_v51  ;;  %v7775_v36 = vld [vmem:[#allocation16_spill] sm:$0xff]  ;;  %v7783_v44 = vld [vmem:[#allocation19_spill] sm:$0xff] }
 0x21e   :  { %v1207_v29 = vcombine.low %v1200_v23, %v1201_v11  ;;  %7769 = vst [vmem:[#allocation91_spill] sm:$0xff] %v6196_v24  ;;  %v1241_v23 = vmul.f32 %v6171_v7, %v7775_v36  ;;  %v7776_v11 = vld [vmem:[#allocation76_spill] sm:$0xff]  ;;  %v6226_v10 = vmul.f32 %v6177_v1, %v7781_v33  ;;  %v7789_v33 = vld [vmem:[#allocation23_spill] sm:$0xff] }
 0x21f   :  { %v1214_v20 = vrot.slane %v1206_v50, %v1157_v8  ;;  %7773 = vst [vmem:[#allocation94_spill] sm:$0xff] %v6204_v54  ;;  %v6214_v50 = vmul.f32 %v6177_v1, %v7776_v11  ;;  %v7784_v55 = vld [vmem:[#allocation20_spill] sm:$0xff]  ;;  %v7787_v11 = vld [vmem:[#allocation22_spill] sm:$0xff] }
 0x220   :  { %v1221_v28 = vrot.slane %v1207_v29, %v1157_v8  ;;  %7782 = vst [vmem:[#allocation101_spill] sm:$0xff] %v6226_v10  ;;  %v6234_v51 = vmul.f32 %v6171_v7, %v7784_v55  ;;  %v7790_v55 = vld [vmem:[#allocation24_spill] sm:$0xff] }
 0x221   :  { %7777 = vst [vmem:[#allocation97_spill] sm:$0xff] %v6214_v50  ;;  %v7796_v25 = vld [vmem:[#allocation28_spill] sm:$0xff] }
 0x222   :  { %v1222_v53 = vcombine.low %v1214_v20, %v1221_v28  ;;  %v7779_v20 = vld [vmem:[#allocation17_spill] sm:$0xff] }
 0x223   :  { %v6220_v28 = vmul.f32 %v6168_v26, %v7779_v20  ;;  %v6246_v20 = vmul.f32 %v6171_v7, %v7787_v11  ;;  %v6266_v11 = vmul.f32 %v6168_v26, %v7792_v41  ;;  %v6286_v41 = vmul.f32 %v6171_v7, %v7796_v25  ;;  %v4597_v54 = vld [vmem:[#allocation2 + $0x1a0] ss:$12 sps:$4 sm:$0xff]  }
 0x224   :  { %v1229_v18 = vrot.slane %v1222_v53, %v1157_v8  ;;  %v1237_v8 = vmul.f32 %v6171_v7, %v7771_v4  ;;  %v7780_v53 = vld [vmem:[#allocation18_spill] sm:$0xff]  ;;  %v6230_v4 = vmul.f32 %v6168_v26, %v7783_v44  ;;  %v6254_v44 = vmul.f32 %v6168_v26, %v7789_v33 }
 0x225   :  { %v1245_v9 = vmul.f32 %v6171_v7, %v7780_v53  ;;  %v6250_v53 = vmul.f32 %v6177_v1, %v7729_v5  ;;  %v6270_v5 = vmul.f32 %v6171_v7, %v7793_v27  ;;  %v6274_v33 = vmul.f32 %v6177_v1, %v7733_v6 }
 0x226   :  { %v6216_v29 = vsub.f32 %v1176_v19, %v1229_v18  ;;  %v6238_v18 = vmul.f32 %v6177_v1, %v7727_v16  ;;  %v7786_v19 = vld [vmem:[#allocation21_spill] sm:$0xff]  ;;  %v6258_v16 = vmul.f32 %v6171_v7, %v7790_v55  ;;  %v6290_v27 = vmul.f32 %v6177_v1, %v7735_v0 }
 0x227   :  { %v6242_v36 = vmul.f32 %v6168_v26, %v7786_v19  ;;  %7788 = vst [vmem:[#allocation105_spill] sm:$0xff] %v6250_v53  ;;  %v6262_v19 = vmul.f32 %v6177_v1, %v7731_v63  ;;  %7794 = vst [vmem:[#allocation96_spill] sm:$0xff] %v6274_v33  ;;  %v6282_v63 = vmul.f32 %v6168_v26, %v7795_v17  ;;  %v7830_v33 = vld [vmem:[#allocation61_spill] sm:$0xff]  ;;  %v7836_v53 = vld [vmem:[#allocation70_spill] sm:$0xff] }
 0x228   :  { %7778 = vst [vmem:[#allocation99_spill] sm:$0xff] %v6216_v29  ;;  %7785 = vst [vmem:[#allocation103_spill] sm:$0xff] %v6238_v18  ;;  %v6278_v55 = vrot.slane %v6216_v29, %v7759_v56  ;;  %v6294_v6 = vrot.slane %v6216_v29, %v7760_v61  ;;  %v6298_v56 = vrot.slane %v6216_v29, %v7763_v48  ;;  %v7805_v29 = vld [vmem:[#allocation33_spill] sm:$0xff]  ;;  %v7838_v18 = vld [vmem:[#allocation74_spill] sm:$0xff] }
 0x229   :  { %7791 = vst [vmem:[#allocation107_spill] sm:$0xff] %v6262_v19  ;;  %7797 = vst [vmem:[#allocation8_spill] sm:$0xff] %v6290_v27  ;;  %v6302_v17 = vmul.f32 %v6168_v26, %v7799_v40  ;;  %v6306_v25 = vmul.f32 %v6171_v7, %v7800_v62  ;;  %v6310_v0 = vmul.f32 %v6177_v1, %v7737_v58  ;;  %v7829_v27 = vld [vmem:[#allocation59_spill] sm:$0xff]  ;;  %v4585_v19 = vld [vmem:[#allocation2 + $0x180] ss:$12 sps:$4 sm:$0xff]  }
 0x22a   :  { %7798 = vst [vmem:[#allocation60_spill] sm:$0xff] %v6298_v56  ;;  %v6314_v61 = vmul.f32 %v6168_v26, %v7802_v57  ;;  %v6318_v48 = vmul.f32 %v6171_v7, %v7803_v59  ;;  %v6322_v40 = vmul.f32 %v6177_v1, %v7739_v49  ;;  %v6326_v62 = vmul.f32 %v6168_v26, %v7805_v29 }
 0x22b   :  { %7801 = vst [vmem:[#allocation110_spill] sm:$0xff] %v6310_v0  ;;  %v6330_v58 = vmul.f32 %v6171_v7, %v7806_v3  ;;  %v6334_v57 = vmul.f32 %v6177_v1, %v7740_v46  ;;  %v6338_v59 = vmul.f32 %v6168_v26, %v7808_v32  ;;  %v6342_v49 = vmul.f32 %v6171_v7, %v7810_v52 }
 0x22c   :  { %7804 = vst [vmem:[#allocation11_spill] sm:$0xff] %v6322_v40  ;;  %v6346_v29 = vmul.f32 %v6177_v1, %v7741_v43  ;;  %v6350_v3 = vmul.f32 %v6168_v26, %v7812_v45  ;;  %v6354_v46 = vmul.f32 %v6171_v7, %v7814_v12  ;;  %v6358_v32 = vmul.f32 %v6177_v1, %v7742_v2 }
 0x22d   :  { %7807 = vst [vmem:[#allocation13_spill] sm:$0xff] %v6334_v57  ;;  %7809 = vst [vmem:[#allocation75_spill] sm:$0xff] %v6338_v59  ;;  %v6362_v52 = vmul.f32 %v6171_v7, %v7816_v30  ;;  %v6366_v43 = vmul.f32 %v6168_v26, %v7818_v34  ;;  %v6370_v45 = vmul.f32 %v6168_v26, %v7819_v42  ;;  %v7823_v34 = vld [vmem:[#allocation50_spill] sm:$0xff]  ;;  %v7824_v42 = vld [vmem:[#allocation51_spill] sm:$0xff] }
 0x22e   :  { %7811 = vst [vmem:[#allocation12_spill] sm:$0xff] %v6346_v29  ;;  %7813 = vst [vmem:[#allocation14_spill] sm:$0xff] %v6350_v3  ;;  %v6374_v12 = vmul.f32 %v6168_v26, %v7820_v60  ;;  %v6378_v2 = vmul.f32 %v6171_v7, %v7821_v35  ;;  %v6382_v30 = vmul.f32 %v6168_v26, %v7822_v13  ;;  %v4596_v3 = vld [vmem:[#allocation2 + $0x260] ss:$12 sps:$4 sm:$0xff]   ;;  %v7837_v59 = vld [vmem:[#allocation71_spill] sm:$0xff] }
 0x22f   :  { %7815 = vst [vmem:[#allocation72_spill] sm:$0xff] %v6358_v32  ;;  %7817 = vst [vmem:[#allocation15_spill] sm:$0xff] %v6362_v52  ;;  %v1381_v31 = vadd.f32 %v6278_v55, %v1232_v21  ;;  %v6387_v47 = vmul.f32 %v6171_v7, %v7823_v34  ;;  %v6391_v32 = vmul.f32 %v6168_v26, %v7824_v42  ;;  %v7825_v21 = vld [vmem:[#allocation52_spill] sm:$0xff]  ;;  %v7826_v34 = vld [vmem:[#allocation53_spill] sm:$0xff] }
 0x230   :  { %v1385_v60 = vadd.f32 %v6278_v55, %v1236_v39  ;;  %v1382_v22 = vadd.f32 %v6294_v6, %v1233_v38  ;;  %v1386_v1 = vadd.f32 %v6294_v6, %v1237_v8  ;;  %v1390_v13 = vadd.f32 %v6294_v6, %v1241_v23  ;;  %v7827_v39 = vld [vmem:[#allocation55_spill] sm:$0xff]  ;;  %v7828_v23 = vld [vmem:[#allocation56_spill] sm:$0xff] }
 0x231   :  { %v1509_v35 = vmax.f32 %v1381_v31, 0.0  ;;  %v1394_v14 = vadd.f32 %v6294_v6, %v1245_v9  ;;  %v6400_v29 = vmul.f32 %v6171_v7, %v7825_v21  ;;  %v6404_v57 = vmul.f32 %v6168_v26, %v7826_v34  ;;  %v4592_v52 = vld [vmem:[#allocation2 + $0x19c] ss:$12 sps:$4 sm:$0xff]  }
 0x232   :  { %v1513_v42 = vmax.f32 %v1385_v60, 0.0  ;;  %v1510_v40 = vmax.f32 %v1382_v22, 0.0  ;;  %v6408_v38 = vmul.f32 %v6171_v7, %v7827_v39  ;;  %v1514_v31 = vmax.f32 %v1386_v1, 0.0  ;;  %v7831_v39 = vld [vmem:[#allocation64_spill] sm:$0xff] }
 0x233   :  { %v1518_v8 = vmax.f32 %v1390_v13, 0.0  ;;  %v1522_v0 = vmax.f32 %v1394_v14, 0.0  ;;  %v6412_v9 = vmul.f32 %v6168_v26, %v7828_v23  ;;  %v6416_v21 = vmul.f32 %v6171_v7, %v7829_v27  ;;  %v7832_v23 = vld [vmem:[#allocation65_spill] sm:$0xff] }
 0x234   :  { %v6420_v34 = vmul.f32 %v6168_v26, %v7830_v33  ;;  %v1637_v22 = vpack.c.bf16 %v1513_v42, %v1509_v35  ;;  %v1638_v60 = vpack.c.bf16 %v1514_v31, %v1510_v40  ;;  %v1389_v1 = vadd.f32 %v6278_v55, %v6208_v37  ;;  %v7833_v35 = vld [vmem:[#allocation66_spill] sm:$0xff] }
 0x235   :  { %v1393_v14 = vadd.f32 %v6278_v55, %v6220_v28  ;;  %v1398_v13 = vadd.f32 %v6294_v6, %v6234_v51  ;;  %v6430_v27 = vmul.f32 %v6171_v7, %v7831_v39  ;;  %v6434_v33 = vmul.f32 %v6168_v26, %v7832_v23  ;;  %v4589_v42 = vld [vmem:[#allocation2 + $0x188] ss:$12 sps:$4 sm:$0xff]   ;;  %v7834_v28 = vld [vmem:[#allocation67_spill] sm:$0xff]  ;;  %v7835_v51 = vld [vmem:[#allocation68_spill] sm:$0xff] }
 0x236   :  { %v6438_v40 = vmul.f32 %v6171_v7, %v7833_v35  ;;  %v1402_v37 = vadd.f32 %v6294_v6, %v6246_v20  ;;  %v6444_v31 = vmul.f32 %v6168_v26, %v7834_v28  ;;  %v6448_v39 = vmul.f32 %v6171_v7, %v7835_v51  ;;  %2390 = vmatprep.mubr.bf16.mxu0 %v1638_v60  ;;  %v7840_v51 = vld [vmem:[#allocation77_spill] sm:$0xff] }
 0x237   :  { %2776 = vmatprep.mubr.bf16.mxu1 %v1638_v60  ;;  %v1642_v23 = vpack.c.bf16 %v1522_v0, %v1518_v8  ;;  %v6452_v35 = vmul.f32 %v6168_v26, %v7836_v53  ;;  %v6456_v20 = vmul.f32 %v6171_v7, %v7837_v59  ;;  %v6460_v28 = vmul.f32 %v6168_v26, %v7838_v18  ;;  %v4590_v53 = vld [vmem:[#allocation2 + $0x198] ss:$12 sps:$4 sm:$0xff]  }
 0x238   :  { %2391 = vmatmul.mubr.bf16.vlgmr.msra.gmra.mrb[48].mxu0 %v1637_v22  ;;  %2777 = vmatmul.mubr.bf16.vlgmr.msra.gmra.mrb[80].mxu1 %v1637_v22  ;;  %v6464_v60 = vmul.f32 %v6171_v7, %v7840_v51  ;;  %v1517_v0 = vmax.f32 %v1389_v1, 0.0  ;;  %v1521_v8 = vmax.f32 %v1393_v14, 0.0  ;;  %v1526_v10 = vmax.f32 %v1398_v13, 0.0  ;;  %v4595_v22 = vld [vmem:[#allocation2 + $0x1b4] ss:$12 sps:$4 sm:$0xff]  }
 0x239   :  { %7839 = vst [vmem:[#allocation16_spill] sm:$0xff] %v6460_v28  ;;  %2400 = vmatprep.mubr.bf16.mxu0 %v1642_v23  ;;  %2552 = vmatpush1.bf16.msra.mxu0 %v4585_v19  ;;  %v1530_v59 = vmax.f32 %v1402_v37, 0.0  ;;  %v1397_v50 = vadd.f32 %v6278_v55, %v6230_v4  ;;  %v1401_v18 = vadd.f32 %v6278_v55, %v6242_v36  ;;  %v4604_v4 = vld [vmem:[#allocation2 + $0x278] ss:$12 sps:$4 sm:$0xff]   ;;  %v7841_v13 = vld [vmem:[#allocation78_spill] sm:$0xff] }
 0x23a   :  { %2784 = vmatprep.mubr.bf16.mxu1 %v1642_v23  ;;  %4082 = vmatpush3.bf16.msra.mxu1 %v4589_v42  ;;  %v1406_v51 = vadd.f32 %v6294_v6, %v6258_v16  ;;  %v1410_v19 = vadd.f32 %v6294_v6, %v6270_v5  ;;  %v1405_v1 = vadd.f32 %v6278_v55, %v6254_v44  ;;  %v7843_v42 = vld [vmem:[#allocation83_spill] sm:$0xff] }
 0x23b   :  { %2553 = vmatprep.subr.bf16.mxu0 %v4592_v52  ;;  %4083 = vmatprep.subr.bf16.mxu1 %v4596_v3  ;;  %v1409_v14 = vadd.f32 %v6278_v55, %v6266_v11  ;;  %v6480_v36 = vmul.f32 %v6168_v26, %v7841_v13  ;;  %v6484_v16 = vmul.f32 %v6171_v7, %v7843_v42  ;;  %v7845_v3 = vld [vmem:[#allocation80_spill] sm:$0xff]  ;;  %v7847_v11 = vld [vmem:[#allocation87_spill] sm:$0xff]  ;;  %v1525_v24 = vmax.f32 %v1397_v50, 0.0 }
 0x23c   :  { %v1414_v52 = vadd.f32 %v6294_v6, %v6286_v41  ;;  %v1418_v5 = vadd.f32 %v6294_v6, %v6306_v25  ;;  %v6492_v44 = vmul.f32 %v6168_v26, %v7845_v3  ;;  %v6496_v37 = vmul.f32 %v6171_v7, %v7847_v11  ;;  %v4593_v23 = vld [vmem:[#allocation2 + $0x1b0] ss:$12 sps:$4 sm:$0xff]   ;;  %v4600_v3 = vld [vmem:[#allocation2 + $0x1cc] ss:$12 sps:$4 sm:$0xff]  }
 0x23d   :  { %7842 = vst [vmem:[#allocation76_spill] sm:$0xff] %v6480_v36  ;;  %7844 = vst [vmem:[#allocation17_spill] sm:$0xff] %v6484_v16  ;;  %2554 = vmatpush1.bf16.msra.mxu0 %v4590_v53  ;;  %v1413_v13 = vadd.f32 %v6278_v55, %v6282_v63  ;;  %v1417_v42 = vadd.f32 %v6278_v55, %v6302_v17  ;;  %v1641_v41 = vpack.c.bf16 %v1521_v8, %v1517_v0  ;;  %v4612_v53 = vld [vmem:[#allocation2 + $0x290] ss:$12 sps:$4 sm:$0xff]   ;;  %v7850_v0 = vld [vmem:[#allocation92_spill] sm:$0xff] }
 0x23e   :  { %7846 = vst [vmem:[#allocation18_spill] sm:$0xff] %v6492_v44  ;;  %7848 = vst [vmem:[#allocation81_spill] sm:$0xff] %v6496_v37  ;;  %v1646_v56 = vpack.c.bf16 %v1530_v59, %v1526_v10  ;;  %v1529_v25 = vmax.f32 %v1401_v18, 0.0  ;;  %2555 = vmatprep.subr.bf16.mxu0 %v4595_v22  ;;  %4084 = vmatpush3.bf16.msra.mxu1 %v4597_v54  ;;  %v4605_v44 = vld [vmem:[#allocation2 + $0x1b8] ss:$12 sps:$4 sm:$0xff]   ;;  %v1534_v36 = vmax.f32 %v1406_v51, 0.0 }
 0x23f   :  { %v1538_v16 = vmax.f32 %v1410_v19, 0.0  ;;  %v1533_v11 = vmax.f32 %v1405_v1, 0.0  ;;  %v1537_v37 = vmax.f32 %v1409_v14, 0.0  ;;  %4085 = vmatprep.subr.bf16.mxu1 %v4604_v4  ;;  %v1542_v63 = vmax.f32 %v1414_v52, 0.0  ;;  %v7849_v10 = vld [vmem:[#allocation84_spill] sm:$0xff] }
 0x240   :  { %2401 = vmatmul.mubr.bf16.gmra.mrb[52].mxu0 %v1641_v41  ;;  %2785 = vmatmul.mubr.bf16.gmra.mrb[84].mxu1 %v1641_v41  ;;  %v1546_v28 = vmax.f32 %v1418_v5, 0.0  ;;  %v1422_v17 = vadd.f32 %v6294_v6, %v6318_v48  ;;  %v1426_v50 = vadd.f32 %v6294_v6, %v6330_v58  ;;  %v6508_v54 = vmul.f32 %v6168_v26, %v7849_v10  ;;  %v7851_v22 = vld [vmem:[#allocation88_spill] sm:$0xff]  ;;  %v4598_v58 = vld [vmem:[#allocation2 + $0x1c8] ss:$12 sps:$4 sm:$0xff]   ;;  %v4613_v1 = vld [vmem:[#allocation2 + $0x1d0] ss:$12 sps:$4 sm:$0xff]  }
 0x241   :  { %v6512_v8 = vmul.f32 %v6171_v7, %v7850_v0  ;;  %2410 = vmatprep.mubr.bf16.mxu0 %v1646_v56  ;;  %2792 = vmatprep.mubr.bf16.mxu1 %v1646_v56  ;;  %v1541_v59 = vmax.f32 %v1413_v13, 0.0  ;;  %v1545_v18 = vmax.f32 %v1417_v42, 0.0  ;;  %v6516_v51 = vmul.f32 %v6168_v26, %v7851_v22  ;;  %v4603_v4 = vld [vmem:[#allocation2 + $0x1e4] ss:$12 sps:$4 sm:$0xff]   ;;  %v4620_v5 = vld [vmem:[#allocation2 + $0x2a8] ss:$12 sps:$4 sm:$0xff]  }
 0x242   :  { %v6520_v48 = vmul.f32 %v6171_v7, %v7749_v15  ;;  %2556 = vmatpush1.bf16.msra.mxu0 %v4593_v23  ;;  %4086 = vmatpush3.bf16.msra.mxu1 %v4605_v44  ;;  %v6524_v19 = vadd.f32 %v6278_v55, %v6314_v61  ;;  %v1645_v14 = vpack.c.bf16 %v1529_v25, %v1525_v24  ;;  %v1550_v44 = vmax.f32 %v1422_v17, 0.0  ;;  %v4601_v61 = vld [vmem:[#allocation2 + $0x1e0] ss:$12 sps:$4 sm:$0xff]   ;;  %v4621_v25 = vld [vmem:[#allocation2 + $0x1e8] ss:$12 sps:$4 sm:$0xff]  }
 0x243   :  { %v1650_v56 = vpack.c.bf16 %v1538_v16, %v1534_v36  ;;  %2557 = vmatprep.subr.bf16.mxu0 %v4600_v3  ;;  %v6528_v52 = vadd.f32 %v6278_v55, %v6326_v62  ;;  %4087 = vmatprep.subr.bf16.mxu1 %v4612_v53  ;;  %v6530_v15 = vpack.c.bf16 %v1537_v37, %v1533_v11  ;;  %v1554_v13 = vmax.f32 %v1426_v50, 0.0  ;;  %v4628_v53 = vld [vmem:[#allocation2 + $0x2c0] ss:$12 sps:$4 sm:$0xff]   ;;  %v4606_v0 = vld [vmem:[#allocation2 + $0x1f8] ss:$12 sps:$4 sm:$0xff]  }
 0x244   :  { %v6532_v23 = vpack.c.bf16 %v1546_v28, %v1542_v63  ;;  %v6534_v42 = vpack.c.bf16 %v1545_v18, %v1541_v59  ;;  %v6538_v24 = vadd.f32 %v6294_v6, %v6342_v49  ;;  %v1445_v36 = vadd.f32 %v6278_v55, %v6366_v43  ;;  %v4608_v28 = vld [vmem:[#allocation2 + $0x1fc] ss:$12 sps:$4 sm:$0xff]  }
 0x245   :  { %v1449_v62 = vadd.f32 %v6278_v55, %v6370_v45  ;;  %v1549_v16 = vmax.f32 %v6524_v19, 0.0  ;;  %v6547_v37 = vadd.f32 %v6294_v6, %v6354_v46  ;;  %v1454_v41 = vadd.f32 %v6294_v6, %v6378_v2 }
 0x246   :  { %2558 = vmatpush1.bf16.msra.mxu0 %v4598_v58  ;;  %4088 = vmatpush3.bf16.msra.mxu1 %v4613_v1  ;;  %v1458_v49 = vadd.f32 %v6294_v6, %v6387_v47  ;;  %v1553_v43 = vmax.f32 %v6528_v52, 0.0  ;;  %v1573_v45 = vmax.f32 %v1445_v36, 0.0  ;;  %v1453_v11 = vadd.f32 %v6278_v55, %v6374_v12  ;;  %v4629_v58 = vld [vmem:[#allocation2 + $0x200] ss:$12 sps:$4 sm:$0xff]  }
 0x247   :  { %2559 = vmatprep.subr.bf16.mxu0 %v4603_v4  ;;  %v1577_v3 = vmax.f32 %v1449_v62, 0.0  ;;  %4089 = vmatprep.subr.bf16.mxu1 %v4620_v5  ;;  %v6556_v46 = vpack.c.bf16 %v1554_v13, %v1550_v44  ;;  %v1582_v63 = vmax.f32 %v1454_v41, 0.0  ;;  %v1457_v47 = vadd.f32 %v6278_v55, %v6382_v30  ;;  %v4611_v1 = vld [vmem:[#allocation2 + $0x214] ss:$12 sps:$4 sm:$0xff]   ;;  %v4636_v4 = vld [vmem:[#allocation2 + $0x2d8] ss:$12 sps:$4 sm:$0xff]  }
 0x248   :  { %2411 = vmatmul.mubr.bf16.gmra.mrb[56].mxu0 %v1645_v14  ;;  %2793 = vmatmul.mubr.bf16.gmra.mrb[88].mxu1 %v1645_v14  ;;  %v1586_v2 = vmax.f32 %v1458_v49, 0.0  ;;  %v1581_v50 = vmax.f32 %v1453_v11, 0.0  ;;  %v1462_v10 = vadd.f32 %v6294_v6, %v6400_v29  ;;  %v1466_v12 = vadd.f32 %v6294_v6, %v6408_v38  ;;  %v4632_v52 = vld [vmem:[#allocation2 + $0x28c] ss:$12 sps:$4 sm:$0xff]  }
 0x249   :  { %2420 = vmatprep.mubr.bf16.mxu0 %v1650_v56  ;;  %2800 = vmatprep.mubr.bf16.mxu1 %v1650_v56  ;;  %v6560_v17 = vpack.c.bf16 %v1577_v3, %v1573_v45  ;;  %v1585_v18 = vmax.f32 %v1457_v47, 0.0  ;;  %v1461_v30 = vadd.f32 %v6278_v55, %v6391_v32  ;;  %v1465_v22 = vadd.f32 %v6278_v55, %v6404_v57 }
 0x24a   :  { %2560 = vmatpush1.bf16.msra.mxu0 %v4601_v61  ;;  %v6566_v59 = vpack.c.bf16 %v1586_v2, %v1582_v63  ;;  %4090 = vmatpush3.bf16.msra.mxu1 %v4621_v25  ;;  %v1590_v14 = vmax.f32 %v1462_v10, 0.0  ;;  %v1594_v29 = vmax.f32 %v1466_v12, 0.0  ;;  %v1470_v38 = vadd.f32 %v6294_v6, %v6416_v21  ;;  %v4609_v21 = vld [vmem:[#allocation2 + $0x210] ss:$12 sps:$4 sm:$0xff]   ;;  %v4616_v25 = vld [vmem:[#allocation2 + $0x22c] ss:$12 sps:$4 sm:$0xff]  }
 0x24b   :  { %2561 = vmatprep.subr.bf16.mxu0 %v4608_v28  ;;  %v1474_v56 = vadd.f32 %v6294_v6, %v6430_v27  ;;  %4091 = vmatprep.subr.bf16.mxu1 %v4628_v53  ;;  %v6576_v5 = vpack.c.bf16 %v1585_v18, %v1581_v50  ;;  %v1589_v44 = vmax.f32 %v1461_v30, 0.0  ;;  %v1593_v32 = vmax.f32 %v1465_v22, 0.0  ;;  %v4644_v53 = vld [vmem:[#allocation2 + $0x2f0] ss:$12 sps:$4 sm:$0xff]  }
 0x24c   :  { %v1469_v57 = vadd.f32 %v6278_v55, %v6412_v9  ;;  %v6580_v13 = vpack.c.bf16 %v1594_v29, %v1590_v14  ;;  %v1598_v61 = vmax.f32 %v1470_v38, 0.0  ;;  %v1473_v62 = vadd.f32 %v6278_v55, %v6420_v34  ;;  %v4637_v9 = vld [vmem:[#allocation2 + $0x218] ss:$12 sps:$4 sm:$0xff]   ;;  %v4645_v18 = vld [vmem:[#allocation2 + $0x230] ss:$12 sps:$4 sm:$0xff]  }
 0x24d   :  { %v1602_v36 = vmax.f32 %v1474_v56, 0.0  ;;  %v6584_v28 = vpack.c.bf16 %v1593_v32, %v1589_v44  ;;  %v1478_v41 = vadd.f32 %v6294_v6, %v6438_v40  ;;  %v1482_v49 = vadd.f32 %v6294_v6, %v6448_v39  ;;  %v7855_v56 = vld [vmem:[#allocation76_spill] sm:$0xff]  ;;  %v7856_v44 = vld [vmem:[#allocation18_spill] sm:$0xff] }
 0x24e   :  { %2562 = vmatpush1.bf16.msra.mxu0 %v4606_v0  ;;  %4092 = vmatpush3.bf16.msra.mxu1 %v4629_v58  ;;  %v1597_v27 = vmax.f32 %v1469_v57, 0.0  ;;  %v1601_v3 = vmax.f32 %v1473_v62, 0.0  ;;  %v1477_v34 = vadd.f32 %v6278_v55, %v6434_v33  ;;  %v1481_v11 = vadd.f32 %v6278_v55, %v6444_v31  ;;  %v7852_v0 = vld [vmem:[#allocation16_spill] sm:$0xff]  ;;  %v7853_v58 = vld [vmem:[#allocation17_spill] sm:$0xff] }
 0x24f   :  { %2563 = vmatprep.subr.bf16.mxu0 %v4611_v1  ;;  %v6590_v45 = vpack.c.bf16 %v1602_v36, %v1598_v61  ;;  %4093 = vmatprep.subr.bf16.mxu1 %v4636_v4  ;;  %v1606_v40 = vmax.f32 %v1478_v41, 0.0  ;;  %v1610_v39 = vmax.f32 %v1482_v49, 0.0  ;;  %v1486_v63 = vadd.f32 %v6294_v6, %v6456_v20 }
 0x250   :  { %2421 = vmatmul.mubr.bf16.gmra.mrb[60].mxu0 %v6530_v15  ;;  %2801 = vmatmul.mubr.bf16.gmra.mrb[92].mxu1 %v6530_v15  ;;  %v1490_v2 = vadd.f32 %v6294_v6, %v6464_v60  ;;  %v6604_v33 = vpack.c.bf16 %v1601_v3, %v1597_v27  ;;  %v1605_v31 = vmax.f32 %v1477_v34, 0.0  ;;  %v1609_v47 = vmax.f32 %v1481_v11, 0.0  ;;  %v4614_v15 = vld [vmem:[#allocation2 + $0x228] ss:$12 sps:$4 sm:$0xff]  }
 0x251   :  { %2430 = vmatprep.mubr.bf16.mxu0 %v6532_v23  ;;  %2808 = vmatprep.mubr.bf16.mxu1 %v6532_v23  ;;  %v1485_v50 = vadd.f32 %v6278_v55, %v6452_v35  ;;  %v6608_v10 = vpack.c.bf16 %v1610_v39, %v1606_v40  ;;  %v1614_v12 = vmax.f32 %v1486_v63, 0.0  ;;  %v1489_v60 = vadd.f32 %v6278_v55, %v7852_v0  ;;  %v4619_v23 = vld [vmem:[#allocation2 + $0x244] ss:$12 sps:$4 sm:$0xff]   ;;  %v7854_v35 = vld [vmem:[#allocation81_spill] sm:$0xff]  ;;  %v7857_v40 = vld [vmem:[#allocation91_spill] sm:$0xff] }
 0x252   :  { %2564 = vmatpush1.bf16.msra.mxu0 %v4609_v21  ;;  %v1618_v20 = vmax.f32 %v1490_v2, 0.0  ;;  %4094 = vmatpush3.bf16.msra.mxu1 %v4637_v9  ;;  %v6612_v30 = vpack.c.bf16 %v1609_v47, %v1605_v31  ;;  %v1494_v1 = vadd.f32 %v6294_v6, %v7853_v58  ;;  %v1498_v14 = vadd.f32 %v6294_v6, %v7854_v35  ;;  %v4617_v21 = vld [vmem:[#allocation2 + $0x240] ss:$12 sps:$4 sm:$0xff]   ;;  %v4622_v0 = vld [vmem:[#allocation2 + $0x258] ss:$12 sps:$4 sm:$0xff]  }
 0x253   :  { %2565 = vmatprep.subr.bf16.mxu0 %v4616_v25  ;;  %v1613_v22 = vmax.f32 %v1485_v50, 0.0  ;;  %4095 = vmatprep.subr.bf16.mxu1 %v4644_v53  ;;  %v1617_v38 = vmax.f32 %v1489_v60, 0.0  ;;  %v1493_v4 = vadd.f32 %v6278_v55, %v7855_v56  ;;  %v1497_v32 = vadd.f32 %v6278_v55, %v7856_v44  ;;  %v4624_v25 = vld [vmem:[#allocation2 + $0x25c] ss:$12 sps:$4 sm:$0xff]   ;;  %v7858_v39 = vld [vmem:[#allocation60_spill] sm:$0xff] }
 0x254   :  { %v6618_v29 = vpack.c.bf16 %v1618_v20, %v1614_v12  ;;  %v1622_v57 = vmax.f32 %v1494_v1, 0.0  ;;  %v1626_v61 = vmax.f32 %v1498_v14, 0.0  ;;  %v1502_v36 = vadd.f32 %v6294_v6, %v6512_v8  ;;  %v7860_v47 = vld [vmem:[#allocation97_spill] sm:$0xff]  ;;  %v7862_v1 = vld [vmem:[#allocation103_spill] sm:$0xff]  ;;  %v7863_v14 = vld [vmem:[#allocation42_spill] sm:$0xff] }
 0x255   :  { %v1506_v62 = vadd.f32 %v6294_v6, %v6520_v48  ;;  %v6628_v27 = vpack.c.bf16 %v1617_v38, %v1613_v22  ;;  %v1621_v41 = vmax.f32 %v1493_v4, 0.0  ;;  %v1625_v49 = vmax.f32 %v1497_v32, 0.0  ;;  %v7864_v56 = vld [vmem:[#allocation75_spill] sm:$0xff]  ;;  %v7865_v4 = vld [vmem:[#allocation105_spill] sm:$0xff]  ;;  %v7866_v32 = vld [vmem:[#allocation14_spill] sm:$0xff] }
 0x256   :  { %2566 = vmatpush1.bf16.msra.mxu0 %v4614_v15  ;;  %4096 = vmatpush3.bf16.msra.mxu1 %v4645_v18  ;;  %v1501_v9 = vadd.f32 %v6278_v55, %v6508_v54  ;;  %v6632_v3 = vpack.c.bf16 %v1626_v61, %v1622_v57  ;;  %v1630_v34 = vmax.f32 %v1502_v36, 0.0  ;;  %v1505_v8 = vadd.f32 %v6278_v55, %v6516_v51  ;;  %v7859_v54 = vld [vmem:[#allocation94_spill] sm:$0xff]  ;;  %v7867_v61 = vld [vmem:[#allocation15_spill] sm:$0xff] }
 0x257   :  { %2567 = vmatprep.subr.bf16.mxu0 %v4619_v23  ;;  %v1634_v11 = vmax.f32 %v1506_v62, 0.0  ;;  %v6638_v48 = vpack.c.bf16 %v1625_v49, %v1621_v41  ;;  %v1384_v63 = vadd.f32 %v7858_v39, %v7857_v40  ;;  %v1388_v2 = vadd.f32 %v7858_v39, %v7859_v54  ;;  %v4627_v23 = vld [vmem:[#allocation2 + $0x274] ss:$12 sps:$4 sm:$0xff]   ;;  %v4625_v49 = vld [vmem:[#allocation2 + $0x270] ss:$12 sps:$4 sm:$0xff]  }
 0x258   :  { %2431 = vmatmul.mubr.bf16.gmra.mrb[64].mxu0 %v6534_v42  ;;  %2809 = vmatmul.mubr.bf16.gmra.mrb[96].mxu1 %v6534_v42  ;;  %v1629_v53 = vmax.f32 %v1501_v9, 0.0  ;;  %v1633_v51 = vmax.f32 %v1505_v8, 0.0  ;;  %v1392_v50 = vadd.f32 %v7858_v39, %v7860_v47  ;;  %v7861_v42 = vld [vmem:[#allocation101_spill] sm:$0xff]  ;;  %v1558_v12 = vmax.f32 %v6538_v24, 0.0  ;;  %v7872_v47 = vld [vmem:[#allocation8_spill] sm:$0xff] }
 0x259   :  { %2440 = vmatprep.mubr.bf16.mxu0 %v6556_v46  ;;  %2816 = vmatprep.mubr.bf16.mxu1 %v6556_v46  ;;  %v6646_v31 = vpack.c.bf16 %v1634_v11, %v1630_v34  ;;  %v1396_v15 = vadd.f32 %v7858_v39, %v7861_v42  ;;  %v1562_v20 = vmax.f32 %v6547_v37, 0.0  ;;  %v1512_v60 = vmax.f32 %v1384_v63, 0.0  ;;  %v7869_v11 = vld [vmem:[#allocation96_spill] sm:$0xff]  ;;  %v7871_v63 = vld [vmem:[#allocation41_spill] sm:$0xff] }
 0x25a   :  { %2568 = vmatpush1.bf16.msra.mxu0 %v4617_v21  ;;  %v1516_v18 = vmax.f32 %v1388_v2, 0.0  ;;  %v6654_v46 = vpack.c.bf16 %v1633_v51, %v1629_v53  ;;  %v1520_v22 = vmax.f32 %v1392_v50, 0.0  ;;  %v1400_v35 = vadd.f32 %v7858_v39, %v7862_v1  ;;  %v7870_v53 = vld [vmem:[#allocation39_spill] sm:$0xff]  ;;  %v7873_v42 = vld [vmem:[#allocation44_spill] sm:$0xff] }
 0x25b   :  { %2569 = vmatprep.subr.bf16.mxu0 %v4624_v25  ;;  %v1524_v58 = vmax.f32 %v1396_v15, 0.0  ;;  %v1293_v38 = vmul.f32 %v6171_v7, %v7863_v14  ;;  %v1429_v24 = vadd.f32 %v6278_v55, %v7864_v56  ;;  %v1404_v44 = vadd.f32 %v7858_v39, %v7865_v4  ;;  %v7868_v25 = vld [vmem:[#allocation107_spill] sm:$0xff]  ;;  %v4635_v14 = vld [vmem:[#allocation2 + $0x2a4] ss:$12 sps:$4 sm:$0xff]   ;;  %v7877_v4 = vld [vmem:[#allocation13_spill] sm:$0xff] }
 0x25c   :  { %v6662_v37 = vpack.c.bf16 %v1516_v18, %v1512_v60  ;;  %v1433_v57 = vadd.f32 %v6278_v55, %v7866_v32  ;;  %v1438_v36 = vadd.f32 %v6294_v6, %v7867_v61  ;;  %v1528_v21 = vmax.f32 %v1400_v35, 0.0  ;;  %v7876_v56 = vld [vmem:[#allocation11_spill] sm:$0xff] }
 0x25d   :  { %v6670_v62 = vpack.c.bf16 %v1524_v58, %v1520_v22  ;;  %v1657_v41 = vpack.c.bf16 %v1553_v43, %v1549_v16  ;;  %v1532_v9 = vmax.f32 %v1404_v44, 0.0  ;;  %v1408_v34 = vadd.f32 %v7858_v39, %v7868_v25  ;;  %v4630_v22 = vld [vmem:[#allocation2 + $0x288] ss:$12 sps:$4 sm:$0xff]  }
 0x25e   :  { %2570 = vmatpush1.bf16.msra.mxu0 %v4622_v0  ;;  %v1412_v8 = vadd.f32 %v7858_v39, %v7869_v11  ;;  %v1288_v40 = vmul.f32 %v6168_v26, %v7870_v53  ;;  %v1292_v54 = vmul.f32 %v6168_v26, %v7871_v63  ;;  %v1662_v2 = vpack.c.bf16 %v1562_v20, %v1558_v12  ;;  %v7874_v0 = vld [vmem:[#allocation46_spill] sm:$0xff]  ;;  %v7879_v25 = vld [vmem:[#allocation57_spill] sm:$0xff]  ;;  %v7882_v63 = vld [vmem:[#allocation72_spill] sm:$0xff] }
 0x25f   :  { %v1442_v19 = vadd.f32 %v6294_v6, %v1293_v38  ;;  %2571 = vmatprep.subr.bf16.mxu0 %v4627_v23  ;;  %v6685_v16 = vpack.c.bf16 %v1532_v9, %v1528_v21  ;;  %v1536_v43 = vmax.f32 %v1408_v34, 0.0  ;;  %v1416_v50 = vadd.f32 %v7858_v39, %v7872_v47  ;;  %v7875_v20 = vld [vmem:[#allocation110_spill] sm:$0xff]  ;;  %v7880_v34 = vld [vmem:[#allocation89_spill] sm:$0xff]  ;;  %v7884_v47 = vld [vmem:[#allocation115_spill] sm:$0xff] }
 0x260   :  { %2441 = vmatmul.mubr.bf16.gmra.mrb[68].mxu0 %v1657_v41  ;;  %2817 = vmatmul.mubr.bf16.gmra.mrb[100].mxu1 %v1657_v41  ;;  %v1540_v51 = vmax.f32 %v1412_v8, 0.0  ;;  %v1297_v15 = vmul.f32 %v6171_v7, %v7873_v42  ;;  %v1301_v26 = vmul.f32 %v6171_v7, %v7874_v0  ;;  %v1557_v12 = vmax.f32 %v1429_v24, 0.0  ;;  %v7881_v8 = vld [vmem:[#allocation111_spill] sm:$0xff] }
 0x261   :  { %2450 = vmatprep.mubr.bf16.mxu0 %v1662_v2  ;;  %2824 = vmatprep.mubr.bf16.mxu1 %v1662_v2  ;;  %v1420_v60 = vadd.f32 %v7858_v39, %v7875_v20  ;;  %v1561_v18 = vmax.f32 %v1433_v57, 0.0  ;;  %v1566_v23 = vmax.f32 %v1438_v36, 0.0  ;;  %v1544_v1 = vmax.f32 %v1416_v50, 0.0 }
 0x262   :  { %2572 = vmatpush1.bf16.msra.mxu0 %v4625_v49  ;;  %v6695_v58 = vpack.c.bf16 %v1540_v51, %v1536_v43  ;;  %v1570_v35 = vmax.f32 %v1442_v19, 0.0  ;;  %v1424_v7 = vadd.f32 %v7858_v39, %v7876_v56  ;;  %v1428_v24 = vadd.f32 %v7858_v39, %v7877_v4  ;;  %v7878_v49 = vld [vmem:[#allocation12_spill] sm:$0xff]  ;;  %v7886_v56 = vld [vmem:[#allocation119_spill] sm:$0xff] }
 0x263   :  { %2573 = vmatprep.subr.bf16.mxu0 %v4632_v52  ;;  %v1548_v38 = vmax.f32 %v1420_v60, 0.0  ;;  %v1437_v44 = vadd.f32 %v6278_v55, %v1288_v40  ;;  %v1441_v32 = vadd.f32 %v6278_v55, %v1292_v54  ;;  %v1446_v57 = vadd.f32 %v6294_v6, %v1297_v15  ;;  %v4633_v55 = vld [vmem:[#allocation2 + $0x2a0] ss:$12 sps:$4 sm:$0xff]   ;;  %v4640_v52 = vld [vmem:[#allocation2 + $0x2bc] ss:$12 sps:$4 sm:$0xff]  }
 0x264   :  { %v1450_v61 = vadd.f32 %v6294_v6, %v1301_v26  ;;  %v1552_v21 = vmax.f32 %v1424_v7, 0.0  ;;  %v1556_v41 = vmax.f32 %v1428_v24, 0.0  ;;  %v1432_v9 = vadd.f32 %v7858_v39, %v7878_v49  ;;  %v7883_v6 = vld [vmem:[#allocation113_spill] sm:$0xff]  ;;  %v4643_v4 = vld [vmem:[#allocation2 + $0x2d4] ss:$12 sps:$4 sm:$0xff]  }
 0x265   :  { %v6705_v36 = vpack.c.bf16 %v1548_v38, %v1544_v1  ;;  %v1291_v11 = vmul.f32 %v7880_v34, %v7879_v25  ;;  %v1295_v53 = vmul.f32 %v7880_v34, %v7881_v8  ;;  %v1661_v40 = vpack.c.bf16 %v1561_v18, %v1557_v12  ;;  %v4638_v18 = vld [vmem:[#allocation2 + $0x2b8] ss:$12 sps:$4 sm:$0xff]  }
 0x266   :  { %2574 = vmatpush1.bf16.msra.mxu0 %v4630_v22  ;;  %v1436_v54 = vadd.f32 %v7858_v39, %v7882_v63  ;;  %v1299_v2 = vmul.f32 %v7880_v34, %v7883_v6  ;;  %v1666_v19 = vpack.c.bf16 %v1570_v35, %v1566_v23  ;;  %v6717_v43 = vpack.c.bf16 %v1556_v41, %v1552_v21 }
 0x267   :  { %2575 = vmatprep.subr.bf16.mxu0 %v4635_v14  ;;  %v1560_v51 = vmax.f32 %v1432_v9, 0.0  ;;  %v1303_v50 = vmul.f32 %v7880_v34, %v7884_v47  ;;  %v1440_v15 = vadd.f32 %v7858_v39, %v1291_v11  ;;  %v1444_v0 = vadd.f32 %v7858_v39, %v1295_v53  ;;  %v7885_v14 = vld [vmem:[#allocation117_spill] sm:$0xff]  ;;  %v7888_v9 = vld [vmem:[#allocation123_spill] sm:$0xff] }
 0x268   :  { %2451 = vmatmul.mubr.bf16.gmra.mrb[72].mxu0 %v1661_v40  ;;  %2825 = vmatmul.mubr.bf16.gmra.mrb[104].mxu1 %v1661_v40  ;;  %v1564_v42 = vmax.f32 %v1436_v54, 0.0  ;;  %v1565_v26 = vmax.f32 %v1437_v44, 0.0  ;;  %v1569_v12 = vmax.f32 %v1441_v32, 0.0  ;;  %v1574_v20 = vmax.f32 %v1446_v57, 0.0  ;;  %v7887_v57 = vld [vmem:[#allocation121_spill] sm:$0xff] }
 0x269   :  { %2460 = vmatprep.mubr.bf16.mxu0 %v1666_v19  ;;  %2832 = vmatprep.mubr.bf16.mxu1 %v1666_v19  ;;  %v1578_v60 = vmax.f32 %v1450_v61, 0.0  ;;  %v1568_v22 = vmax.f32 %v1440_v15, 0.0  ;;  %v1572_v1 = vmax.f32 %v1444_v0, 0.0  ;;  %v1448_v35 = vadd.f32 %v7858_v39, %v1299_v2  ;;  %v4641_v53 = vld [vmem:[#allocation2 + $0x2d0] ss:$12 sps:$4 sm:$0xff]   ;;  %v7891_v15 = vld [vmem:[#allocation132_spill] sm:$0xff] }
 0x26a   :  { %2576 = vmatpush1.bf16.msra.mxu0 %v4633_v55  ;;  %v6723_v23 = vpack.c.bf16 %v1564_v42, %v1560_v51  ;;  %v1307_v38 = vmul.f32 %v7880_v34, %v7885_v14  ;;  %v1311_v7 = vmul.f32 %v7880_v34, %v7886_v56  ;;  %v1452_v24 = vadd.f32 %v7858_v39, %v1303_v50  ;;  %v4648_v40 = vld [vmem:[#allocation2 + $0x2ec] ss:$12 sps:$4 sm:$0xff]   ;;  %v7893_v56 = vld [vmem:[#allocation136_spill] sm:$0xff] }
 0x26b   :  { %2577 = vmatprep.subr.bf16.mxu0 %v4640_v52  ;;  %v6731_v44 = vpack.c.bf16 %v1572_v1, %v1568_v22  ;;  %v1576_v32 = vmax.f32 %v1448_v35, 0.0  ;;  %v1315_v61 = vmul.f32 %v7880_v34, %v7887_v57  ;;  %v1319_v25 = vmul.f32 %v7880_v34, %v7888_v9  ;;  %v7889_v2 = vld [vmem:[#allocation127_spill] sm:$0xff]  ;;  %v7890_v52 = vld [vmem:[#allocation130_spill] sm:$0xff] }
 0x26c   :  { %v1580_v21 = vmax.f32 %v1452_v24, 0.0  ;;  %v1456_v41 = vadd.f32 %v7858_v39, %v1307_v38  ;;  %v1460_v49 = vadd.f32 %v7858_v39, %v1311_v7  ;;  %v1665_v11 = vpack.c.bf16 %v1569_v12, %v1565_v26  ;;  %v4646_v26 = vld [vmem:[#allocation2 + $0x2e8] ss:$12 sps:$4 sm:$0xff]  }
 0x26d   :  { %v1670_v8 = vpack.c.bf16 %v1578_v60, %v1574_v20  ;;  %v1464_v6 = vadd.f32 %v7858_v39, %v1315_v61  ;;  %v1323_v19 = vmul.f32 %v7880_v34, %v7889_v2  ;;  %v1327_v51 = vmul.f32 %v7880_v34, %v7890_v52 }
 0x26e   :  { %2578 = vmatpush1.bf16.msra.mxu0 %v4638_v18  ;;  %v6739_v55 = vpack.c.bf16 %v1580_v21, %v1576_v32  ;;  %v1584_v63 = vmax.f32 %v1456_v41, 0.0  ;;  %v1588_v54 = vmax.f32 %v1460_v49, 0.0  ;;  %v1468_v47 = vadd.f32 %v7858_v39, %v1319_v25  ;;  %v7892_v18 = vld [vmem:[#allocation135_spill] sm:$0xff]  ;;  %v7895_v21 = vld [vmem:[#allocation138_spill] sm:$0xff] }
 0x26f   :  { %2579 = vmatprep.subr.bf16.mxu0 %v4643_v4  ;;  %v1592_v42 = vmax.f32 %v1464_v6, 0.0  ;;  %v1331_v0 = vmul.f32 %v7880_v34, %v7891_v15  ;;  %v1472_v20 = vadd.f32 %v7858_v39, %v1323_v19  ;;  %v1476_v60 = vadd.f32 %v7858_v39, %v1327_v51  ;;  %v7894_v4 = vld [vmem:[#allocation137_spill] sm:$0xff]  ;;  %v7898_v19 = vld [vmem:[#allocation140_spill] sm:$0xff] }
 0x270   :  { %2461 = vmatmul.mubr.bf16.gmra.mrb[76].mxu0 %v1665_v11  ;;  %2833 = vmatmul.mubr.bf16.gmra.mrb[108].mxu1 %v1665_v11  ;;  %v6747_v50 = vpack.c.bf16 %v1588_v54, %v1584_v63  ;;  %v1596_v12 = vmax.f32 %v1468_v47, 0.0  ;;  %v1335_v22 = vmul.f32 %v7880_v34, %v7892_v18  ;;  %v1339_v7 = vmul.f32 %v7880_v34, %v7893_v56  ;;  %v7896_v11 = vld [vmem:[#allocation139_spill] sm:$0xff]  ;;  %v7897_v6 = vld [vmem:[#allocation141_spill] sm:$0xff] }
 0x271   :  { %2470 = vmatprep.mubr.bf16.mxu0 %v1670_v8  ;;  %2840 = vmatprep.mubr.bf16.mxu1 %v1670_v8  ;;  %v1600_v35 = vmax.f32 %v1472_v20, 0.0  ;;  %v1604_v14 = vmax.f32 %v1476_v60, 0.0  ;;  %v1480_v38 = vadd.f32 %v7858_v39, %v1331_v0  ;;  %v1343_v24 = vmul.f32 %v7880_v34, %v7894_v4  ;;  %v7905_v18 = vld [vmem:[#allocation69_spill] sm:$0xff] }
 0x272   :  { %2580 = vmatpush1.bf16.msra.mxu0 %v4641_v53  ;;  %v6755_v1 = vpack.c.bf16 %v1596_v12, %v1592_v42  ;;  %v1484_v32 = vadd.f32 %v7858_v39, %v1335_v22  ;;  %v1347_v41 = vmul.f32 %v7880_v34, %v7895_v21  ;;  %v1488_v9 = vadd.f32 %v7858_v39, %v1339_v7  ;;  %v4652_v4 = vld [vmem:[%s7281_s7 + $0x8] sm:$0xff]   ;;  %v7907_v21 = vld [vmem:[#allocation79_spill] sm:$0xff] }
 0x273   :  { %2581 = vmatprep.subr.bf16.mxu0 %v4648_v40  ;;  %v6763_v57 = vpack.c.bf16 %v1604_v14, %v1600_v35  ;;  %v1608_v61 = vmax.f32 %v1480_v38, 0.0  ;;  %v1492_v25 = vadd.f32 %v7858_v39, %v1343_v24  ;;  %v1351_v8 = vmul.f32 %v7880_v34, %v7896_v11  ;;  %v4653_v24 = vld [vmem:[%s7281_s7 + $0x50] sm:$0xff]  }
 0x274   :  { %v1612_v49 = vmax.f32 %v1484_v32, 0.0  ;;  %v1616_v40 = vmax.f32 %v1488_v9, 0.0  ;;  %v1496_v54 = vadd.f32 %v7858_v39, %v1347_v41  ;;  %v1359_v2 = vmul.f32 %v7880_v34, %v7897_v6  ;;  %v7906_v32 = vld [vmem:[#allocation73_spill] sm:$0xff] }
 0x275   :  { %v1620_v63 = vmax.f32 %v1492_v25, 0.0  ;;  %v1355_v52 = vmul.f32 %v7880_v34, %v7898_v19  ;;  %v1500_v51 = vadd.f32 %v7858_v39, %v1351_v8  ;;  %v7904_v34 = vld [vmem:[#allocation63_spill] sm:$0xff]  ;;  %v4654_v25 = vld [vmem:[%s7281_s7 + $0x10] sm:$0xff]  }
 0x276   :  { %2582 = vmatpush1.bf16.msra.mxu0 %v4646_v26  ;;  %v6775_v53 = vpack.c.bf16 %v1612_v49, %v1608_v61  ;;  %v1508_v15 = vadd.f32 %v7858_v39, %v1359_v2 }
 0x277   :  { %v6783_v47 = vpack.c.bf16 %v1620_v63, %v1616_v40  ;;  %v1628_v42 = vmax.f32 %v1500_v51, 0.0  ;;  %v7908_v40 = vld [vmem:[#allocation82_spill] sm:$0xff]  ;;  %v4656_v51 = vld [vmem:[%s7281_s7 + $0x18] sm:$0xff]  }
 0x278   :  { %2471 = vmatmul.mubr.bf16.gmra.mrb[80].mxu0 %v6560_v17  ;;  %2841 = vmatmul.mubr.bf16.gmra.mrb[112].mxu1 %v6560_v17  ;;  %v1624_v17 = vmax.f32 %v1496_v54, 0.0  ;;  %v1636_v12 = vmax.f32 %v1508_v15, 0.0  ;;  %v7909_v54 = vld [vmem:[#allocation86_spill] sm:$0xff] }
 0x279   :  { %2480 = vmatprep.mubr.bf16.mxu0 %v6566_v59  ;;  %2848 = vmatprep.mubr.bf16.mxu1 %v6566_v59  ;;  %v1504_v59 = vadd.f32 %v7858_v39, %v1355_v52 }
 0x27a   :  { %v6787_v0 = vpack.c.bf16 %v1628_v42, %v1624_v17 }
 0x27b   :  { %v1632_v26 = vmax.f32 %v1504_v59, 0.0  ;;  %v7910_v59 = vld [vmem:[#allocation90_spill] sm:$0xff] }
 0x27d   :  { %v6791_v20 = vpack.c.bf16 %v1636_v12, %v1632_v26  ;;  %v7911_v26 = vld [vmem:[#allocation93_spill] sm:$0xff] }
 0x280   :  { %2481 = vmatmul.mubr.bf16.gmra.mrb[84].mxu0 %v6576_v5  ;;  %2849 = vmatmul.mubr.bf16.gmra.mrb[116].mxu1 %v6576_v5  ;;  %v4649_v5 = vld [vmem:[%s7281_s7 + $0x40] sm:$0xff]  }
 0x281   :  { %2490 = vmatprep.mubr.bf16.mxu0 %v6580_v13  ;;  %2856 = vmatprep.mubr.bf16.mxu1 %v6580_v13  ;;  %v7899_v13 = vld [vmem:[#allocation54_spill] sm:$0xff] }
 0x282   :  { %4193 = vmatprep.subr.bf16.mxu0 %v4649_v5 }
 0x288   :  { %2491 = vmatmul.mubr.bf16.gmra.mrb[88].mxu0 %v6584_v28  ;;  %2857 = vmatmul.mubr.bf16.gmra.mrb[120].mxu1 %v6584_v28  ;;  %v7900_v28 = vld [vmem:[#allocation99_spill] sm:$0xff] }
 0x289   :  { %2500 = vmatprep.mubr.bf16.mxu0 %v6590_v45  ;;  %2864 = vmatprep.mubr.bf16.mxu1 %v6590_v45  ;;  %v6820_v45 = vrot.slane %v7900_v28, %v7899_v13 }
 0x290   :  { %2501 = vmatmul.mubr.bf16.gmra.mrb[92].mxu0 %v6604_v33  ;;  %2865 = vmatmul.mubr.bf16.gmra.mrb[124].mxu1 %v6604_v33  ;;  %v7901_v33 = vld [vmem:[#allocation62_spill] sm:$0xff] }
 0x291   :  { %2510 = vmatprep.mubr.bf16.mxu0 %v6608_v10  ;;  %2872 = vmatprep.mubr.bf16.mxu1 %v6608_v10  ;;  %v7902_v10 = vld [vmem:[#allocation85_spill] sm:$0xff] }
 0x292   :  { %v1242_v60 = vmul.f32 %v7902_v10, %v7904_v34  ;;  %v1246_v22 = vmul.f32 %v7902_v10, %v7905_v18  ;;  %v1250_v61 = vmul.f32 %v7902_v10, %v7906_v32  ;;  %v1254_v41 = vmul.f32 %v7902_v10, %v7907_v21  ;;  %v4659_v18 = vld [vmem:[%s7281_s7 + $0x80] sm:$0xff]   ;;  %v7917_v21 = vld [vmem:[#allocation106_spill] sm:$0xff] }
 0x293   :  { %v1258_v63 = vmul.f32 %v7902_v10, %v7908_v40  ;;  %v1262_v6 = vmul.f32 %v7902_v10, %v7909_v54  ;;  %v1266_v15 = vmul.f32 %v7902_v10, %v7910_v59  ;;  %v1270_v12 = vmul.f32 %v7902_v10, %v7911_v26  ;;  %4329 = vmatprep.subr.bf16.mxu1 %v4659_v18  ;;  %v7916_v32 = vld [vmem:[#allocation104_spill] sm:$0xff]  ;;  %v7921_v59 = vld [vmem:[#allocation114_spill] sm:$0xff] }
 0x294   :  { %v1391_v14 = vadd.f32 %v6820_v45, %v1242_v60  ;;  %v1395_v38 = vadd.f32 %v6820_v45, %v1246_v22  ;;  %v1403_v9 = vadd.f32 %v6820_v45, %v1254_v41  ;;  %v4658_v60 = vld [vmem:[%s7281_s7 + $0x20] sm:$0xff]   ;;  %v1294_v41 = vmul.f32 %v7902_v10, %v7917_v21 }
 0x295   :  { %v1407_v19 = vadd.f32 %v6820_v45, %v1258_v63  ;;  %v1411_v52 = vadd.f32 %v6820_v45, %v1262_v6  ;;  %v1419_v28 = vadd.f32 %v6820_v45, %v1270_v12  ;;  %v7918_v63 = vld [vmem:[#allocation108_spill] sm:$0xff] }
 0x296   :  { %v1519_v56 = vmax.f32 %v1391_v14, 0.0  ;;  %v1523_v7 = vmax.f32 %v1395_v38, 0.0  ;;  %v1531_v8 = vmax.f32 %v1403_v9, 0.0  ;;  %v7914_v14 = vld [vmem:[#allocation100_spill] sm:$0xff]  ;;  %v1443_v9 = vadd.f32 %v6820_v45, %v1294_v41 }
 0x297   :  { %v1535_v17 = vmax.f32 %v1407_v19, 0.0  ;;  %v1539_v42 = vmax.f32 %v1411_v52, 0.0  ;;  %v1282_v38 = vmul.f32 %v7902_v10, %v7914_v14  ;;  %v1298_v54 = vmul.f32 %v7902_v10, %v7918_v63 }
 0x298   :  { %2511 = vmatmul.mubr.bf16.gmra.mrb[96].mxu0 %v6612_v30  ;;  %2873 = vmatmul.mubr.bf16.gmra.mrb[128].mxu1 %v6612_v30  ;;  %v1234_v30 = vmul.f32 %v7902_v10, %v7901_v33  ;;  %v1643_v49 = vpack.c.bf16 %v1523_v7, %v1519_v56  ;;  %v1571_v40 = vmax.f32 %v1443_v9, 0.0 }
 0x299   :  { %2520 = vmatprep.mubr.bf16.mxu0 %v6618_v29  ;;  %2880 = vmatprep.mubr.bf16.mxu1 %v6618_v29  ;;  %v7903_v29 = vld [vmem:[#allocation58_spill] sm:$0xff]  ;;  %v1651_v5 = vpack.c.bf16 %v1539_v42, %v1535_v17  ;;  %v1431_v56 = vadd.f32 %v6820_v45, %v1282_v38  ;;  %v1447_v19 = vadd.f32 %v6820_v45, %v1298_v54  ;;  %v7920_v17 = vld [vmem:[#allocation112_spill] sm:$0xff] }
 0x29a   :  { %v1306_v42 = vmul.f32 %v7902_v10, %v7920_v17  ;;  %v4669_v54 = vld [vmem:[%s7281_s7 + $0xa0] sm:$0xff]  }
 0x29c   :  { %v1455_v12 = vadd.f32 %v6820_v45, %v1306_v42 }
 0x2a0   :  { %2521 = vmatmul.mubr.bf16.gmra.mrb[100].mxu0 %v6628_v27  ;;  %2881 = vmatmul.mubr.bf16.gmra.mrb[132].mxu1 %v6628_v27  ;;  %v1238_v27 = vmul.f32 %v7902_v10, %v7903_v29  ;;  %v7912_v29 = vld [vmem:[#allocation95_spill] sm:$0xff] }
 0x2a1   :  { %2530 = vmatprep.mubr.bf16.mxu0 %v6632_v3  ;;  %2888 = vmatprep.mubr.bf16.mxu1 %v6632_v3  ;;  %v1383_v3 = vadd.f32 %v6820_v45, %v1234_v30  ;;  %v1547_v30 = vmax.f32 %v1419_v28, 0.0  ;;  %v4665_v28 = vld [vmem:[%s7281_s7 + $0x90] sm:$0xff]  }
 0x2a2   :  { %v1387_v39 = vadd.f32 %v6820_v45, %v1238_v27  ;;  %v1274_v27 = vmul.f32 %v7902_v10, %v7912_v29  ;;  %v7922_v29 = vld [vmem:[#allocation116_spill] sm:$0xff] }
 0x2a8   :  { %2531 = vmatmul.mubr.bf16.gmra.mrb[104].mxu0 %v6638_v48  ;;  %2889 = vmatmul.mubr.bf16.gmra.mrb[136].mxu1 %v6638_v48  ;;  %v1511_v48 = vmax.f32 %v1383_v3, 0.0  ;;  %v7913_v3 = vld [vmem:[#allocation98_spill] sm:$0xff] }
 0x2a9   :  { %2540 = vmatprep.mubr.bf16.mxu0 %v6646_v31  ;;  %2896 = vmatprep.mubr.bf16.mxu1 %v6646_v31  ;;  %v1515_v31 = vmax.f32 %v1387_v39, 0.0  ;;  %v1278_v39 = vmul.f32 %v7902_v10, %v7913_v3 }
 0x2ab   :  { %v1639_v35 = vpack.c.bf16 %v1515_v31, %v1511_v48  ;;  %v1423_v31 = vadd.f32 %v6820_v45, %v1274_v27  ;;  %v1427_v34 = vadd.f32 %v6820_v45, %v1278_v39  ;;  %v1314_v27 = vmul.f32 %v7902_v10, %v7922_v29 }
 0x2ad   :  { %v1551_v22 = vmax.f32 %v1423_v31, 0.0 }
 0x2b0   :  { %2541 = vmatmul.mubr.bf16.gmra.mrb[108].mxu0 %v6654_v46  ;;  %2897 = vmatmul.mubr.bf16.gmra.mrb[140].mxu1 %v6654_v46  ;;  %v4650_v46 = vld [vmem:[%s7281_s7] sm:$0xff]  }
 0x2b1   :  { %2583 = vmatprep.mubr.bf16.mxu0 %v6662_v37  ;;  %2937 = vmatprep.mubr.bf16.mxu1 %v6662_v37  ;;  %v4651_v37 = vld [vmem:[%s7281_s7 + $0x48] sm:$0xff]  }
 0x2b8   :  { %2584 = vmatmul.mubr.bf16.vlgmr.msra.gmra.mrb[48].mxu0 %v1639_v35  ;;  %2938 = vmatmul.mubr.bf16.vlgmr.msra.gmra.mrb[144].mxu1 %v1639_v35  ;;  %v1555_v35 = vmax.f32 %v1427_v34, 0.0 }
 0x2b9   :  { %2593 = vmatprep.mubr.bf16.mxu0 %v6670_v62  ;;  %2945 = vmatprep.mubr.bf16.mxu1 %v6670_v62  ;;  %v1399_v62 = vadd.f32 %v6820_v45, %v1250_v61  ;;  %v1290_v61 = vmul.f32 %v7902_v10, %v7916_v32  ;;  %v7927_v32 = vld [vmem:[#allocation125_spill] sm:$0xff] }
 0x2ba   :  { %4194 = vmatpush3.bf16.msra.mxu0 %v4650_v46  ;;  %4330 = vmatpush3.bf16.msra.mxu1 %v4659_v18 }
 0x2bb   :  { %4195 = vmatprep.subr.bf16.mxu0 %v4651_v37  ;;  %v1527_v11 = vmax.f32 %v1399_v62, 0.0  ;;  %v1659_v37 = vpack.c.bf16 %v1555_v35, %v1551_v22  ;;  %v1439_v62 = vadd.f32 %v6820_v45, %v1290_v61  ;;  %v7925_v22 = vld [vmem:[#allocation122_spill] sm:$0xff]  ;;  %v1334_v61 = vmul.f32 %v7902_v10, %v7927_v32 }
 0x2bc   :  { %v1326_v35 = vmul.f32 %v7902_v10, %v7925_v22 }
 0x2bd   :  { %v1647_v2 = vpack.c.bf16 %v1531_v8, %v1527_v11  ;;  %v4662_v11 = vld [vmem:[%s7281_s7 + $0x88] sm:$0xff]   ;;  %v1567_v8 = vmax.f32 %v1439_v62, 0.0 }
 0x2be   :  { %4196 = vmatpush3.bf16.msra.mxu0 %v4652_v4  ;;  %v1559_v4 = vmax.f32 %v1431_v56, 0.0  ;;  %4331 = vmatprep.subr.bf16.mxu1 %v4662_v11 }
 0x2bf   :  { %4197 = vmatprep.subr.bf16.mxu0 %v4653_v24  ;;  %4332 = vmatpush3.bf16.msra.mxu1 %v4662_v11 }
 0x2c0   :  { %2594 = vmatmul.mubr.bf16.gmra.mrb[52].mxu0 %v1643_v49  ;;  %2946 = vmatmul.mubr.bf16.gmra.mrb[148].mxu1 %v1643_v49 }
 0x2c1   :  { %2603 = vmatprep.mubr.bf16.mxu0 %v6685_v16  ;;  %2953 = vmatprep.mubr.bf16.mxu1 %v6685_v16  ;;  %v4655_v16 = vld [vmem:[%s7281_s7 + $0x58] sm:$0xff]  }
 0x2c2   :  { %4198 = vmatpush3.bf16.msra.mxu0 %v4654_v25  ;;  %v4661_v25 = vld [vmem:[%s7281_s7 + $0x28] sm:$0xff]   ;;  %4333 = vmatprep.subr.bf16.mxu1 %v4665_v28 }
 0x2c3   :  { %4199 = vmatprep.subr.bf16.mxu0 %v4655_v16  ;;  %v1575_v16 = vmax.f32 %v1447_v19, 0.0  ;;  %4334 = vmatpush3.bf16.msra.mxu1 %v4665_v28 }
 0x2c6   :  { %4200 = vmatpush3.bf16.msra.mxu0 %v4656_v51 }
 0x2c8   :  { %2604 = vmatmul.mubr.bf16.gmra.mrb[56].mxu0 %v1647_v2  ;;  %2954 = vmatmul.mubr.bf16.gmra.mrb[152].mxu1 %v1647_v2  ;;  %v1667_v2 = vpack.c.bf16 %v1571_v40, %v1567_v8 }
 0x2c9   :  { %2613 = vmatprep.mubr.bf16.mxu0 %v6695_v58  ;;  %2961 = vmatprep.mubr.bf16.mxu1 %v6695_v58  ;;  %v1415_v58 = vadd.f32 %v6820_v45, %v1266_v15  ;;  %v1310_v15 = vmul.f32 %v7902_v10, %v7921_v59 }
 0x2cb   :  { %v1543_v33 = vmax.f32 %v1415_v58, 0.0  ;;  %v4664_v58 = vld [vmem:[%s7281_s7 + $0x30] sm:$0xff]  }
 0x2cd   :  { %v1655_v48 = vpack.c.bf16 %v1547_v30, %v1543_v33  ;;  %v1583_v33 = vmax.f32 %v1455_v12, 0.0 }
 0x2d0   :  { %2614 = vmatmul.mubr.bf16.gmra.mrb[60].mxu0 %v1651_v5  ;;  %2962 = vmatmul.mubr.bf16.gmra.mrb[156].mxu1 %v1651_v5  ;;  %v1459_v5 = vadd.f32 %v6820_v45, %v1310_v15  ;;  %v4670_v15 = vld [vmem:[%s7281_s7 + $0xa8] sm:$0xff]  }
 0x2d1   :  { %2623 = vmatprep.mubr.bf16.mxu0 %v6705_v36  ;;  %2969 = vmatprep.mubr.bf16.mxu1 %v6705_v36  ;;  %v4657_v36 = vld [vmem:[%s7281_s7 + $0x60] sm:$0xff]  }
 0x2d2   :  { %4201 = vmatprep.subr.bf16.mxu0 %v4657_v36  ;;  %v1587_v30 = vmax.f32 %v1459_v5, 0.0 }
 0x2d3   :  { %4202 = vmatpush3.bf16.msra.mxu0 %v4658_v60  ;;  %v7924_v60 = vld [vmem:[#allocation120_spill] sm:$0xff] }
 0x2d4   :  { %v1675_v39 = vpack.c.bf16 %v1587_v30, %v1583_v33  ;;  %v1322_v18 = vmul.f32 %v7902_v10, %v7924_v60  ;;  %v7931_v33 = vld [vmem:[#allocation131_spill] sm:$0xff] }
 0x2d5   :  { %v1350_v30 = vmul.f32 %v7902_v10, %v7931_v33 }
 0x2d6   :  { %v1471_v38 = vadd.f32 %v6820_v45, %v1322_v18 }
 0x2d8   :  { %2624 = vmatmul.mubr.bf16.gmra.mrb[64].mxu0 %v1655_v48  ;;  %2970 = vmatmul.mubr.bf16.gmra.mrb[160].mxu1 %v1655_v48  ;;  %v1463_v48 = vadd.f32 %v6820_v45, %v1314_v27  ;;  %v1599_v56 = vmax.f32 %v1471_v38, 0.0  ;;  %v7933_v38 = vld [vmem:[#allocation134_spill] sm:$0xff] }
 0x2d9   :  { %2633 = vmatprep.mubr.bf16.mxu0 %v6717_v43  ;;  %2977 = vmatprep.mubr.bf16.mxu1 %v6717_v43  ;;  %v7915_v43 = vld [vmem:[#allocation102_spill] sm:$0xff] }
 0x2da   :  { %v1286_v46 = vmul.f32 %v7902_v10, %v7915_v43  ;;  %v1591_v34 = vmax.f32 %v1463_v48, 0.0  ;;  %v1475_v43 = vadd.f32 %v6820_v45, %v1326_v35  ;;  %v7932_v35 = vld [vmem:[#allocation133_spill] sm:$0xff] }
 0x2dc   :  { %v1435_v7 = vadd.f32 %v6820_v45, %v1286_v46  ;;  %v4667_v46 = vld [vmem:[%s7281_s7 + $0x38] sm:$0xff]  }
 0x2de   :  { %v1563_v24 = vmax.f32 %v1435_v7, 0.0  ;;  %v1603_v7 = vmax.f32 %v1475_v43, 0.0  ;;  %v1358_v43 = vmul.f32 %v7902_v10, %v7933_v38 }
 0x2e0   :  { %2634 = vmatmul.mubr.bf16.gmra.mrb[68].mxu0 %v1659_v37  ;;  %2978 = vmatmul.mubr.bf16.gmra.mrb[164].mxu1 %v1659_v37  ;;  %v1663_v49 = vpack.c.bf16 %v1563_v24, %v1559_v4  ;;  %v4668_v37 = vld [vmem:[%s7281_s7 + $0x98] sm:$0xff]   ;;  %v7926_v24 = vld [vmem:[#allocation124_spill] sm:$0xff]  ;;  %v1683_v9 = vpack.c.bf16 %v1603_v7, %v1599_v56 }
 0x2e1   :  { %2643 = vmatprep.mubr.bf16.mxu0 %v6723_v23  ;;  %2985 = vmatprep.mubr.bf16.mxu1 %v6723_v23  ;;  %v4660_v23 = vld [vmem:[%s7281_s7 + $0x68] sm:$0xff]  }
 0x2e2   :  { %4203 = vmatprep.subr.bf16.mxu0 %v4660_v23  ;;  %4335 = vmatprep.subr.bf16.mxu1 %v4668_v37 }
 0x2e3   :  { %4204 = vmatpush3.bf16.msra.mxu0 %v4661_v25  ;;  %4336 = vmatpush3.bf16.msra.mxu1 %v4668_v37  ;;  %v1483_v25 = vadd.f32 %v6820_v45, %v1334_v61 }
 0x2e4   :  { %4337 = vmatprep.subr.bf16.mxu1 %v4669_v54 }
 0x2e5   :  { %v1611_v40 = vmax.f32 %v1483_v25, 0.0 }
 0x2e7   :  { %4338 = vmatpush3.bf16.msra.mxu1 %v4669_v54 }
 0x2e8   :  { %2644 = vmatmul.mubr.bf16.gmra.mrb[72].mxu0 %v1663_v49  ;;  %2986 = vmatmul.mubr.bf16.gmra.mrb[168].mxu1 %v1663_v49 }
 0x2e9   :  { %2653 = vmatprep.mubr.bf16.mxu0 %v6731_v44  ;;  %2993 = vmatprep.mubr.bf16.mxu1 %v6731_v44  ;;  %v7919_v44 = vld [vmem:[#allocation109_spill] sm:$0xff] }
 0x2ea   :  { %v1302_v6 = vmul.f32 %v7902_v10, %v7919_v44  ;;  %v7928_v44 = vld [vmem:[#allocation126_spill] sm:$0xff]  ;;  %4339 = vmatprep.subr.bf16.mxu1 %v4670_v15 }
 0x2eb   :  { %4340 = vmatpush3.bf16.msra.mxu1 %v4670_v15 }
 0x2ec   :  { %v1451_v52 = vadd.f32 %v6820_v45, %v1302_v6  ;;  %v1338_v6 = vmul.f32 %v7902_v10, %v7928_v44 }
 0x2ee   :  { %v1579_v51 = vmax.f32 %v1451_v52, 0.0  ;;  %v1487_v42 = vadd.f32 %v6820_v45, %v1338_v6 }
 0x2f0   :  { %2654 = vmatmul.mubr.bf16.gmra.mrb[76].mxu0 %v1667_v2  ;;  %2994 = vmatmul.mubr.bf16.gmra.mrb[172].mxu1 %v1667_v2  ;;  %v1671_v26 = vpack.c.bf16 %v1579_v51, %v1575_v16  ;;  %v7929_v2 = vld [vmem:[#allocation128_spill] sm:$0xff]  ;;  %v1615_v12 = vmax.f32 %v1487_v42, 0.0 }
 0x2f1   :  { %2663 = vmatprep.mubr.bf16.mxu0 %v6739_v55  ;;  %3001 = vmatprep.mubr.bf16.mxu1 %v6739_v55  ;;  %v4663_v55 = vld [vmem:[%s7281_s7 + $0x70] sm:$0xff]   ;;  %v1342_v19 = vmul.f32 %v7902_v10, %v7929_v2 }
 0x2f2   :  { %4205 = vmatprep.subr.bf16.mxu0 %v4663_v55 }
 0x2f3   :  { %4206 = vmatpush3.bf16.msra.mxu0 %v4664_v58  ;;  %v1491_v59 = vadd.f32 %v6820_v45, %v1342_v19  ;;  %v7930_v58 = vld [vmem:[#allocation129_spill] sm:$0xff] }
 0x2f4   :  { %v1346_v28 = vmul.f32 %v7902_v10, %v7930_v58 }
 0x2f5   :  { %v1619_v5 = vmax.f32 %v1491_v59, 0.0 }
 0x2f6   :  { %v1495_v48 = vadd.f32 %v6820_v45, %v1346_v28 }
 0x2f8   :  { %2664 = vmatmul.mubr.bf16.gmra.mrb[80].mxu0 %v1671_v26  ;;  %3002 = vmatmul.mubr.bf16.gmra.mrb[176].mxu1 %v1671_v26  ;;  %v1623_v60 = vmax.f32 %v1495_v48, 0.0 }
 0x2f9   :  { %2673 = vmatprep.mubr.bf16.mxu0 %v6747_v50  ;;  %3009 = vmatprep.mubr.bf16.mxu1 %v6747_v50  ;;  %v7923_v50 = vld [vmem:[#allocation118_spill] sm:$0xff] }
 0x2fa   :  { %v1318_v3 = vmul.f32 %v7902_v10, %v7923_v50 }
 0x2fc   :  { %v1467_v31 = vadd.f32 %v6820_v45, %v1318_v3  ;;  %v4671_v3 = vld [vmem:[%s7281_s7 + $0xb0] sm:$0xff]  }
 0x2fd   :  { %4341 = vmatprep.subr.bf16.mxu1 %v4671_v3 }
 0x2fe   :  { %v1595_v36 = vmax.f32 %v1467_v31, 0.0  ;;  %v1499_v31 = vadd.f32 %v6820_v45, %v1350_v30  ;;  %4342 = vmatpush3.bf16.msra.mxu1 %v4671_v3 }
 0x300   :  { %2674 = vmatmul.mubr.bf16.gmra.mrb[84].mxu0 %v1675_v39  ;;  %3010 = vmatmul.mubr.bf16.gmra.mrb[180].mxu1 %v1675_v39  ;;  %v1679_v14 = vpack.c.bf16 %v1595_v36, %v1591_v34  ;;  %v1691_v39 = vpack.c.bf16 %v1619_v5, %v1615_v12  ;;  %v4672_v36 = vld [vmem:[%s7281_s7 + $0xb8] sm:$0xff]   ;;  %v1627_v18 = vmax.f32 %v1499_v31, 0.0 }
 0x301   :  { %2683 = vmatprep.mubr.bf16.mxu0 %v6755_v1  ;;  %3017 = vmatprep.mubr.bf16.mxu1 %v6755_v1  ;;  %v4666_v1 = vld [vmem:[%s7281_s7 + $0x78] sm:$0xff]  }
 0x302   :  { %4207 = vmatprep.subr.bf16.mxu0 %v4666_v1  ;;  %4343 = vmatprep.subr.bf16.mxu1 %v4672_v36  ;;  %v1695_v7 = vpack.c.bf16 %v1627_v18, %v1623_v60 }
 0x303   :  { %4208 = vmatpush3.bf16.msra.mxu0 %v4667_v46  ;;  %4344 = vmatpush3.bf16.msra.mxu1 %v4672_v36 }
 0x308   :  { %2684 = vmatmul.mubr.bf16.gmra.mrb[88].mxu0 %v1679_v14  ;;  %3018 = vmatmul.mubr.bf16.gmra.mrb[184].mxu1 %v1679_v14  ;;  %v1354_v14 = vmul.f32 %v7902_v10, %v7932_v35 }
 0x309   :  { %2693 = vmatprep.mubr.bf16.mxu0 %v6763_v57  ;;  %3025 = vmatprep.mubr.bf16.mxu1 %v6763_v57  ;;  %v1330_v57 = vmul.f32 %v7902_v10, %v7926_v24 }
 0x30b   :  { %v3985_v4 = vpop.f32.mrb[80].mxu1  ;;  %v1479_v23 = vadd.f32 %v6820_v45, %v1330_v57 }
 0x30c   :  { %v3986_v21 = vpop.f32.mrb[81].mxu1 }
 0x30d   :  { %v6981_v41 = vadd.f32 %v3986_v21, %v3985_v4  ;;  %v3988_v49 = vpop.f32.mrb[82].mxu1  ;;  %v1607_v8 = vmax.f32 %v1479_v23, 0.0  ;;  %v1503_v4 = vadd.f32 %v6820_v45, %v1354_v14 }
 0x30e   :  { %v3989_v62 = vpop.f32.mrb[83].mxu1 }
 0x30f   :  { %v6985_v11 = vadd.f32 %v3989_v62, %v3988_v49  ;;  %v1631_v10 = vmax.f32 %v1503_v4, 0.0 }
 0x310   :  { %2694 = vmatmul.mubr.bf16.gmra.mrb[92].mxu0 %v1683_v9  ;;  %3026 = vmatmul.mubr.bf16.gmra.mrb[188].mxu1 %v1683_v9 }
 0x311   :  { %2703 = vmatprep.mubr.bf16.mxu0 %v6775_v53  ;;  %3033 = vmatprep.mubr.bf16.mxu1 %v6775_v53  ;;  %v1687_v53 = vpack.c.bf16 %v1611_v40, %v1607_v8 }
 0x313   :  { %v3991_v63 = vpop.f32.mrb[84].mxu1 }
 0x314   :  { %v3992_v52 = vpop.f32.mrb[85].mxu1 }
 0x315   :  { %v6996_v16 = vadd.f32 %v3992_v52, %v3991_v63  ;;  %v3994_v51 = vpop.f32.mrb[86].mxu1 }
 0x316   :  { %v3995_v17 = vpop.f32.mrb[87].mxu1 }
 0x317   :  { %v7003_v26 = vadd.f32 %v3995_v17, %v3994_v51 }
 0x318   :  { %2704 = vmatmul.mubr.bf16.gmra.mrb[96].mxu0 %v1687_v53  ;;  %3034 = vmatmul.mubr.bf16.gmra.mrb[192].mxu1 %v1687_v53 }
 0x319   :  { %2713 = vmatprep.mubr.bf16.mxu0 %v6783_v47  ;;  %3041 = vmatprep.mubr.bf16.mxu1 %v6783_v47 }
 0x31b   :  { %v3997_v55 = vpop.f32.mrb[88].mxu1 }
 0x31c   :  { %v3998_v29 = vpop.f32.mrb[89].mxu1 }
 0x31d   :  { %v7011_v27 = vadd.f32 %v3998_v29, %v3997_v55  ;;  %v4000_v50 = vpop.f32.mrb[90].mxu1 }
 0x31e   :  { %v4001_v47 = vpop.f32.mrb[91].mxu1 }
 0x31f   :  { %v7018_v34 = vadd.f32 %v4001_v47, %v4000_v50 }
 0x320   :  { %2714 = vmatmul.mubr.bf16.gmra.mrb[100].mxu0 %v1691_v39  ;;  %3042 = vmatmul.mubr.bf16.gmra.mrb[196].mxu1 %v1691_v39 }
 0x321   :  { %2723 = vmatprep.mubr.bf16.mxu0 %v6787_v0  ;;  %3049 = vmatprep.mubr.bf16.mxu1 %v6787_v0  ;;  %v1507_v0 = vadd.f32 %v6820_v45, %v1358_v43 }
 0x323   :  { %v4003_v22 = vpop.f32.mrb[92].mxu1  ;;  %v1635_v57 = vmax.f32 %v1507_v0, 0.0 }
 0x324   :  { %v4004_v1 = vpop.f32.mrb[93].mxu1 }
 0x325   :  { %v7029_v46 = vadd.f32 %v4004_v1, %v4003_v22  ;;  %v4006_v37 = vpop.f32.mrb[94].mxu1  ;;  %v1699_v9 = vpack.c.bf16 %v1635_v57, %v1631_v10 }
 0x326   :  { %v4007_v56 = vpop.f32.mrb[95].mxu1 }
 0x327   :  { %v7033_v24 = vadd.f32 %v4007_v56, %v4006_v37 }
 0x328   :  { %2724 = vmatmul.mubr.bf16.gmra.mrb[104].mxu0 %v1695_v7  ;;  %3050 = vmatmul.mubr.bf16.gmra.mrb[200].mxu1 %v1695_v7 }
 0x329   :  { %2733 = vmatprep.mubr.bf16.mxu0 %v6791_v20  ;;  %3057 = vmatprep.mubr.bf16.mxu1 %v6791_v20 }
 0x32b   :  { %v4009_v32 = vpop.f32.mrb[96].mxu1 }
 0x32c   :  { %v4010_v61 = vpop.f32.mrb[97].mxu1 }
 0x32d   :  { %v7037_v21 = vadd.f32 %v4010_v61, %v4009_v32  ;;  %v4012_v49 = vpop.f32.mrb[98].mxu1 }
 0x32e   :  { %v4013_v62 = vpop.f32.mrb[99].mxu1 }
 0x32f   :  { %v7039_v23 = vadd.f32 %v4013_v62, %v4012_v49 }
 0x330   :  { %2734 = vmatmul.mubr.bf16.gmra.mrb[108].mxu0 %v1699_v9  ;;  %3058 = vmatmul.mubr.bf16.gmra.mrb[204].mxu1 %v1699_v9 }
 0x333   :  { %v4015_v45 = vpop.f32.mrb[100].mxu1 }
 0x334   :  { %v4016_v25 = vpop.f32.mrb[101].mxu1 }
 0x335   :  { %v7041_v8 = vadd.f32 %v4016_v25, %v4015_v45  ;;  %v4018_v40 = vpop.f32.mrb[102].mxu1 }
 0x336   :  { %v4019_v63 = vpop.f32.mrb[103].mxu1 }
 0x337   :  { %v7043_v20 = vadd.f32 %v4019_v63, %v4018_v40 }
 0x33b   :  { %v4021_v54 = vpop.f32.mrb[104].mxu1 }
 0x33c   :  { %v4022_v44 = vpop.f32.mrb[105].mxu1 }
 0x33d   :  { %v7045_v6 = vadd.f32 %v4022_v44, %v4021_v54  ;;  %v4024_v2 = vpop.f32.mrb[106].mxu1 }
 0x33e   :  { %v4025_v19 = vpop.f32.mrb[107].mxu1 }
 0x33f   :  { %v7047_v52 = vadd.f32 %v4025_v19, %v4024_v2 }
 0x343   :  { %v4027_v51 = vpop.f32.mrb[108].mxu1 }
 0x344   :  { %v4028_v17 = vpop.f32.mrb[109].mxu1 }
 0x345   :  { %v7049_v53 = vadd.f32 %v4028_v17, %v4027_v51  ;;  %v4030_v42 = vpop.f32.mrb[110].mxu1 }
 0x346   :  { %v4031_v59 = vpop.f32.mrb[111].mxu1 }
 0x347   :  { %v7051_v15 = vadd.f32 %v4031_v59, %v4030_v42  ;;  %v1829_v59 = vld [vmem:[%s7280_s6] sm:$0x7] }
 0x34b   :  { %v4033_v12 = vpop.f32.mrb[112].mxu1 }
 0x34c   :  { %v4034_v5 = vpop.f32.mrb[113].mxu1 }
 0x34d   :  { %v7053_v55 = vadd.f32 %v4034_v5, %v4033_v12  ;;  %v4036_v58 = vpop.f32.mrb[114].mxu1 }
 0x34e   :  { %v4037_v28 = vpop.f32.mrb[115].mxu1 }
 0x34f   :  { %v7055_v33 = vadd.f32 %v4037_v28, %v4036_v58  ;;  %v7934_v58 = vld [vmem:[#allocation9_spill] sm:$0xff] }
 0x350   :  { %v7089_v28 = vrot.slane %v1829_v59, %v7934_v58 }
 0x353   :  { %v4039_v30 = vpop.f32.mrb[116].mxu1 }
 0x354   :  { %v4040_v29 = vpop.f32.mrb[117].mxu1 }
 0x355   :  { %v7057_v50 = vadd.f32 %v4040_v29, %v4039_v30  ;;  %v4042_v3 = vpop.f32.mrb[118].mxu1  ;;  %v7935_v30 = vld [vmem:[#allocation10_spill] sm:$0xff] }
 0x356   :  { %v4043_v47 = vpop.f32.mrb[119].mxu1  ;;  %v7092_v29 = vrot.slane %v1829_v59, %v7935_v30 }
 0x357   :  { %v7059_v39 = vadd.f32 %v4043_v47, %v4042_v3  ;;  %v7095_v3 = vrot.slane %v1829_v59, %v7899_v13 }
 0x359   :  { %v2782_v13 = vadd.f32 %v6985_v11, %v7095_v3  ;;  %v2787_v11 = vadd.f32 %v6996_v16, %v7095_v3 }
 0x35b   :  { %v4045_v48 = vpop.f32.mrb[120].mxu1 }
 0x35c   :  { %v4046_v31 = vpop.f32.mrb[121].mxu1 }
 0x35d   :  { %v7061_v36 = vadd.f32 %v4046_v31, %v4045_v48  ;;  %v4048_v60 = vpop.f32.mrb[122].mxu1 }
 0x35e   :  { %v4049_v18 = vpop.f32.mrb[123].mxu1 }
 0x35f   :  { %v7063_v22 = vadd.f32 %v4049_v18, %v4048_v60 }
 0x363   :  { %v4051_v35 = vpop.f32.mrb[124].mxu1 }
 0x364   :  { %v4052_v14 = vpop.f32.mrb[125].mxu1 }
 0x365   :  { %v7065_v38 = vadd.f32 %v4052_v14, %v4051_v35  ;;  %v4054_v43 = vpop.f32.mrb[126].mxu1  ;;  %v2779_v35 = vadd.f32 %v6981_v41, %v7095_v3 }
 0x366   :  { %v4055_v1 = vpop.f32.mrb[127].mxu1 }
 0x367   :  { %v7067_v37 = vadd.f32 %v4055_v1, %v4054_v43 }
 0x36b   :  { %v4057_v56 = vpop.f32.mrb[128].mxu1 }
 0x36c   :  { %v4058_v7 = vpop.f32.mrb[129].mxu1 }
 0x36d   :  { %v7069_v4 = vadd.f32 %v4058_v7, %v4057_v56  ;;  %v4060_v0 = vpop.f32.mrb[130].mxu1 }
 0x36e   :  { %v4061_v10 = vpop.f32.mrb[131].mxu1 }
 0x36f   :  { %v7071_v57 = vadd.f32 %v4061_v10, %v4060_v0 }
 0x373   :  { %v4063_v32 = vpop.f32.mrb[132].mxu1 }
 0x374   :  { %v4064_v61 = vpop.f32.mrb[133].mxu1 }
 0x375   :  { %v7073_v49 = vadd.f32 %v4064_v61, %v4063_v32  ;;  %v4066_v62 = vpop.f32.mrb[134].mxu1 }
 0x376   :  { %v4067_v9 = vpop.f32.mrb[135].mxu1 }
 0x377   :  { %v7075_v45 = vadd.f32 %v4067_v9, %v4066_v62 }
 0x37b   :  { %v4069_v25 = vpop.f32.mrb[136].mxu1 }
 0x37c   :  { %v4070_v40 = vpop.f32.mrb[137].mxu1 }
 0x37d   :  { %v7077_v63 = vadd.f32 %v4070_v40, %v4069_v25  ;;  %v4072_v54 = vpop.f32.mrb[138].mxu1 }
 0x37e   :  { %v4073_v44 = vpop.f32.mrb[139].mxu1 }
 0x37f   :  { %v7079_v2 = vadd.f32 %v4073_v44, %v4072_v54 }
 0x383   :  { %v4075_v19 = vpop.f32.mrb[140].mxu1 }
 0x384   :  { %v4076_v51 = vpop.f32.mrb[141].mxu1 }
 0x385   :  { %v7081_v17 = vadd.f32 %v4076_v51, %v4075_v19  ;;  %v4078_v42 = vpop.f32.mrb[142].mxu1 }
 0x386   :  { %v4079_v12 = vpop.f32.mrb[143].mxu1 }
 0x387   :  { %v7086_v5 = vadd.f32 %v4079_v12, %v4078_v42 }
 0x38b   :  { %v2585_v47 = vpop.f32.mrb[48].mxu0  ;;  %v4097_v48 = vpop.f32.mrb[144].mxu1 }
 0x38c   :  { %v4379_v31 = vadd.f32 %v2585_v47, %v7089_v28  ;;  %v2587_v60 = vpop.f32.mrb[49].mxu0  ;;  %v4098_v18 = vpop.f32.mrb[145].mxu1 }
 0x38d   :  { %v4380_v14 = vadd.f32 %v2587_v60, %v7092_v29  ;;  %v4099_v43 = vadd.f32 %v4098_v18, %v4097_v48  ;;  %v2589_v1 = vpop.f32.mrb[50].mxu0  ;;  %v4100_v56 = vpop.f32.mrb[146].mxu1 }
 0x38e   :  { %v4381_v7 = vadd.f32 %v2589_v1, %v7089_v28  ;;  %v2591_v0 = vpop.f32.mrb[51].mxu0  ;;  %v4101_v10 = vpop.f32.mrb[147].mxu1  ;;  %v3066_v9 = vmax.f32 %v4379_v31, 0.0 }
 0x38f   :  { %v2940_v32 = vadd.f32 %v4099_v43, %v2779_v35  ;;  %v4382_v61 = vadd.f32 %v2591_v0, %v7092_v29  ;;  %v4102_v62 = vadd.f32 %v4101_v10, %v4100_v56  ;;  %v3067_v40 = vmax.f32 %v4380_v14, 0.0 }
 0x390   :  { %v3069_v25 = vmax.f32 %v4381_v7, 0.0  ;;  %v2790_v56 = vadd.f32 %v7003_v26, %v7095_v3 }
 0x391   :  { %v3070_v41 = vmax.f32 %v4382_v61, 0.0  ;;  %v2943_v54 = vadd.f32 %v4102_v62, %v2782_v13  ;;  %v3068_v19 = vmax.f32 %v2940_v32, 0.0 }
 0x392   :  { %v3162_v44 = vpack.c.bf16 %v3069_v25, %v3066_v9 }
 0x393   :  { %v3163_v51 = vpack.c.bf16 %v3070_v41, %v3067_v40  ;;  %v3071_v42 = vmax.f32 %v2943_v54, 0.0  ;;  %v2595_v59 = vpop.f32.mrb[52].mxu0  ;;  %v4103_v12 = vpop.f32.mrb[148].mxu1 }
 0x394   :  { %v4383_v58 = vadd.f32 %v2595_v59, %v7089_v28  ;;  %v2597_v30 = vpop.f32.mrb[53].mxu0  ;;  %v4104_v47 = vpop.f32.mrb[149].mxu1 }
 0x395   :  { %v4384_v48 = vadd.f32 %v2597_v30, %v7092_v29  ;;  %v4105_v31 = vadd.f32 %v4104_v47, %v4103_v12  ;;  %v2599_v60 = vpop.f32.mrb[54].mxu0  ;;  %v4106_v18 = vpop.f32.mrb[150].mxu1  ;;  %3441 = vmatprep.mubr.bf16.mxu0 %v3163_v51  ;;  %v3164_v35 = vpack.c.bf16 %v3071_v42, %v3068_v19  ;;  %v2795_v42 = vadd.f32 %v7011_v27, %v7095_v3 }
 0x396   :  { %v4385_v14 = vadd.f32 %v2599_v60, %v7089_v28  ;;  %v2601_v43 = vpop.f32.mrb[55].mxu0  ;;  %v4107_v1 = vpop.f32.mrb[151].mxu1  ;;  %3442 = vmatmul.mubr.bf16.vlgmr.msra.gmra.mrb[112].mxu0 %v3162_v44  ;;  %v3072_v16 = vmax.f32 %v4383_v58, 0.0  ;;  %v2798_v60 = vadd.f32 %v7018_v34, %v7095_v3 }
 0x397   :  { %v2948_v7 = vadd.f32 %v4105_v31, %v2787_v11  ;;  %v4386_v0 = vadd.f32 %v2601_v43, %v7092_v29  ;;  %v4108_v10 = vadd.f32 %v4107_v1, %v4106_v18  ;;  %4345 = vmatprep.mubr.bf16.mxu1 %v3164_v35  ;;  %v3073_v32 = vmax.f32 %v4384_v48, 0.0 }
 0x398   :  { %v3075_v13 = vmax.f32 %v4385_v14, 0.0 }
 0x399   :  { %v3076_v61 = vmax.f32 %v4386_v0, 0.0  ;;  %v2951_v62 = vadd.f32 %v4108_v10, %v2790_v56  ;;  %v3074_v25 = vmax.f32 %v2948_v7, 0.0 }
 0x39a   :  { %v3165_v9 = vpack.c.bf16 %v3075_v13, %v3072_v16 }
 0x39b   :  { %v3166_v40 = vpack.c.bf16 %v3076_v61, %v3073_v32  ;;  %v3077_v41 = vmax.f32 %v2951_v62, 0.0  ;;  %v2605_v54 = vpop.f32.mrb[56].mxu0  ;;  %v4109_v19 = vpop.f32.mrb[152].mxu1 }
 0x39c   :  { %v4387_v44 = vadd.f32 %v2605_v54, %v7089_v28  ;;  %v2607_v51 = vpop.f32.mrb[57].mxu0  ;;  %v4110_v26 = vpop.f32.mrb[153].mxu1 }
 0x39d   :  { %v3167_v59 = vpack.c.bf16 %v3077_v41, %v3074_v25  ;;  %v4388_v12 = vadd.f32 %v2607_v51, %v7092_v29  ;;  %v4111_v58 = vadd.f32 %v4110_v26, %v4109_v19  ;;  %v2609_v30 = vpop.f32.mrb[58].mxu0  ;;  %v4112_v47 = vpop.f32.mrb[154].mxu1  ;;  %3449 = vmatprep.mubr.bf16.mxu0 %v3166_v40  ;;  %v2803_v25 = vadd.f32 %v7029_v46, %v7095_v3 }
 0x39e   :  { %v4389_v11 = vadd.f32 %v2609_v30, %v7089_v28  ;;  %v2611_v48 = vpop.f32.mrb[59].mxu0  ;;  %v4113_v31 = vpop.f32.mrb[155].mxu1  ;;  %3450 = vmatmul.mubr.bf16.gmra.mrb[116].mxu0 %v3165_v9  ;;  %v3078_v27 = vmax.f32 %v4387_v44, 0.0 }
 0x39f   :  { %v2956_v18 = vadd.f32 %v4111_v58, %v2795_v42  ;;  %v4390_v35 = vadd.f32 %v2611_v48, %v7092_v29  ;;  %v4114_v14 = vadd.f32 %v4113_v31, %v4112_v47  ;;  %4346 = vmatmul.mubr.bf16.vlgmr.msra.gmra.mrb[208].mxu1 %v3167_v59  ;;  %v3079_v1 = vmax.f32 %v4388_v12, 0.0 }
 0x3a0   :  { %v3081_v43 = vmax.f32 %v4389_v11, 0.0  ;;  %v2806_v59 = vadd.f32 %v7033_v24, %v7095_v3 }
 0x3a1   :  { %v3082_v56 = vmax.f32 %v4390_v35, 0.0  ;;  %v2959_v7 = vadd.f32 %v4114_v14, %v2798_v60  ;;  %v3080_v10 = vmax.f32 %v2956_v18, 0.0 }
 0x3a2   :  { %v3168_v0 = vpack.c.bf16 %v3081_v43, %v3078_v27 }
 0x3a3   :  { %v3169_v16 = vpack.c.bf16 %v3082_v56, %v3079_v1  ;;  %v3083_v13 = vmax.f32 %v2959_v7, 0.0  ;;  %v2615_v32 = vpop.f32.mrb[60].mxu0  ;;  %v4115_v61 = vpop.f32.mrb[156].mxu1  ;;  %v2811_v7 = vadd.f32 %v7037_v21, %v7095_v3 }
 0x3a4   :  { %v4391_v62 = vadd.f32 %v2615_v32, %v7089_v28  ;;  %v2617_v9 = vpop.f32.mrb[61].mxu0  ;;  %v4116_v34 = vpop.f32.mrb[157].mxu1 }
 0x3a5   :  { %v4392_v40 = vadd.f32 %v2617_v9, %v7092_v29  ;;  %v4117_v41 = vadd.f32 %v4116_v34, %v4115_v61  ;;  %v2619_v54 = vpop.f32.mrb[62].mxu0  ;;  %v4118_v19 = vpop.f32.mrb[158].mxu1  ;;  %3457 = vmatprep.mubr.bf16.mxu0 %v3169_v16  ;;  %v3170_v44 = vpack.c.bf16 %v3083_v13, %v3080_v10  ;;  %v2814_v34 = vadd.f32 %v7039_v23, %v7095_v3 }
 0x3a6   :  { %v4393_v51 = vadd.f32 %v2619_v54, %v7089_v28  ;;  %v2621_v26 = vpop.f32.mrb[63].mxu0  ;;  %v4119_v42 = vpop.f32.mrb[159].mxu1  ;;  %3458 = vmatmul.mubr.bf16.gmra.mrb[120].mxu0 %v3168_v0  ;;  %v3084_v46 = vmax.f32 %v4391_v62, 0.0 }
 0x3a7   :  { %v2964_v12 = vadd.f32 %v4117_v41, %v2803_v25  ;;  %v4394_v58 = vadd.f32 %v2621_v26, %v7092_v29  ;;  %v4120_v30 = vadd.f32 %v4119_v42, %v4118_v19  ;;  %4349 = vmatprep.mubr.bf16.mxu1 %v3170_v44  ;;  %v3085_v11 = vmax.f32 %v4392_v40, 0.0 }
 0x3a8   :  { %v3087_v47 = vmax.f32 %v4393_v51, 0.0 }
 0x3a9   :  { %v3088_v48 = vmax.f32 %v4394_v58, 0.0  ;;  %v2967_v31 = vadd.f32 %v4120_v30, %v2806_v59  ;;  %v3086_v18 = vmax.f32 %v2964_v12, 0.0 }
 0x3aa   :  { %v3171_v60 = vpack.c.bf16 %v3087_v47, %v3084_v46 }
 0x3ab   :  { %v3172_v35 = vpack.c.bf16 %v3088_v48, %v3085_v11  ;;  %v3089_v14 = vmax.f32 %v2967_v31, 0.0  ;;  %v2625_v27 = vpop.f32.mrb[64].mxu0  ;;  %v4121_v43 = vpop.f32.mrb[160].mxu1  ;;  %v2819_v11 = vadd.f32 %v7041_v8, %v7095_v3 }
 0x3ac   :  { %v4395_v1 = vadd.f32 %v2625_v27, %v7089_v28  ;;  %v2627_v56 = vpop.f32.mrb[65].mxu0  ;;  %v4122_v24 = vpop.f32.mrb[161].mxu1 }
 0x3ad   :  { %v4396_v0 = vadd.f32 %v2627_v56, %v7092_v29  ;;  %v4123_v10 = vadd.f32 %v4122_v24, %v4121_v43  ;;  %v2629_v16 = vpop.f32.mrb[66].mxu0  ;;  %v4124_v13 = vpop.f32.mrb[162].mxu1  ;;  %3465 = vmatprep.mubr.bf16.mxu0 %v3172_v35  ;;  %v3173_v32 = vpack.c.bf16 %v3089_v14, %v3086_v18 }
 0x3ae   :  { %v4397_v61 = vadd.f32 %v2629_v16, %v7089_v28  ;;  %v2631_v62 = vpop.f32.mrb[67].mxu0  ;;  %v4125_v9 = vpop.f32.mrb[163].mxu1  ;;  %3466 = vmatmul.mubr.bf16.gmra.mrb[124].mxu0 %v3171_v60  ;;  %v3090_v21 = vmax.f32 %v4395_v1, 0.0  ;;  %v2822_v1 = vadd.f32 %v7043_v20, %v7095_v3 }
 0x3af   :  { %v2972_v25 = vadd.f32 %v4123_v10, %v2811_v7  ;;  %v4398_v40 = vadd.f32 %v2631_v62, %v7092_v29  ;;  %v4126_v41 = vadd.f32 %v4125_v9, %v4124_v13  ;;  %4350 = vmatmul.mubr.bf16.gmra.mrb[212].mxu1 %v3173_v32  ;;  %v3091_v19 = vmax.f32 %v4396_v0, 0.0 }
 0x3b0   :  { %v3093_v54 = vmax.f32 %v4397_v61, 0.0 }
 0x3b1   :  { %v3094_v44 = vmax.f32 %v4398_v40, 0.0  ;;  %v2975_v51 = vadd.f32 %v4126_v41, %v2814_v34  ;;  %v3092_v42 = vmax.f32 %v2972_v25, 0.0 }
 0x3b2   :  { %v3174_v26 = vpack.c.bf16 %v3093_v54, %v3090_v21  ;;  %v2827_v21 = vadd.f32 %v7045_v6, %v7095_v3 }
 0x3b3   :  { %v3175_v59 = vpack.c.bf16 %v3094_v44, %v3091_v19  ;;  %v3095_v12 = vmax.f32 %v2975_v51, 0.0  ;;  %v2635_v58 = vpop.f32.mrb[68].mxu0  ;;  %v4127_v30 = vpop.f32.mrb[164].mxu1 }
 0x3b4   :  { %v4399_v46 = vadd.f32 %v2635_v58, %v7089_v28  ;;  %v2637_v47 = vpop.f32.mrb[69].mxu0  ;;  %v4128_v23 = vpop.f32.mrb[165].mxu1  ;;  %v2830_v58 = vadd.f32 %v7047_v52, %v7095_v3 }
 0x3b5   :  { %v4400_v48 = vadd.f32 %v2637_v47, %v7092_v29  ;;  %v4129_v31 = vadd.f32 %v4128_v23, %v4127_v30  ;;  %v2639_v60 = vpop.f32.mrb[70].mxu0  ;;  %v4130_v18 = vpop.f32.mrb[166].mxu1  ;;  %3473 = vmatprep.mubr.bf16.mxu0 %v3175_v59  ;;  %v3176_v35 = vpack.c.bf16 %v3095_v12, %v3092_v42 }
 0x3b6   :  { %v4401_v14 = vadd.f32 %v2639_v60, %v7089_v28  ;;  %v2641_v27 = vpop.f32.mrb[71].mxu0  ;;  %v4131_v43 = vpop.f32.mrb[167].mxu1  ;;  %3474 = vmatmul.mubr.bf16.gmra.mrb[128].mxu0 %v3174_v26  ;;  %v3096_v8 = vmax.f32 %v4399_v46, 0.0 }
 0x3b7   :  { %v2980_v56 = vadd.f32 %v4129_v31, %v2819_v11  ;;  %v4402_v24 = vadd.f32 %v2641_v27, %v7092_v29  ;;  %v4132_v7 = vadd.f32 %v4131_v43, %v4130_v18  ;;  %4353 = vmatprep.mubr.bf16.mxu1 %v3176_v35  ;;  %v3097_v10 = vmax.f32 %v4400_v48, 0.0 }
 0x3b8   :  { %v3099_v0 = vmax.f32 %v4401_v14, 0.0 }
 0x3b9   :  { %v3100_v16 = vmax.f32 %v4402_v24, 0.0  ;;  %v2983_v13 = vadd.f32 %v4132_v7, %v2822_v1  ;;  %v3098_v61 = vmax.f32 %v2980_v56, 0.0  ;;  %v2835_v24 = vadd.f32 %v7049_v53, %v7095_v3 }
 0x3ba   :  { %v3177_v32 = vpack.c.bf16 %v3099_v0, %v3096_v8 }
 0x3bb   :  { %v3178_v62 = vpack.c.bf16 %v3100_v16, %v3097_v10  ;;  %v3101_v9 = vmax.f32 %v2983_v13, 0.0  ;;  %v2645_v34 = vpop.f32.mrb[72].mxu0  ;;  %v4133_v25 = vpop.f32.mrb[168].mxu1 }
 0x3bc   :  { %v4403_v40 = vadd.f32 %v2645_v34, %v7089_v28  ;;  %v2647_v41 = vpop.f32.mrb[73].mxu0  ;;  %v4134_v20 = vpop.f32.mrb[169].mxu1 }
 0x3bd   :  { %v4404_v54 = vadd.f32 %v2647_v41, %v7092_v29  ;;  %v4135_v19 = vadd.f32 %v4134_v20, %v4133_v25  ;;  %v2649_v44 = vpop.f32.mrb[74].mxu0  ;;  %v4136_v51 = vpop.f32.mrb[170].mxu1  ;;  %3481 = vmatprep.mubr.bf16.mxu0 %v3178_v62  ;;  %v3179_v26 = vpack.c.bf16 %v3101_v9, %v3098_v61  ;;  %v2838_v62 = vadd.f32 %v7051_v15, %v7095_v3 }
 0x3be   :  { %v4405_v42 = vadd.f32 %v2649_v44, %v7089_v28  ;;  %v2651_v59 = vpop.f32.mrb[75].mxu0  ;;  %v4137_v12 = vpop.f32.mrb[171].mxu1  ;;  %3482 = vmatmul.mubr.bf16.gmra.mrb[132].mxu0 %v3177_v32  ;;  %v3102_v6 = vmax.f32 %v4403_v40, 0.0 }
 0x3bf   :  { %v2988_v30 = vadd.f32 %v4135_v19, %v2827_v21  ;;  %v4406_v46 = vadd.f32 %v2651_v59, %v7092_v29  ;;  %v4138_v47 = vadd.f32 %v4137_v12, %v4136_v51  ;;  %4354 = vmatmul.mubr.bf16.gmra.mrb[216].mxu1 %v3179_v26  ;;  %v3103_v11 = vmax.f32 %v4404_v54, 0.0 }
 0x3c0   :  { %v3105_v23 = vmax.f32 %v4405_v42, 0.0 }
 0x3c1   :  { %v3106_v48 = vmax.f32 %v4406_v46, 0.0  ;;  %v2991_v31 = vadd.f32 %v4138_v47, %v2830_v58  ;;  %v3104_v18 = vmax.f32 %v2988_v30, 0.0  ;;  %v2843_v58 = vadd.f32 %v7053_v55, %v7095_v3 }
 0x3c2   :  { %v3180_v60 = vpack.c.bf16 %v3105_v23, %v3102_v6 }
 0x3c3   :  { %v3181_v35 = vpack.c.bf16 %v3106_v48, %v3103_v11  ;;  %v3107_v14 = vmax.f32 %v2991_v31, 0.0  ;;  %v2655_v27 = vpop.f32.mrb[76].mxu0  ;;  %v4139_v43 = vpop.f32.mrb[172].mxu1 }
 0x3c4   :  { %v4407_v1 = vadd.f32 %v2655_v27, %v7089_v28  ;;  %v2657_v56 = vpop.f32.mrb[77].mxu0  ;;  %v4140_v52 = vpop.f32.mrb[173].mxu1 }
 0x3c5   :  { %v4408_v7 = vadd.f32 %v2657_v56, %v7092_v29  ;;  %v4141_v8 = vadd.f32 %v4140_v52, %v4139_v43  ;;  %v2659_v0 = vpop.f32.mrb[78].mxu0  ;;  %v4142_v10 = vpop.f32.mrb[174].mxu1  ;;  %3489 = vmatprep.mubr.bf16.mxu0 %v3181_v35  ;;  %v3182_v16 = vpack.c.bf16 %v3107_v14, %v3104_v18 }
 0x3c6   :  { %v4409_v13 = vadd.f32 %v2659_v0, %v7089_v28  ;;  %v2661_v32 = vpop.f32.mrb[79].mxu0  ;;  %v4143_v61 = vpop.f32.mrb[175].mxu1  ;;  %3490 = vmatmul.mubr.bf16.gmra.mrb[136].mxu0 %v3180_v60  ;;  %v3108_v53 = vmax.f32 %v4407_v1, 0.0  ;;  %v2846_v60 = vadd.f32 %v7055_v33, %v7095_v3 }
 0x3c7   :  { %v2996_v9 = vadd.f32 %v4141_v8, %v2835_v24  ;;  %v4410_v34 = vadd.f32 %v2661_v32, %v7092_v29  ;;  %v4144_v25 = vadd.f32 %v4143_v61, %v4142_v10  ;;  %4357 = vmatprep.mubr.bf16.mxu1 %v3182_v16  ;;  %v3109_v41 = vmax.f32 %v4408_v7, 0.0 }
 0x3c8   :  { %v3111_v40 = vmax.f32 %v4409_v13, 0.0  ;;  %v2851_v32 = vadd.f32 %v7057_v50, %v7095_v3 }
 0x3c9   :  { %v3112_v20 = vmax.f32 %v4410_v34, 0.0  ;;  %v2999_v21 = vadd.f32 %v4144_v25, %v2838_v62  ;;  %v3110_v19 = vmax.f32 %v2996_v9, 0.0 }
 0x3ca   :  { %v3183_v54 = vpack.c.bf16 %v3111_v40, %v3108_v53 }
 0x3cb   :  { %v3184_v44 = vpack.c.bf16 %v3112_v20, %v3109_v41  ;;  %v3113_v51 = vmax.f32 %v2999_v21, 0.0  ;;  %v2665_v26 = vpop.f32.mrb[80].mxu0  ;;  %v4145_v42 = vpop.f32.mrb[176].mxu1  ;;  %v2854_v20 = vadd.f32 %v7059_v39, %v7095_v3 }
 0x3cc   :  { %v4411_v59 = vadd.f32 %v2665_v26, %v7089_v28  ;;  %v2667_v12 = vpop.f32.mrb[81].mxu0  ;;  %v4146_v15 = vpop.f32.mrb[177].mxu1 }
 0x3cd   :  { %v4412_v30 = vadd.f32 %v2667_v12, %v7092_v29  ;;  %v4147_v46 = vadd.f32 %v4146_v15, %v4145_v42  ;;  %v2669_v47 = vpop.f32.mrb[82].mxu0  ;;  %v4148_v6 = vpop.f32.mrb[178].mxu1  ;;  %3497 = vmatprep.mubr.bf16.mxu0 %v3184_v44  ;;  %v3185_v23 = vpack.c.bf16 %v3113_v51, %v3110_v19 }
 0x3ce   :  { %v4413_v11 = vadd.f32 %v2669_v47, %v7089_v28  ;;  %v2671_v48 = vpop.f32.mrb[83].mxu0  ;;  %v4149_v31 = vpop.f32.mrb[179].mxu1  ;;  %3498 = vmatmul.mubr.bf16.gmra.mrb[140].mxu0 %v3183_v54  ;;  %v3114_v55 = vmax.f32 %v4411_v59, 0.0 }
 0x3cf   :  { %v3004_v18 = vadd.f32 %v4147_v46, %v2843_v58  ;;  %v4414_v35 = vadd.f32 %v2671_v48, %v7092_v29  ;;  %v4150_v14 = vadd.f32 %v4149_v31, %v4148_v6  ;;  %4358 = vmatmul.mubr.bf16.gmra.mrb[220].mxu1 %v3185_v23  ;;  %v3115_v43 = vmax.f32 %v4412_v30, 0.0 }
 0x3d0   :  { %v3117_v27 = vmax.f32 %v4413_v11, 0.0  ;;  %v2859_v23 = vadd.f32 %v7061_v36, %v7095_v3 }
 0x3d1   :  { %v3118_v1 = vmax.f32 %v4414_v35, 0.0  ;;  %v3007_v56 = vadd.f32 %v4150_v14, %v2846_v60  ;;  %v3116_v24 = vmax.f32 %v3004_v18, 0.0 }
 0x3d2   :  { %v3186_v52 = vpack.c.bf16 %v3117_v27, %v3114_v55  ;;  %v2862_v27 = vadd.f32 %v7063_v22, %v7095_v3 }
 0x3d3   :  { %v3187_v7 = vpack.c.bf16 %v3118_v1, %v3115_v43  ;;  %v3119_v8 = vmax.f32 %v3007_v56, 0.0  ;;  %v2675_v0 = vpop.f32.mrb[84].mxu0  ;;  %v4151_v10 = vpop.f32.mrb[180].mxu1 }
 0x3d4   :  { %v4415_v16 = vadd.f32 %v2675_v0, %v7089_v28  ;;  %v2677_v13 = vpop.f32.mrb[85].mxu0  ;;  %v4152_v33 = vpop.f32.mrb[181].mxu1 }
 0x3d5   :  { %v4416_v61 = vadd.f32 %v2677_v13, %v7092_v29  ;;  %v4153_v62 = vadd.f32 %v4152_v33, %v4151_v10  ;;  %v2679_v9 = vpop.f32.mrb[86].mxu0  ;;  %v4154_v34 = vpop.f32.mrb[182].mxu1  ;;  %3505 = vmatprep.mubr.bf16.mxu0 %v3187_v7  ;;  %v3188_v25 = vpack.c.bf16 %v3119_v8, %v3116_v24 }
 0x3d6   :  { %v4417_v53 = vadd.f32 %v2679_v9, %v7089_v28  ;;  %v2681_v40 = vpop.f32.mrb[87].mxu0  ;;  %v4155_v41 = vpop.f32.mrb[183].mxu1  ;;  %3506 = vmatmul.mubr.bf16.gmra.mrb[144].mxu0 %v3186_v52  ;;  %v3120_v50 = vmax.f32 %v4415_v16, 0.0  ;;  %v2867_v9 = vadd.f32 %v7065_v38, %v7095_v3 }
 0x3d7   :  { %v3012_v21 = vadd.f32 %v4153_v62, %v2851_v32  ;;  %v4418_v54 = vadd.f32 %v2681_v40, %v7092_v29  ;;  %v4156_v19 = vadd.f32 %v4155_v41, %v4154_v34  ;;  %4361 = vmatprep.mubr.bf16.mxu1 %v3188_v25  ;;  %v3121_v51 = vmax.f32 %v4416_v61, 0.0 }
 0x3d8   :  { %v3123_v44 = vmax.f32 %v4417_v53, 0.0 }
 0x3d9   :  { %v3124_v26 = vmax.f32 %v4418_v54, 0.0  ;;  %v3015_v42 = vadd.f32 %v4156_v19, %v2854_v20  ;;  %v3122_v12 = vmax.f32 %v3012_v21, 0.0  ;;  %v2870_v19 = vadd.f32 %v7067_v37, %v7095_v3 }
 0x3da   :  { %v3189_v59 = vpack.c.bf16 %v3123_v44, %v3120_v50 }
 0x3db   :  { %v3190_v15 = vpack.c.bf16 %v3124_v26, %v3121_v51  ;;  %v3125_v58 = vmax.f32 %v3015_v42, 0.0  ;;  %v2685_v30 = vpop.f32.mrb[88].mxu0  ;;  %v4157_v46 = vpop.f32.mrb[184].mxu1 }
 0x3dc   :  { %v4419_v47 = vadd.f32 %v2685_v30, %v7089_v28  ;;  %v2687_v6 = vpop.f32.mrb[89].mxu0  ;;  %v4158_v39 = vpop.f32.mrb[185].mxu1 }
 0x3dd   :  { %v4420_v11 = vadd.f32 %v2687_v6, %v7092_v29  ;;  %v4159_v48 = vadd.f32 %v4158_v39, %v4157_v46  ;;  %v2689_v31 = vpop.f32.mrb[90].mxu0  ;;  %v4160_v60 = vpop.f32.mrb[186].mxu1  ;;  %3513 = vmatprep.mubr.bf16.mxu0 %v3190_v15  ;;  %v3191_v18 = vpack.c.bf16 %v3125_v58, %v3122_v12 }
 0x3de   :  { %v4421_v35 = vadd.f32 %v2689_v31, %v7089_v28  ;;  %v2691_v14 = vpop.f32.mrb[91].mxu0  ;;  %v4161_v55 = vpop.f32.mrb[187].mxu1  ;;  %3514 = vmatmul.mubr.bf16.gmra.mrb[148].mxu0 %v3189_v59  ;;  %v3126_v36 = vmax.f32 %v4419_v47, 0.0 }
 0x3df   :  { %v3020_v43 = vadd.f32 %v4159_v48, %v2859_v23  ;;  %v4422_v1 = vadd.f32 %v2691_v14, %v7092_v29  ;;  %v4162_v56 = vadd.f32 %v4161_v55, %v4160_v60  ;;  %4362 = vmatmul.mubr.bf16.gmra.mrb[224].mxu1 %v3191_v18  ;;  %v3127_v24 = vmax.f32 %v4420_v11, 0.0 }
 0x3e0   :  { %v3129_v52 = vmax.f32 %v4421_v35, 0.0  ;;  %v2875_v11 = vadd.f32 %v7069_v4, %v7095_v3 }
 0x3e1   :  { %v3130_v7 = vmax.f32 %v4422_v1, 0.0  ;;  %v3023_v8 = vadd.f32 %v4162_v56, %v2862_v27  ;;  %v3128_v10 = vmax.f32 %v3020_v43, 0.0  ;;  %v2878_v43 = vadd.f32 %v7071_v57, %v7095_v3 }
 0x3e2   :  { %v3192_v0 = vpack.c.bf16 %v3129_v52, %v3126_v36 }
 0x3e3   :  { %v3193_v16 = vpack.c.bf16 %v3130_v7, %v3127_v24  ;;  %v3131_v13 = vmax.f32 %v3023_v8, 0.0  ;;  %v2695_v33 = vpop.f32.mrb[92].mxu0  ;;  %v4163_v32 = vpop.f32.mrb[188].mxu1 }
 0x3e4   :  { %v4423_v61 = vadd.f32 %v2695_v33, %v7089_v28  ;;  %v2697_v62 = vpop.f32.mrb[93].mxu0  ;;  %v4164_v22 = vpop.f32.mrb[189].mxu1 }
 0x3e5   :  { %v4424_v34 = vadd.f32 %v2697_v62, %v7092_v29  ;;  %v4165_v25 = vadd.f32 %v4164_v22, %v4163_v32  ;;  %v2699_v53 = vpop.f32.mrb[94].mxu0  ;;  %v4166_v40 = vpop.f32.mrb[190].mxu1  ;;  %3521 = vmatprep.mubr.bf16.mxu0 %v3193_v16  ;;  %v3194_v41 = vpack.c.bf16 %v3131_v13, %v3128_v10  ;;  %v2883_v22 = vadd.f32 %v7073_v49, %v7095_v3 }
 0x3e6   :  { %v4425_v20 = vadd.f32 %v2699_v53, %v7089_v28  ;;  %v2701_v21 = vpop.f32.mrb[95].mxu0  ;;  %v4167_v54 = vpop.f32.mrb[191].mxu1  ;;  %3522 = vmatmul.mubr.bf16.gmra.mrb[152].mxu0 %v3192_v0  ;;  %v3132_v38 = vmax.f32 %v4423_v61, 0.0 }
 0x3e7   :  { %v3028_v50 = vadd.f32 %v4165_v25, %v2867_v9  ;;  %v4426_v44 = vadd.f32 %v2701_v21, %v7092_v29  ;;  %v4168_v51 = vadd.f32 %v4167_v54, %v4166_v40  ;;  %4365 = vmatprep.mubr.bf16.mxu1 %v3194_v41  ;;  %v3133_v42 = vmax.f32 %v4424_v34, 0.0 }
 0x3e8   :  { %v3135_v26 = vmax.f32 %v4425_v20, 0.0  ;;  %v2886_v54 = vadd.f32 %v7075_v45, %v7095_v3 }
 0x3e9   :  { %v3136_v59 = vmax.f32 %v4426_v44, 0.0  ;;  %v3031_v12 = vadd.f32 %v4168_v51, %v2870_v19  ;;  %v3134_v58 = vmax.f32 %v3028_v50, 0.0 }
 0x3ea   :  { %v3195_v15 = vpack.c.bf16 %v3135_v26, %v3132_v38 }
 0x3eb   :  { %v3196_v30 = vpack.c.bf16 %v3136_v59, %v3133_v42  ;;  %v3137_v46 = vmax.f32 %v3031_v12, 0.0  ;;  %v2705_v47 = vpop.f32.mrb[96].mxu0  ;;  %v4169_v6 = vpop.f32.mrb[192].mxu1 }
 0x3ec   :  { %v4427_v39 = vadd.f32 %v2705_v47, %v7089_v28  ;;  %v2707_v23 = vpop.f32.mrb[97].mxu0  ;;  %v4170_v37 = vpop.f32.mrb[193].mxu1 }
 0x3ed   :  { %v4428_v48 = vadd.f32 %v2707_v23, %v7092_v29  ;;  %v4171_v31 = vadd.f32 %v4170_v37, %v4169_v6  ;;  %v2709_v60 = vpop.f32.mrb[98].mxu0  ;;  %v4172_v18 = vpop.f32.mrb[194].mxu1  ;;  %3529 = vmatprep.mubr.bf16.mxu0 %v3196_v30  ;;  %v3197_v35 = vpack.c.bf16 %v3137_v46, %v3134_v58 }
 0x3ee   :  { %v4429_v14 = vadd.f32 %v2709_v60, %v7089_v28  ;;  %v2711_v55 = vpop.f32.mrb[99].mxu0  ;;  %v4173_v27 = vpop.f32.mrb[195].mxu1  ;;  %3530 = vmatmul.mubr.bf16.gmra.mrb[156].mxu0 %v3195_v15  ;;  %v3138_v4 = vmax.f32 %v4427_v39, 0.0  ;;  %v2891_v39 = vadd.f32 %v7077_v63, %v7095_v3 }
 0x3ef   :  { %v3036_v1 = vadd.f32 %v4171_v31, %v2875_v11  ;;  %v4430_v56 = vadd.f32 %v2711_v55, %v7092_v29  ;;  %v4174_v36 = vadd.f32 %v4173_v27, %v4172_v18  ;;  %4366 = vmatmul.mubr.bf16.gmra.mrb[228].mxu1 %v3197_v35  ;;  %v3139_v24 = vmax.f32 %v4428_v48, 0.0 }
 0x3f0   :  { %v3141_v52 = vmax.f32 %v4429_v14, 0.0  ;;  %v2894_v14 = vadd.f32 %v7079_v2, %v7095_v3 }
 0x3f1   :  { %v3142_v7 = vmax.f32 %v4430_v56, 0.0  ;;  %v3039_v8 = vadd.f32 %v4174_v36, %v2878_v43  ;;  %v3140_v10 = vmax.f32 %v3036_v1, 0.0 }
 0x3f2   :  { %v3198_v0 = vpack.c.bf16 %v3141_v52, %v3138_v4 }
 0x3f3   :  { %v3199_v16 = vpack.c.bf16 %v3142_v7, %v3139_v24  ;;  %v3143_v13 = vmax.f32 %v3039_v8, 0.0  ;;  %v2715_v33 = vpop.f32.mrb[100].mxu0  ;;  %v4175_v32 = vpop.f32.mrb[196].mxu1 }
 0x3f4   :  { %v4431_v61 = vadd.f32 %v2715_v33, %v7089_v28  ;;  %v2717_v62 = vpop.f32.mrb[101].mxu0  ;;  %v4176_v57 = vpop.f32.mrb[197].mxu1  ;;  %v2899_v33 = vadd.f32 %v7081_v17, %v7095_v3 }
 0x3f5   :  { %v4432_v9 = vadd.f32 %v2717_v62, %v7092_v29  ;;  %v4177_v34 = vadd.f32 %v4176_v57, %v4175_v32  ;;  %v2719_v25 = vpop.f32.mrb[102].mxu0  ;;  %v4178_v53 = vpop.f32.mrb[198].mxu1  ;;  %3537 = vmatprep.mubr.bf16.mxu0 %v3199_v16  ;;  %v3200_v40 = vpack.c.bf16 %v3143_v13, %v3140_v10 }
 0x3f6   :  { %v4433_v41 = vadd.f32 %v2719_v25, %v7089_v28  ;;  %v2721_v20 = vpop.f32.mrb[103].mxu0  ;;  %v4179_v21 = vpop.f32.mrb[199].mxu1  ;;  %3538 = vmatmul.mubr.bf16.gmra.mrb[160].mxu0 %v3198_v0  ;;  %v3144_v49 = vmax.f32 %v4431_v61, 0.0 }
 0x3f7   :  { %v3044_v19 = vadd.f32 %v4177_v34, %v2883_v22  ;;  %v4434_v50 = vadd.f32 %v2721_v20, %v7092_v29  ;;  %v4180_v44 = vadd.f32 %v4179_v21, %v4178_v53  ;;  %4369 = vmatprep.mubr.bf16.mxu1 %v3200_v40  ;;  %v3145_v38 = vmax.f32 %v4432_v9, 0.0 }
 0x3f8   :  { %v3147_v51 = vmax.f32 %v4433_v41, 0.0  ;;  %v2902_v53 = vadd.f32 %v7086_v5, %v7095_v3 }
 0x3f9   :  { %v3148_v26 = vmax.f32 %v4434_v50, 0.0  ;;  %v3047_v42 = vadd.f32 %v4180_v44, %v2886_v54  ;;  %v3146_v12 = vmax.f32 %v3044_v19, 0.0 }
 0x3fa   :  { %v3201_v59 = vpack.c.bf16 %v3147_v51, %v3144_v49 }
 0x3fb   :  { %v3202_v15 = vpack.c.bf16 %v3148_v26, %v3145_v38  ;;  %v3149_v58 = vmax.f32 %v3047_v42, 0.0  ;;  %v2725_v30 = vpop.f32.mrb[104].mxu0  ;;  %v4181_v46 = vpop.f32.mrb[200].mxu1 }
 0x3fc   :  { %v4435_v47 = vadd.f32 %v2725_v30, %v7089_v28  ;;  %v2727_v6 = vpop.f32.mrb[105].mxu0  ;;  %v4182_v45 = vpop.f32.mrb[201].mxu1 }
 0x3fd   :  { %v4436_v23 = vadd.f32 %v2727_v6, %v7092_v29  ;;  %v4183_v37 = vadd.f32 %v4182_v45, %v4181_v46  ;;  %v2729_v11 = vpop.f32.mrb[106].mxu0  ;;  %v4184_v48 = vpop.f32.mrb[202].mxu1  ;;  %3545 = vmatprep.mubr.bf16.mxu0 %v3202_v15  ;;  %v3203_v31 = vpack.c.bf16 %v3149_v58, %v3146_v12  ;;  %v7228_v12 = vld [vmem:[%s7282_s8] ss:$0 sm:$0xff]  ;;  %s4798_s8 = smov [#allocation5]  }
 0x3fe   :  { %v4437_v60 = vadd.f32 %v2729_v11, %v7089_v28  ;;  %v2731_v18 = vpop.f32.mrb[107].mxu0  ;;  %v4185_v35 = vpop.f32.mrb[203].mxu1  ;;  %3546 = vmatmul.mubr.bf16.gmra.mrb[164].mxu0 %v3201_v59  ;;  %v3150_v63 = vmax.f32 %v4435_v47, 0.0  ;;  %s3800_s2 = sshll.u32 %s4798_s8, 4  ;;  %s3801_s2 = int_to_ptr.vmem [resolvable:$true] %s3800_s2 }
 0x3ff   :  { %v3052_v55 = vadd.f32 %v4183_v37, %v2891_v39  ;;  %v4438_v27 = vadd.f32 %v2731_v18, %v7092_v29  ;;  %v4186_v43 = vadd.f32 %v4185_v35, %v4184_v48  ;;  %4370 = vmatmul.mubr.bf16.gmra.mrb[232].mxu1 %v3203_v31  ;;  %v3151_v56 = vmax.f32 %v4436_v23, 0.0  ;;  %s4767_s27 = scalar_lea.vmem %s3801_s2, 4096  ;;  %p4772_p9 = scmp.lt.s32.totalorder %s3801_s2, %s3801_s2 }
 0x400   :  { %v3153_v1 = vmax.f32 %v4437_v60, 0.0  ;;  %p4768_p8 = scmp.ne.s32.totalorder %s3801_s2, %s4767_s27  ;;  %p4773_p10 = scmp.lt.s32.totalorder %s4767_s27, %s4767_s27 }
 0x401   :  { %v3154_v36 = vmax.f32 %v4438_v27, 0.0  ;;  %v3055_v4 = vadd.f32 %v4186_v43, %v2894_v14  ;;  %v3152_v24 = vmax.f32 %v3052_v55, 0.0 }
 0x402   :  { %v3204_v52 = vpack.c.bf16 %v3153_v1, %v3150_v63  ;;  %p4774_p11 = por %p4773_p10, %p4772_p9 }
 0x403   :  { %v3205_v7 = vpack.c.bf16 %v3154_v36, %v3151_v56  ;;  %v3155_v8 = vmax.f32 %v3055_v4, 0.0  ;;  %v2735_v0 = vpop.f32.mrb[108].mxu0  ;;  %v4187_v10 = vpop.f32.mrb[204].mxu1 }
 0x404   :  { %v4439_v16 = vadd.f32 %v2735_v0, %v7089_v28  ;;  %v2737_v13 = vpop.f32.mrb[109].mxu0  ;;  %v4188_v2 = vpop.f32.mrb[205].mxu1  ;;  %p4775_p12 = pnand %p4774_p11, %p4768_p8 }
 0x405   :  { %v4440_v32 = vadd.f32 %v2737_v13, %v7092_v29  ;;  %v4189_v61 = vadd.f32 %v4188_v2, %v4187_v10  ;;  %v2739_v62 = vpop.f32.mrb[110].mxu0  ;;  %v4190_v57 = vpop.f32.mrb[206].mxu1  ;;  %3553 = vmatprep.mubr.bf16.mxu0 %v3205_v7  ;;  %v3206_v22 = vpack.c.bf16 %v3155_v8, %v3152_v24 }
 0x406   :  { %v4441_v9 = vadd.f32 %v2739_v62, %v7089_v28  ;;  %v2741_v34 = vpop.f32.mrb[111].mxu0  ;;  %v4191_v25 = vpop.f32.mrb[207].mxu1  ;;  %3554 = vmatmul.mubr.bf16.gmra.mrb[168].mxu0 %v3204_v52  ;;  %v3156_v17 = vmax.f32 %v4439_v16, 0.0 }
 0x407   :  { %v3060_v40 = vadd.f32 %v4189_v61, %v2899_v33  ;;  %v4442_v41 = vadd.f32 %v2741_v34, %v7092_v29  ;;  %v4192_v20 = vadd.f32 %v4191_v25, %v4190_v57  ;;  %4373 = vmatprep.mubr.bf16.mxu1 %v3206_v22  ;;  %v3157_v54 = vmax.f32 %v4440_v32, 0.0 }
 0x408   :  { %v3159_v21 = vmax.f32 %v4441_v9, 0.0 }
 0x409   :  { %v3160_v19 = vmax.f32 %v4442_v41, 0.0  ;;  %v3063_v50 = vadd.f32 %v4192_v20, %v2902_v53  ;;  %v3158_v49 = vmax.f32 %v3060_v40, 0.0 }
 0x40a   :  { %v3207_v44 = vpack.c.bf16 %v3159_v21, %v3156_v17 }
 0x40b   :  { %v3208_v51 = vpack.c.bf16 %v3160_v19, %v3157_v54  ;;  %v3161_v28 = vmax.f32 %v3063_v50, 0.0 }
 0x40d   :  { %3561 = vmatprep.mubr.bf16.mxu0 %v3208_v51  ;;  %v3209_v38 = vpack.c.bf16 %v3161_v28, %v3158_v49 }
 0x40e   :  { %3562 = vmatmul.mubr.bf16.gmra.mrb[172].mxu0 %v3207_v44 }
 0x40f   :  { %4374 = vmatmul.mubr.bf16.gmra.mrb[236].mxu1 %v3209_v38 }
 0x469   :  { %v4209_v26 = vpop.f32.mrb[112].mxu0 }
 0x46a   :  { %v4210_v5 = vpop.f32.mrb[113].mxu0 }
 0x46b   :  { %v4211_v3 = vadd.f32 %v4210_v5, %v4209_v26  ;;  %v4212_v42 = vpop.f32.mrb[114].mxu0 }
 0x46c   :  { %v4213_v29 = vpop.f32.mrb[115].mxu0 }
 0x46d   :  { %v4214_v59 = vadd.f32 %v4213_v29, %v4212_v42  ;;  %v3444_v46 = vadd.f32 %v4211_v3, %v7228_v12 }
 0x46f   :  { %v3447_v11 = vadd.f32 %v4214_v59, %v7228_v12 }
 0x471   :  { %v4215_v15 = vpop.f32.mrb[116].mxu0 }
 0x472   :  { %v4216_v58 = vpop.f32.mrb[117].mxu0  ;;  %v4347_v30 = vpop.f32.mrb[208].mxu1 }
 0x473   :  { %v4217_v47 = vadd.f32 %v4216_v58, %v4215_v15  ;;  %v4218_v6 = vpop.f32.mrb[118].mxu0  ;;  %v3604_v45 = vpop.f32.mrb[209].mxu1 }
 0x474   :  { %v3605_v39 = vadd.f32 %v3604_v45, %v3444_v46  ;;  %v4219_v23 = vpop.f32.mrb[119].mxu0  ;;  %v4348_v37 = vpop.f32.mrb[210].mxu1 }
 0x475   :  { %v3452_v48 = vadd.f32 %v4217_v47, %v7228_v12  ;;  %v4220_v31 = vadd.f32 %v4219_v23, %v4218_v6  ;;  %v3607_v60 = vpop.f32.mrb[211].mxu1 }
 0x476   :  { %4681 = vtanh.f32 %v3605_v39  ;;  %v3608_v18 = vadd.f32 %v3607_v60, %v3447_v11 }
 0x477   :  { %v3613_v35 = vadd.f32 %v4347_v30, %v3452_v48  ;;  %v3455_v14 = vadd.f32 %v4220_v31, %v7228_v12 }
 0x478   :  { %4683 = vtanh.f32 %v3608_v18 }
 0x479   :  { %4685 = vtanh.f32 %v3613_v35  ;;  %v3616_v55 = vadd.f32 %v4348_v37, %v3455_v14  ;;  %v4221_v27 = vpop.f32.mrb[120].mxu0 }
 0x47a   :  { %v4222_v43 = vpop.f32.mrb[121].mxu0 }
 0x47b   :  { %4687 = vtanh.f32 %v3616_v55  ;;  %v4223_v63 = vadd.f32 %v4222_v43, %v4221_v27  ;;  %v4224_v1 = vpop.f32.mrb[122].mxu0 }
 0x47c   :  { %v4225_v56 = vpop.f32.mrb[123].mxu0 }
 0x47d   :  { %v4226_v36 = vadd.f32 %v4225_v56, %v4224_v1  ;;  %v3460_v0 = vadd.f32 %v4223_v63, %v7228_v12 }
 0x47f   :  { %v3463_v62 = vadd.f32 %v4226_v36, %v7228_v12 }
 0x480   :  { %v4682_v4 = vpop.eup %4681 }
 0x481   :  { %3763 = vst [vmem:[#allocation5] sm:$0xff] %v4682_v4  ;;  %v4227_v52 = vpop.f32.mrb[124].mxu0 }
 0x482   :  { %v4684_v24 = vpop.eup %4683  ;;  %v4228_v7 = vpop.f32.mrb[125].mxu0 }
 0x483   :  { %v4351_v8 = vpop.f32.mrb[212].mxu1  ;;  %v4686_v10 = vpop.eup %4685  ;;  %3764 = vst [vmem:[#allocation5 + $0x8] sm:$0xff] %v4684_v24  ;;  %v4229_v16 = vadd.f32 %v4228_v7, %v4227_v52 }
 0x484   :  { %v4230_v13 = vpop.f32.mrb[126].mxu0  ;;  %v3620_v2 = vpop.f32.mrb[213].mxu1  ;;  %3765 = vst [vmem:[#allocation5 + $0x10] sm:$0xff] %v4686_v10 }
 0x485   :  { %v3621_v33 = vadd.f32 %v3620_v2, %v3460_v0  ;;  %v4231_v32 = vpop.f32.mrb[127].mxu0  ;;  %v4352_v61 = vpop.f32.mrb[214].mxu1  ;;  %v3468_v22 = vadd.f32 %v4229_v16, %v7228_v12 }
 0x486   :  { %v4688_v57 = vpop.eup %4687  ;;  %v4232_v9 = vadd.f32 %v4231_v32, %v4230_v13  ;;  %v3623_v34 = vpop.f32.mrb[215].mxu1 }
 0x487   :  { %3766 = vst [vmem:[#allocation5 + $0x18] sm:$0xff] %v4688_v57  ;;  %4689 = vtanh.f32 %v3621_v33  ;;  %v3624_v25 = vadd.f32 %v3623_v34, %v3463_v62  ;;  %v3629_v53 = vadd.f32 %v4351_v8, %v3468_v22 }
 0x488   :  { %v3471_v40 = vadd.f32 %v4232_v9, %v7228_v12 }
 0x489   :  { %4691 = vtanh.f32 %v3624_v25  ;;  %v4233_v20 = vpop.f32.mrb[128].mxu0 }
 0x48a   :  { %4693 = vtanh.f32 %v3629_v53  ;;  %v3632_v41 = vadd.f32 %v4352_v61, %v3471_v40  ;;  %v4234_v17 = vpop.f32.mrb[129].mxu0 }
 0x48b   :  { %v4235_v21 = vadd.f32 %v4234_v17, %v4233_v20  ;;  %v4236_v54 = vpop.f32.mrb[130].mxu0 }
 0x48c   :  { %4695 = vtanh.f32 %v3632_v41  ;;  %v4237_v19 = vpop.f32.mrb[131].mxu0 }
 0x48d   :  { %v4238_v50 = vadd.f32 %v4237_v19, %v4236_v54  ;;  %v3476_v26 = vadd.f32 %v4235_v21, %v7228_v12 }
 0x48f   :  { %v3479_v30 = vadd.f32 %v4238_v50, %v7228_v12 }
 0x491   :  { %v4690_v44 = vpop.eup %4689  ;;  %v4239_v49 = vpop.f32.mrb[132].mxu0 }
 0x492   :  { %3767 = vst [vmem:[#allocation5 + $0x20] sm:$0xff] %v4690_v44  ;;  %v4240_v28 = vpop.f32.mrb[133].mxu0  ;;  %v4355_v38 = vpop.f32.mrb[216].mxu1 }
 0x493   :  { %v4692_v51 = vpop.eup %4691  ;;  %v4241_v3 = vadd.f32 %v4240_v28, %v4239_v49  ;;  %v4242_v42 = vpop.f32.mrb[134].mxu0 }
 0x494   :  { %v4694_v5 = vpop.eup %4693  ;;  %3768 = vst [vmem:[#allocation5 + $0x28] sm:$0xff] %v4692_v51  ;;  %v3636_v29 = vpop.f32.mrb[217].mxu1 }
 0x495   :  { %3769 = vst [vmem:[#allocation5 + $0x30] sm:$0xff] %v4694_v5  ;;  %v3637_v59 = vadd.f32 %v3636_v29, %v3476_v26  ;;  %v4243_v15 = vpop.f32.mrb[135].mxu0  ;;  %v4356_v58 = vpop.f32.mrb[218].mxu1  ;;  %v3484_v47 = vadd.f32 %v4241_v3, %v7228_v12 }
 0x496   :  { %v4696_v46 = vpop.eup %4695  ;;  %v4244_v6 = vadd.f32 %v4243_v15, %v4242_v42  ;;  %v3639_v45 = vpop.f32.mrb[219].mxu1 }
 0x497   :  { %3770 = vst [vmem:[#allocation5 + $0x38] sm:$0xff] %v4696_v46  ;;  %4697 = vtanh.f32 %v3637_v59  ;;  %v3640_v39 = vadd.f32 %v3639_v45, %v3479_v30  ;;  %v3645_v23 = vadd.f32 %v4355_v38, %v3484_v47 }
 0x498   :  { %v3487_v37 = vadd.f32 %v4244_v6, %v7228_v12 }
 0x499   :  { %4699 = vtanh.f32 %v3640_v39  ;;  %v4245_v48 = vpop.f32.mrb[136].mxu0 }
 0x49a   :  { %4701 = vtanh.f32 %v3645_v23  ;;  %v3648_v11 = vadd.f32 %v4356_v58, %v3487_v37  ;;  %v4246_v31 = vpop.f32.mrb[137].mxu0 }
 0x49b   :  { %v4247_v60 = vadd.f32 %v4246_v31, %v4245_v48  ;;  %v4248_v18 = vpop.f32.mrb[138].mxu0 }
 0x49c   :  { %4703 = vtanh.f32 %v3648_v11  ;;  %v4249_v35 = vpop.f32.mrb[139].mxu0 }
 0x49d   :  { %v4250_v14 = vadd.f32 %v4249_v35, %v4248_v18  ;;  %v3492_v56 = vadd.f32 %v4247_v60, %v7228_v12 }
 0x49f   :  { %v3495_v10 = vadd.f32 %v4250_v14, %v7228_v12 }
 0x4a1   :  { %v4698_v55 = vpop.eup %4697  ;;  %v4251_v27 = vpop.f32.mrb[140].mxu0 }
 0x4a2   :  { %3771 = vst [vmem:[#allocation5 + $0x40] sm:$0xff] %v4698_v55  ;;  %v4252_v63 = vpop.f32.mrb[141].mxu0  ;;  %v4359_v1 = vpop.f32.mrb[220].mxu1 }
 0x4a3   :  { %v4700_v43 = vpop.eup %4699  ;;  %v4253_v4 = vadd.f32 %v4252_v63, %v4251_v27  ;;  %v4254_v52 = vpop.f32.mrb[142].mxu0 }
 0x4a4   :  { %v4702_v36 = vpop.eup %4701  ;;  %3772 = vst [vmem:[#allocation5 + $0x48] sm:$0xff] %v4700_v43  ;;  %v3652_v24 = vpop.f32.mrb[221].mxu1 }
 0x4a5   :  { %3773 = vst [vmem:[#allocation5 + $0x50] sm:$0xff] %v4702_v36  ;;  %v3653_v7 = vadd.f32 %v3652_v24, %v3492_v56  ;;  %v4255_v8 = vpop.f32.mrb[143].mxu0  ;;  %v4360_v0 = vpop.f32.mrb[222].mxu1  ;;  %v3500_v13 = vadd.f32 %v4253_v4, %v7228_v12 }
 0x4a6   :  { %v4704_v16 = vpop.eup %4703  ;;  %v4256_v2 = vadd.f32 %v4255_v8, %v4254_v52  ;;  %v3655_v33 = vpop.f32.mrb[223].mxu1 }
 0x4a7   :  { %3774 = vst [vmem:[#allocation5 + $0x58] sm:$0xff] %v4704_v16  ;;  %4705 = vtanh.f32 %v3653_v7  ;;  %v3656_v32 = vadd.f32 %v3655_v33, %v3495_v10  ;;  %v3661_v61 = vadd.f32 %v4359_v1, %v3500_v13 }
 0x4a8   :  { %v3503_v62 = vadd.f32 %v4256_v2, %v7228_v12 }
 0x4a9   :  { %4707 = vtanh.f32 %v3656_v32  ;;  %v4257_v22 = vpop.f32.mrb[144].mxu0 }
 0x4aa   :  { %4709 = vtanh.f32 %v3661_v61  ;;  %v3664_v57 = vadd.f32 %v4360_v0, %v3503_v62  ;;  %v4258_v9 = vpop.f32.mrb[145].mxu0 }
 0x4ab   :  { %v4259_v34 = vadd.f32 %v4258_v9, %v4257_v22  ;;  %v4260_v25 = vpop.f32.mrb[146].mxu0 }
 0x4ac   :  { %4711 = vtanh.f32 %v3664_v57  ;;  %v4261_v53 = vpop.f32.mrb[147].mxu0 }
 0x4ad   :  { %v4262_v40 = vadd.f32 %v4261_v53, %v4260_v25  ;;  %v3508_v19 = vadd.f32 %v4259_v34, %v7228_v12 }
 0x4af   :  { %v3511_v5 = vadd.f32 %v4262_v40, %v7228_v12 }
 0x4b1   :  { %v4706_v41 = vpop.eup %4705  ;;  %v4263_v20 = vpop.f32.mrb[148].mxu0 }
 0x4b2   :  { %3775 = vst [vmem:[#allocation5 + $0x60] sm:$0xff] %v4706_v41  ;;  %v4264_v21 = vpop.f32.mrb[149].mxu0  ;;  %v4363_v54 = vpop.f32.mrb[224].mxu1 }
 0x4b3   :  { %v4708_v17 = vpop.eup %4707  ;;  %v4265_v44 = vadd.f32 %v4264_v21, %v4263_v20  ;;  %v4266_v49 = vpop.f32.mrb[150].mxu0 }
 0x4b4   :  { %v4710_v50 = vpop.eup %4709  ;;  %3776 = vst [vmem:[#allocation5 + $0x68] sm:$0xff] %v4708_v17  ;;  %v3668_v51 = vpop.f32.mrb[225].mxu1 }
 0x4b5   :  { %3777 = vst [vmem:[#allocation5 + $0x70] sm:$0xff] %v4710_v50  ;;  %v3669_v28 = vadd.f32 %v3668_v51, %v3508_v19  ;;  %v4267_v38 = vpop.f32.mrb[151].mxu0  ;;  %v4364_v26 = vpop.f32.mrb[226].mxu1  ;;  %v3516_v42 = vadd.f32 %v4265_v44, %v7228_v12 }
 0x4b6   :  { %v4712_v3 = vpop.eup %4711  ;;  %v4268_v29 = vadd.f32 %v4267_v38, %v4266_v49  ;;  %v3671_v59 = vpop.f32.mrb[227].mxu1 }
 0x4b7   :  { %3778 = vst [vmem:[#allocation5 + $0x78] sm:$0xff] %v4712_v3  ;;  %4713 = vtanh.f32 %v3669_v28  ;;  %v3672_v15 = vadd.f32 %v3671_v59, %v3511_v5  ;;  %v3677_v58 = vadd.f32 %v4363_v54, %v3516_v42 }
 0x4b8   :  { %v3519_v30 = vadd.f32 %v4268_v29, %v7228_v12 }
 0x4b9   :  { %4715 = vtanh.f32 %v3672_v15  ;;  %v4269_v47 = vpop.f32.mrb[152].mxu0 }
 0x4ba   :  { %4717 = vtanh.f32 %v3677_v58  ;;  %v3680_v46 = vadd.f32 %v4364_v26, %v3519_v30  ;;  %v4270_v6 = vpop.f32.mrb[153].mxu0 }
 0x4bb   :  { %v4271_v45 = vadd.f32 %v4270_v6, %v4269_v47  ;;  %v4272_v39 = vpop.f32.mrb[154].mxu0 }
 0x4bc   :  { %4719 = vtanh.f32 %v3680_v46  ;;  %v4273_v23 = vpop.f32.mrb[155].mxu0 }
 0x4bd   :  { %v4274_v37 = vadd.f32 %v4273_v23, %v4272_v39  ;;  %v3524_v35 = vadd.f32 %v4271_v45, %v7228_v12 }
 0x4bf   :  { %v3527_v36 = vadd.f32 %v4274_v37, %v7228_v12 }
 0x4c1   :  { %v4714_v11 = vpop.eup %4713  ;;  %v4275_v48 = vpop.f32.mrb[156].mxu0 }
 0x4c2   :  { %3779 = vst [vmem:[#allocation5 + $0x80] sm:$0xff] %v4714_v11  ;;  %v4276_v60 = vpop.f32.mrb[157].mxu0  ;;  %v4367_v18 = vpop.f32.mrb[228].mxu1 }
 0x4c3   :  { %v4716_v31 = vpop.eup %4715  ;;  %v4277_v55 = vadd.f32 %v4276_v60, %v4275_v48  ;;  %v4278_v27 = vpop.f32.mrb[158].mxu0 }
 0x4c4   :  { %v4718_v14 = vpop.eup %4717  ;;  %3780 = vst [vmem:[#allocation5 + $0x88] sm:$0xff] %v4716_v31  ;;  %v3684_v43 = vpop.f32.mrb[229].mxu1 }
 0x4c5   :  { %3781 = vst [vmem:[#allocation5 + $0x90] sm:$0xff] %v4718_v14  ;;  %v3685_v63 = vadd.f32 %v3684_v43, %v3524_v35  ;;  %v4279_v1 = vpop.f32.mrb[159].mxu0  ;;  %v4368_v56 = vpop.f32.mrb[230].mxu1  ;;  %v3532_v52 = vadd.f32 %v4277_v55, %v7228_v12 }
 0x4c6   :  { %v4720_v4 = vpop.eup %4719  ;;  %v4280_v24 = vadd.f32 %v4279_v1, %v4278_v27  ;;  %v3687_v7 = vpop.f32.mrb[231].mxu1 }
 0x4c7   :  { %3782 = vst [vmem:[#allocation5 + $0x98] sm:$0xff] %v4720_v4  ;;  %4721 = vtanh.f32 %v3685_v63  ;;  %v3688_v8 = vadd.f32 %v3687_v7, %v3527_v36  ;;  %v3693_v0 = vadd.f32 %v4367_v18, %v3532_v52 }
 0x4c8   :  { %v3535_v10 = vadd.f32 %v4280_v24, %v7228_v12 }
 0x4c9   :  { %4723 = vtanh.f32 %v3688_v8  ;;  %v4281_v13 = vpop.f32.mrb[160].mxu0 }
 0x4ca   :  { %4725 = vtanh.f32 %v3693_v0  ;;  %v3696_v16 = vadd.f32 %v4368_v56, %v3535_v10  ;;  %v4282_v2 = vpop.f32.mrb[161].mxu0 }
 0x4cb   :  { %v4283_v33 = vadd.f32 %v4282_v2, %v4281_v13  ;;  %v4284_v32 = vpop.f32.mrb[162].mxu0 }
 0x4cc   :  { %4727 = vtanh.f32 %v3696_v16  ;;  %v4285_v61 = vpop.f32.mrb[163].mxu0 }
 0x4cd   :  { %v4286_v62 = vadd.f32 %v4285_v61, %v4284_v32  ;;  %v3540_v53 = vadd.f32 %v4283_v33, %v7228_v12 }
 0x4cf   :  { %v3543_v50 = vadd.f32 %v4286_v62, %v7228_v12 }
 0x4d1   :  { %v4722_v57 = vpop.eup %4721  ;;  %v4287_v22 = vpop.f32.mrb[164].mxu0 }
 0x4d2   :  { %3783 = vst [vmem:[#allocation5 + $0xa0] sm:$0xff] %v4722_v57  ;;  %v4288_v34 = vpop.f32.mrb[165].mxu0  ;;  %v4371_v25 = vpop.f32.mrb[232].mxu1 }
 0x4d3   :  { %v4724_v9 = vpop.eup %4723  ;;  %v4289_v41 = vadd.f32 %v4288_v34, %v4287_v22  ;;  %v4290_v20 = vpop.f32.mrb[166].mxu0 }
 0x4d4   :  { %v4726_v40 = vpop.eup %4725  ;;  %3784 = vst [vmem:[#allocation5 + $0xa8] sm:$0xff] %v4724_v9  ;;  %v3700_v17 = vpop.f32.mrb[233].mxu1 }
 0x4d5   :  { %3785 = vst [vmem:[#allocation5 + $0xb0] sm:$0xff] %v4726_v40  ;;  %v3701_v21 = vadd.f32 %v3700_v17, %v3540_v53  ;;  %v4291_v54 = vpop.f32.mrb[167].mxu0  ;;  %v4372_v19 = vpop.f32.mrb[234].mxu1  ;;  %v3548_v49 = vadd.f32 %v4289_v41, %v7228_v12 }
 0x4d6   :  { %v4728_v44 = vpop.eup %4727  ;;  %v4292_v51 = vadd.f32 %v4291_v54, %v4290_v20  ;;  %v3703_v28 = vpop.f32.mrb[235].mxu1 }
 0x4d7   :  { %3786 = vst [vmem:[#allocation5 + $0xb8] sm:$0xff] %v4728_v44  ;;  %4729 = vtanh.f32 %v3701_v21  ;;  %v3704_v38 = vadd.f32 %v3703_v28, %v3543_v50  ;;  %v3709_v26 = vadd.f32 %v4371_v25, %v3548_v49 }
 0x4d8   :  { %v3551_v5 = vadd.f32 %v4292_v51, %v7228_v12 }
 0x4d9   :  { %4731 = vtanh.f32 %v3704_v38  ;;  %v4293_v42 = vpop.f32.mrb[168].mxu0 }
 0x4da   :  { %4733 = vtanh.f32 %v3709_v26  ;;  %v3712_v3 = vadd.f32 %v4372_v19, %v3551_v5  ;;  %v4294_v29 = vpop.f32.mrb[169].mxu0 }
 0x4db   :  { %v4295_v59 = vadd.f32 %v4294_v29, %v4293_v42  ;;  %v4296_v15 = vpop.f32.mrb[170].mxu0 }
 0x4dc   :  { %4735 = vtanh.f32 %v3712_v3  ;;  %v4297_v58 = vpop.f32.mrb[171].mxu0 }
 0x4dd   :  { %v4298_v30 = vadd.f32 %v4297_v58, %v4296_v15  ;;  %v3556_v23 = vadd.f32 %v4295_v59, %v7228_v12 }
 0x4df   :  { %v3559_v14 = vadd.f32 %v4298_v30, %v7228_v12 }
 0x4e1   :  { %v4730_v46 = vpop.eup %4729  ;;  %v4299_v47 = vpop.f32.mrb[172].mxu0 }
 0x4e2   :  { %3787 = vst [vmem:[#allocation5 + $0xc0] sm:$0xff] %v4730_v46  ;;  %v4300_v45 = vpop.f32.mrb[173].mxu0  ;;  %v4375_v39 = vpop.f32.mrb[236].mxu1 }
 0x4e3   :  { %v4732_v6 = vpop.eup %4731  ;;  %v4301_v11 = vadd.f32 %v4300_v45, %v4299_v47  ;;  %v4302_v48 = vpop.f32.mrb[174].mxu0 }
 0x4e4   :  { %v4734_v37 = vpop.eup %4733  ;;  %3788 = vst [vmem:[#allocation5 + $0xc8] sm:$0xff] %v4732_v6  ;;  %v3716_v31 = vpop.f32.mrb[237].mxu1 }
 0x4e5   :  { %3789 = vst [vmem:[#allocation5 + $0xd0] sm:$0xff] %v4734_v37  ;;  %v3717_v60 = vadd.f32 %v3716_v31, %v3556_v23  ;;  %v4303_v18 = vpop.f32.mrb[175].mxu0  ;;  %v4376_v35 = vpop.f32.mrb[238].mxu1  ;;  %v3564_v27 = vadd.f32 %v4301_v11, %v7228_v12 }
 0x4e6   :  { %v4736_v55 = vpop.eup %4735  ;;  %v4304_v43 = vadd.f32 %v4303_v18, %v4302_v48  ;;  %v3719_v63 = vpop.f32.mrb[239].mxu1 }
 0x4e7   :  { %3790 = vst [vmem:[#allocation5 + $0xd8] sm:$0xff] %v4736_v55  ;;  %4737 = vtanh.f32 %v3717_v60  ;;  %v3720_v1 = vadd.f32 %v3719_v63, %v3559_v14  ;;  %v3725_v56 = vadd.f32 %v4375_v39, %v3564_v27 }
 0x4e8   :  { %v3567_v36 = vadd.f32 %v4304_v43, %v7228_v12 }
 0x4e9   :  { %4739 = vtanh.f32 %v3720_v1 }
 0x4ea   :  { %4741 = vtanh.f32 %v3725_v56  ;;  %v3728_v4 = vadd.f32 %v4376_v35, %v3567_v36 }
 0x4ec   :  { %4743 = vtanh.f32 %v3728_v4 }
 0x4f1   :  { %v4738_v52 = vpop.eup %4737 }
 0x4f2   :  { %3791 = vst [vmem:[#allocation5 + $0xe0] sm:$0xff] %v4738_v52 }
 0x4f3   :  { %v4740_v24 = vpop.eup %4739 }
 0x4f4   :  { %v4742_v7 = vpop.eup %4741  ;;  %3792 = vst [vmem:[#allocation5 + $0xe8] sm:$0xff] %v4740_v24 }
 0x4f5   :  { %3793 = vst [vmem:[#allocation5 + $0xf0] sm:$0xff] %v4742_v7 }
 0x4f6   :  { %v4744_v8 = vpop.eup %4743 }
 0x4f7   :  { %3794 = vst [vmem:[#allocation5 + $0xf8] sm:$0xff] %v4744_v8 }
 0x4f8   :  { %4778 = shalt.err (!%p4775_p12)
}
 0x4f9   :  { %s4779_s4 = scalar_lea.hbm %s7283_s9, 4096 }
 0x4fa   :  { %p4780_p13 = scmp.ne.s32.totalorder %s7283_s9, %s4779_s4  ;;  %p4783_p0 = scmp.lt.u32.totalorder %s4779_s4, %s7283_s9 }
 0x4fc   :  { %p4785_p1 = pnand %p4783_p0, %p4780_p13 }
 0x4fe   :  { %4788 = shalt.err (!%p4785_p1)
}
 0x4ff   :  { %s4799_s11 = smov 128   ;;  %s4800_s12 = smov 8  }
 0x500   :  { %3806 = dma.vmem_to_hbm [thread:$0]  %s3801_s2, 4096, %s7283_s9, [#allocation4], %s4799_s11, %s4799_s11, %s4800_s12  }
 0x501   :  { %4791 = dma.done.wait [#allocation4], 4096  }
 0x502   :  { %4792 = vsyncadd [#allocation4], 4294963200 }
 0x503   :  { %3810 = vsyncpa [#allocation3], 1 }
 0x504   :  { %3811 = vsyncpa [#allocation4], 1 }

</bundles_post_ra>
